<compile_context>
chip_gen: v5e
topology: v5e:2x2
jax: 0.10.0
libtpu: 0.0.40
codegen_flags: <defaults>
</compile_context>

<pallas_src>
import functools

import jax
import jax.numpy as jnp
from jax.experimental import pallas as pl
from jax.experimental.pallas import tpu as pltpu


def _self_attn_kernel(x_ref, w_in_ref, b_in_ref, w_out_ref, b_out_ref,
                      ln_w_ref, ln_b_ref, o_ref, *, num_heads, eps,
                      layer_norm, batch_block):
    """Channel-major self-attention + layer norm for `batch_block` images.

    x_ref:     (bblk, C, S)  tokens, channel-major (S on lanes)
    w_in_ref:  (3C, C)  bf16  in_proj_weight with 1/sqrt(hd) folded into Q rows
    b_in_ref:  (3C, 1)  f32   in_proj_bias   (Q rows pre-scaled)
    w_out_ref: (C, C)   bf16  out_proj.weight
    b_out_ref: (C, 1)   f32   out_proj.bias
    ln_w_ref:  (C, 1)   f32   LayerNorm weight
    ln_b_ref:  (C, 1)   f32   LayerNorm bias
    o_ref:     (bblk, C, S)
    """
    C = w_out_ref.shape[0]
    hd = C // num_heads

    for b in range(batch_block):                       # static, small unroll
        x = x_ref[b].astype(jnp.bfloat16)              # (C, S)
        S = x.shape[-1]

        # QKV projection, channel-major: (3C, C) @ (C, S) -> (3C, S).
        qkv = jnp.dot(w_in_ref[...], x,
                      preferred_element_type=jnp.float32) + b_in_ref[...]
        qkv = qkv.reshape(3 * num_heads, hd, S)        # free: leading-dim split

        # (nh, S, hd) for Q so both attention einsums are canonical batched
        # matmuls; K/V stay (nh, hd, S).
        q = jnp.swapaxes(qkv[:num_heads], 1, 2).astype(jnp.bfloat16)
        k = qkv[num_heads:2 * num_heads].astype(jnp.bfloat16)
        v = qkv[2 * num_heads:].astype(jnp.bfloat16)

        # Scores for all heads at once: (nh, Sq, Sk).  Scale already folded
        # into the Q projection weights.
        s = jnp.einsum('nqd,ndk->nqk', q, k,
                       preferred_element_type=jnp.float32)

        # Unnormalized softmax (normalize after P@V).
        m = jnp.max(s, axis=-1, keepdims=True)
        e = jnp.exp(s - m)
        l = jnp.sum(e, axis=-1, keepdims=True)         # (nh, Sq, 1)
        p = e.astype(jnp.bfloat16)

        # Context, channel-major per head: (nh, hd, Sq).
        ctx = jnp.einsum('ndk,nqk->ndq', v, p,
                         preferred_element_type=jnp.float32)
        inv_l = jax.lax.transpose(pl.reciprocal(l, approx=True), (0, 2, 1))
        ctx = ctx * inv_l                              # (nh, 1, Sq) broadcast
        ctx = ctx.reshape(C, S).astype(jnp.bfloat16)   # merge heads (free)

        # Output projection: (C, C) @ (C, S) -> (C, S).
        out = jnp.dot(w_out_ref[...], ctx,
                      preferred_element_type=jnp.float32) + b_out_ref[...]

        if layer_norm:
            # Normalize over channels = sublane axis (axis 0); f32 throughout.
            mu = jnp.mean(out, axis=0, keepdims=True)
            var = jnp.mean(jnp.square(out - mu), axis=0, keepdims=True)
            out = (out - mu) * jax.lax.rsqrt(var + eps)
            out = out * ln_w_ref[...] + ln_b_ref[...]

        o_ref[b] = out


def self_attention_2d(x, params, *, num_heads, layer_norm=True, eps=1e-5,
                      batch_block=None):
    """x: (B, C, H, W) float32 -> (B, C, H, W) float32."""
    B, C, H, W = x.shape
    S = H * W
    x_seq = x.reshape(B, C, S)                         # free reshape, NO transpose

    hd = C // num_heads
    scale = 1.0 / float(hd) ** 0.5

    # Fold the 1/sqrt(hd) query scale into the Q rows of the in-projection
    # (one-time weight transform); cast matmul weights to bf16.
    row_scale = jnp.concatenate(
        [jnp.full((C,), scale, jnp.float32), jnp.ones((2 * C,), jnp.float32)])
    w_in = (params["in_proj_weight"] * row_scale[:, None]).astype(jnp.bfloat16)
    b_in = (params["in_proj_bias"] * row_scale).reshape(3 * C, 1)
    w_out = params["out_proj_weight"].astype(jnp.bfloat16)        # (C, C)
    b_out = params["out_proj_bias"].reshape(C, 1)
    ln_w = params["ln_weight"].reshape(C, 1)
    ln_b = params["ln_bias"].reshape(C, 1)

    if batch_block is None:
        # Fold several batch elements into one grid step to amortize the
        # ~0.35us/step pipeline overhead, while keeping the VMEM tile small.
        # (On v7x, if the resulting grid length is 1 and B is large, a smaller
        # batch_block keeps both TensorCores busy.)
        batch_block = max(d for d in range(1, B + 1)
                          if B % d == 0 and d * S <= 1024)
    bblk = batch_block
    assert B % bblk == 0, "batch_block must divide the batch size"
    grid = (B // bblk,)

    kernel = functools.partial(_self_attn_kernel, num_heads=num_heads,
                               eps=eps, layer_norm=layer_norm,
                               batch_block=bblk)

    def full(shape):
        return pl.BlockSpec(shape, lambda g: tuple(0 for _ in shape))

    out_seq = pl.pallas_call(
        kernel,
        out_shape=jax.ShapeDtypeStruct((B, C, S), jnp.float32),
        grid_spec=pltpu.PrefetchScalarGridSpec(
            num_scalar_prefetch=0,
            grid=grid,
            in_specs=[
                pl.BlockSpec((bblk, C, S), lambda g: (g, 0, 0)),  # x
                full((3 * C, C)),                                 # W_in (scaled)
                full((3 * C, 1)),                                 # b_in
                full((C, C)),                                     # W_out
                full((C, 1)),                                     # b_out
                full((C, 1)),                                     # ln_w
                full((C, 1)),                                     # ln_b
            ],
            out_specs=pl.BlockSpec((bblk, C, S), lambda g: (g, 0, 0)),
        ),
        compiler_params=pltpu.CompilerParams(
            dimension_semantics=("parallel",)),
    )(x_seq, w_in, b_in, w_out, b_out, ln_w, ln_b)

    return out_seq.reshape(B, C, H, W)                 # free reshape, NO transpose


def _reference(x, params, *, num_heads, layer_norm=True, eps=1e-5):
    """Pure-JAX f32 reference mirroring torch.nn.MultiheadAttention + LayerNorm."""
    B, C, H, W = x.shape
    S = H * W
    t = jnp.transpose(x.reshape(B, C, S), (0, 2, 1))              # (B, S, C)
    qkv = t @ params["in_proj_weight"].T + params["in_proj_bias"]
    q, k, v = qkv[..., :C], qkv[..., C:2 * C], qkv[..., 2 * C:]
    hd = C // num_heads

    def heads(a):  # (B, S, C) -> (B, nh, S, hd)
        return jnp.transpose(a.reshape(B, S, num_heads, hd), (0, 2, 1, 3))

    qh, kh, vh = heads(q), heads(k), heads(v)
    s = jnp.einsum("bhqd,bhkd->bhqk", qh, kh) / jnp.sqrt(hd)
    p = jax.nn.softmax(s, axis=-1)
    ctx = jnp.einsum("bhqk,bhkd->bhqd", p, vh)
    ctx = jnp.transpose(ctx, (0, 2, 1, 3)).reshape(B, S, C)
    out = ctx @ params["out_proj_weight"].T + params["out_proj_bias"]
    if layer_norm:
        mu = jnp.mean(out, axis=-1, keepdims=True)
        var = jnp.mean((out - mu) ** 2, axis=-1, keepdims=True)
        out = (out - mu) / jnp.sqrt(var + eps)
        out = out * params["ln_weight"] + params["ln_bias"]
    return jnp.transpose(out, (0, 2, 1)).reshape(B, C, H, W)


def make_params(key, C):
    """Deterministic synthetic parameters with PyTorch's shapes."""
    k1, k2, k3, k4 = jax.random.split(key, 4)
    lim_in = 1.0 / jnp.sqrt(C)
    return {
        # nn.MultiheadAttention: in_proj_weight (3C, C), in_proj_bias (3C,)
        "in_proj_weight": jax.random.uniform(k1, (3 * C, C), jnp.float32,
                                             -lim_in, lim_in),
        "in_proj_bias": jax.random.uniform(k2, (3 * C,), jnp.float32,
                                           -lim_in, lim_in),
        # out_proj: Linear(C, C)
        "out_proj_weight": jax.random.uniform(k3, (C, C), jnp.float32,
                                              -lim_in, lim_in),
        "out_proj_bias": jax.random.uniform(k4, (C,), jnp.float32,
                                            -lim_in, lim_in),
        # nn.LayerNorm(C)
        "ln_weight": jnp.ones((C,), jnp.float32),
        "ln_bias": jnp.zeros((C,), jnp.float32),
    }


if __name__ == "__main__":
    B, C, H, W = 2, 32, 8, 8          # in_c=32, H=W=8  -> S=64 tokens
    num_heads = 4

    key = jax.random.PRNGKey(0)
    kx, kp = jax.random.split(key)
    x = jax.random.normal(kx, (B, C, H, W), jnp.float32)
    params = make_params(kp, C)

    out = self_attention_2d(x, params, num_heads=num_heads, layer_norm=True)
    out = jax.block_until_ready(out)

    ref = jax.block_until_ready(
        _reference(x, params, num_heads=num_heads, layer_norm=True))

    assert out.shape == (B, C, H, W)
    # bf16 MXU operands + EUP approx-reciprocal vs f32 reference: tolerance
    # sized for bf16 input quantization (outputs are LayerNorm-normalized).
    max_err = float(jnp.max(jnp.abs(out - ref)))
    assert jnp.allclose(out, ref, atol=3e-2, rtol=3e-2), max_err
    print("KERNEL_OK")
</pallas_src>

<mosaic_0001>
module attributes {stable_mosaic.version = 11 : i64} {
  func.func @_self_attn_kernel(%arg0: i32, %arg1: memref<2x32x64xf32, #tpu.memory_space<vmem>>, %arg2: memref<96x32xbf16, #tpu.memory_space<vmem>>, %arg3: memref<96x1xf32, #tpu.memory_space<vmem>>, %arg4: memref<32x32xbf16, #tpu.memory_space<vmem>>, %arg5: memref<32x1xf32, #tpu.memory_space<vmem>>, %arg6: memref<32x1xf32, #tpu.memory_space<vmem>>, %arg7: memref<32x1xf32, #tpu.memory_space<vmem>>, %arg8: memref<2x32x64xf32, #tpu.memory_space<vmem>>) attributes {dimension_semantics = [#tpu.dimension_semantics<parallel>], iteration_bounds = array<i64: 1>, scalar_prefetch = 0 : i64, scratch_operands = 0 : i64, tpu.core_type = #tpu.core_type<tc>, window_params = [{transform_indices = @transform_0, window_bounds = array<i64: 2, 32, 64>}, {pipeline_mode = #tpu.pipeline_mode<synchronous>, transform_indices = @transform_1, window_bounds = array<i64: 96, 32>}, {pipeline_mode = #tpu.pipeline_mode<synchronous>, transform_indices = @transform_2, window_bounds = array<i64: 96, 1>}, {pipeline_mode = #tpu.pipeline_mode<synchronous>, transform_indices = @transform_3, window_bounds = array<i64: 32, 32>}, {pipeline_mode = #tpu.pipeline_mode<synchronous>, transform_indices = @transform_4, window_bounds = array<i64: 32, 1>}, {pipeline_mode = #tpu.pipeline_mode<synchronous>, transform_indices = @transform_5, window_bounds = array<i64: 32, 1>}, {pipeline_mode = #tpu.pipeline_mode<synchronous>, transform_indices = @transform_6, window_bounds = array<i64: 32, 1>}, {transform_indices = @transform_7, window_bounds = array<i64: 2, 32, 64>}]} {
    %c0 = arith.constant 0 : index
    %c0_0 = arith.constant 0 : index
    %c0_1 = arith.constant 0 : index
    %0 = vector.load %arg1[%c0, %c0_0, %c0_1] : memref<2x32x64xf32, #tpu.memory_space<vmem>>, vector<1x32x64xf32>
    %1 = vector.shape_cast %0 : vector<1x32x64xf32> to vector<32x64xf32>
    %2 = arith.truncf %1 : vector<32x64xf32> to vector<32x64xbf16>
    %c0_2 = arith.constant 0 : index
    %c0_3 = arith.constant 0 : index
    %3 = vector.load %arg2[%c0_2, %c0_3] : memref<96x32xbf16, #tpu.memory_space<vmem>>, vector<96x32xbf16>
    %cst = arith.constant dense<0.000000e+00> : vector<96x64xf32>
    %4 = tpu.matmul %3, %2, %cst {dimension_numbers = #tpu.dot_dimension_numbers<[1], [0], [0], [1], [0, 0, 1, 1], [], []>} : vector<96x32xbf16>, vector<32x64xbf16>, vector<96x64xf32> -> vector<96x64xf32>
    %c0_4 = arith.constant 0 : index
    %c0_5 = arith.constant 0 : index
    %5 = vector.load %arg3[%c0_4, %c0_5] : memref<96x1xf32, #tpu.memory_space<vmem>>, vector<96x1xf32>
    %6 = vector.broadcast %5 : vector<96x1xf32> to vector<96x64xf32>
    %7 = arith.addf %4, %6 : vector<96x64xf32>
    %8 = vector.shape_cast %7 : vector<96x64xf32> to vector<12x8x64xf32>
    %9 = vector.extract_strided_slice %8 {offsets = [0, 0, 0], sizes = [4, 8, 64], strides = [1, 1, 1]} : vector<12x8x64xf32> to vector<4x8x64xf32>
    %10 = tpu.transpose %9, [0, 2, 1] : vector<4x8x64xf32> -> vector<4x64x8xf32>
    %11 = arith.truncf %10 : vector<4x64x8xf32> to vector<4x64x8xbf16>
    %12 = vector.extract_strided_slice %8 {offsets = [4, 0, 0], sizes = [4, 8, 64], strides = [1, 1, 1]} : vector<12x8x64xf32> to vector<4x8x64xf32>
    %13 = arith.truncf %12 : vector<4x8x64xf32> to vector<4x8x64xbf16>
    %14 = vector.extract_strided_slice %8 {offsets = [8, 0, 0], sizes = [4, 8, 64], strides = [1, 1, 1]} : vector<12x8x64xf32> to vector<4x8x64xf32>
    %15 = arith.truncf %14 : vector<4x8x64xf32> to vector<4x8x64xbf16>
    "tpu.trace_start"() <{level = 10 : i32, message = "nqd,ndk->nqk"}> : () -> ()
    %cst_6 = arith.constant dense<0.000000e+00> : vector<4x64x64xf32>
    %16 = tpu.matmul %11, %13, %cst_6 {dimension_numbers = #tpu.dot_dimension_numbers<[2], [1], [1], [2], [0, 0, 0, 1, 1, 2], [0], [0]>} : vector<4x64x8xbf16>, vector<4x8x64xbf16>, vector<4x64x64xf32> -> vector<4x64x64xf32>
    "tpu.trace_stop"() : () -> ()
    %cst_7 = arith.constant dense<0xFF800000> : vector<4x64xf32>
    %17 = vector.multi_reduction <maximumf>, %16, %cst_7 [2] : vector<4x64x64xf32> to vector<4x64xf32>
    %18 = vector.shape_cast %17 : vector<4x64xf32> to vector<4x64x1xf32>
    %19 = vector.broadcast %18 : vector<4x64x1xf32> to vector<4x64x64xf32>
    %20 = arith.subf %16, %19 : vector<4x64x64xf32>
    %21 = math.exp %20 : vector<4x64x64xf32>
    %cst_8 = arith.constant dense<0.000000e+00> : vector<4x64xf32>
    %22 = vector.multi_reduction <add>, %21, %cst_8 [2] : vector<4x64x64xf32> to vector<4x64xf32>
    %23 = vector.shape_cast %22 : vector<4x64xf32> to vector<4x64x1xf32>
    %24 = arith.truncf %21 : vector<4x64x64xf32> to vector<4x64x64xbf16>
    "tpu.trace_start"() <{level = 10 : i32, message = "ndk,nqk->ndq"}> : () -> ()
    %cst_9 = arith.constant dense<0.000000e+00> : vector<4x8x64xf32>
    %25 = tpu.matmul %15, %24, %cst_9 {dimension_numbers = #tpu.dot_dimension_numbers<[2], [2], [1], [1], [0, 0, 0, 1, 1, 1], [0], [0]>} : vector<4x8x64xbf16>, vector<4x64x64xbf16>, vector<4x8x64xf32> -> vector<4x8x64xf32>
    "tpu.trace_stop"() : () -> ()
    %26 = tpu.reciprocal %23 {approx = true} : vector<4x64x1xf32> -> vector<4x64x1xf32>
    %27 = tpu.transpose %26, [0, 2, 1] : vector<4x64x1xf32> -> vector<4x1x64xf32>
    %28 = vector.broadcast %27 : vector<4x1x64xf32> to vector<4x8x64xf32>
    %29 = arith.mulf %25, %28 : vector<4x8x64xf32>
    %30 = vector.shape_cast %29 : vector<4x8x64xf32> to vector<32x64xf32>
    %31 = arith.truncf %30 : vector<32x64xf32> to vector<32x64xbf16>
    %c0_10 = arith.constant 0 : index
    %c0_11 = arith.constant 0 : index
    %32 = vector.load %arg4[%c0_10, %c0_11] : memref<32x32xbf16, #tpu.memory_space<vmem>>, vector<32x32xbf16>
    %cst_12 = arith.constant dense<0.000000e+00> : vector<32x64xf32>
    %33 = tpu.matmul %32, %31, %cst_12 {dimension_numbers = #tpu.dot_dimension_numbers<[1], [0], [0], [1], [0, 0, 1, 1], [], []>} : vector<32x32xbf16>, vector<32x64xbf16>, vector<32x64xf32> -> vector<32x64xf32>
    %c0_13 = arith.constant 0 : index
    %c0_14 = arith.constant 0 : index
    %34 = vector.load %arg5[%c0_13, %c0_14] : memref<32x1xf32, #tpu.memory_space<vmem>>, vector<32x1xf32>
    %35 = vector.broadcast %34 : vector<32x1xf32> to vector<32x64xf32>
    %36 = arith.addf %33, %35 : vector<32x64xf32>
    %cst_15 = arith.constant dense<0.000000e+00> : vector<64xf32>
    %37 = vector.multi_reduction <add>, %36, %cst_15 [0] : vector<32x64xf32> to vector<64xf32>
    %38 = vector.shape_cast %37 : vector<64xf32> to vector<1x64xf32>
    %cst_16 = arith.constant 3.200000e+01 : f32
    %39 = vector.broadcast %cst_16 : f32 to vector<1x64xf32>
    %40 = arith.divf %38, %39 : vector<1x64xf32>
    %41 = vector.broadcast %40 : vector<1x64xf32> to vector<32x64xf32>
    %42 = arith.subf %36, %41 : vector<32x64xf32>
    %43 = arith.mulf %42, %42 : vector<32x64xf32>
    %cst_17 = arith.constant dense<0.000000e+00> : vector<64xf32>
    %44 = vector.multi_reduction <add>, %43, %cst_17 [0] : vector<32x64xf32> to vector<64xf32>
    %45 = vector.shape_cast %44 : vector<64xf32> to vector<1x64xf32>
    %cst_18 = arith.constant 3.200000e+01 : f32
    %46 = vector.broadcast %cst_18 : f32 to vector<1x64xf32>
    %47 = arith.divf %45, %46 : vector<1x64xf32>
    %48 = vector.broadcast %40 : vector<1x64xf32> to vector<32x64xf32>
    %49 = arith.subf %36, %48 : vector<32x64xf32>
    %cst_19 = arith.constant 9.99999974E-6 : f32
    %50 = vector.broadcast %cst_19 : f32 to vector<1x64xf32>
    %51 = arith.addf %47, %50 : vector<1x64xf32>
    %52 = math.rsqrt %51 : vector<1x64xf32>
    %53 = vector.broadcast %52 : vector<1x64xf32> to vector<32x64xf32>
    %54 = arith.mulf %49, %53 : vector<32x64xf32>
    %c0_20 = arith.constant 0 : index
    %c0_21 = arith.constant 0 : index
    %55 = vector.load %arg6[%c0_20, %c0_21] : memref<32x1xf32, #tpu.memory_space<vmem>>, vector<32x1xf32>
    %56 = vector.broadcast %55 : vector<32x1xf32> to vector<32x64xf32>
    %57 = arith.mulf %54, %56 : vector<32x64xf32>
    %c0_22 = arith.constant 0 : index
    %c0_23 = arith.constant 0 : index
    %58 = vector.load %arg7[%c0_22, %c0_23] : memref<32x1xf32, #tpu.memory_space<vmem>>, vector<32x1xf32>
    %59 = vector.broadcast %58 : vector<32x1xf32> to vector<32x64xf32>
    %60 = arith.addf %57, %59 : vector<32x64xf32>
    %c0_24 = arith.constant 0 : index
    %c0_25 = arith.constant 0 : index
    %c0_26 = arith.constant 0 : index
    %61 = vector.load %arg8[%c0_24, %c0_25, %c0_26] : memref<2x32x64xf32, #tpu.memory_space<vmem>>, vector<1x32x64xf32>
    %62 = vector.shape_cast %61 : vector<1x32x64xf32> to vector<32x64xf32>
    %63 = vector.shape_cast %60 : vector<32x64xf32> to vector<1x32x64xf32>
    tpu.vector_store %arg8[%c0_24, %c0_25, %c0_26], %63 {strides = array<i32>} : memref<2x32x64xf32, #tpu.memory_space<vmem>>, vector<1x32x64xf32>,
    %c1 = arith.constant 1 : index
    %c0_27 = arith.constant 0 : index
    %c0_28 = arith.constant 0 : index
    %64 = vector.load %arg1[%c1, %c0_27, %c0_28] : memref<2x32x64xf32, #tpu.memory_space<vmem>>, vector<1x32x64xf32>
    %65 = vector.shape_cast %64 : vector<1x32x64xf32> to vector<32x64xf32>
    %66 = arith.truncf %65 : vector<32x64xf32> to vector<32x64xbf16>
    %c0_29 = arith.constant 0 : index
    %c0_30 = arith.constant 0 : index
    %67 = vector.load %arg2[%c0_29, %c0_30] : memref<96x32xbf16, #tpu.memory_space<vmem>>, vector<96x32xbf16>
    %cst_31 = arith.constant dense<0.000000e+00> : vector<96x64xf32>
    %68 = tpu.matmul %67, %66, %cst_31 {dimension_numbers = #tpu.dot_dimension_numbers<[1], [0], [0], [1], [0, 0, 1, 1], [], []>} : vector<96x32xbf16>, vector<32x64xbf16>, vector<96x64xf32> -> vector<96x64xf32>
    %c0_32 = arith.constant 0 : index
    %c0_33 = arith.constant 0 : index
    %69 = vector.load %arg3[%c0_32, %c0_33] : memref<96x1xf32, #tpu.memory_space<vmem>>, vector<96x1xf32>
    %70 = vector.broadcast %69 : vector<96x1xf32> to vector<96x64xf32>
    %71 = arith.addf %68, %70 : vector<96x64xf32>
    %72 = vector.shape_cast %71 : vector<96x64xf32> to vector<12x8x64xf32>
    %73 = vector.extract_strided_slice %72 {offsets = [0, 0, 0], sizes = [4, 8, 64], strides = [1, 1, 1]} : vector<12x8x64xf32> to vector<4x8x64xf32>
    %74 = tpu.transpose %73, [0, 2, 1] : vector<4x8x64xf32> -> vector<4x64x8xf32>
    %75 = arith.truncf %74 : vector<4x64x8xf32> to vector<4x64x8xbf16>
    %76 = vector.extract_strided_slice %72 {offsets = [4, 0, 0], sizes = [4, 8, 64], strides = [1, 1, 1]} : vector<12x8x64xf32> to vector<4x8x64xf32>
    %77 = arith.truncf %76 : vector<4x8x64xf32> to vector<4x8x64xbf16>
    %78 = vector.extract_strided_slice %72 {offsets = [8, 0, 0], sizes = [4, 8, 64], strides = [1, 1, 1]} : vector<12x8x64xf32> to vector<4x8x64xf32>
    %79 = arith.truncf %78 : vector<4x8x64xf32> to vector<4x8x64xbf16>
    "tpu.trace_start"() <{level = 10 : i32, message = "nqd,ndk->nqk"}> : () -> ()
    %cst_34 = arith.constant dense<0.000000e+00> : vector<4x64x64xf32>
    %80 = tpu.matmul %75, %77, %cst_34 {dimension_numbers = #tpu.dot_dimension_numbers<[2], [1], [1], [2], [0, 0, 0, 1, 1, 2], [0], [0]>} : vector<4x64x8xbf16>, vector<4x8x64xbf16>, vector<4x64x64xf32> -> vector<4x64x64xf32>
    "tpu.trace_stop"() : () -> ()
    %cst_35 = arith.constant dense<0xFF800000> : vector<4x64xf32>
    %81 = vector.multi_reduction <maximumf>, %80, %cst_35 [2] : vector<4x64x64xf32> to vector<4x64xf32>
    %82 = vector.shape_cast %81 : vector<4x64xf32> to vector<4x64x1xf32>
    %83 = vector.broadcast %82 : vector<4x64x1xf32> to vector<4x64x64xf32>
    %84 = arith.subf %80, %83 : vector<4x64x64xf32>
    %85 = math.exp %84 : vector<4x64x64xf32>
    %cst_36 = arith.constant dense<0.000000e+00> : vector<4x64xf32>
    %86 = vector.multi_reduction <add>, %85, %cst_36 [2] : vector<4x64x64xf32> to vector<4x64xf32>
    %87 = vector.shape_cast %86 : vector<4x64xf32> to vector<4x64x1xf32>
    %88 = arith.truncf %85 : vector<4x64x64xf32> to vector<4x64x64xbf16>
    "tpu.trace_start"() <{level = 10 : i32, message = "ndk,nqk->ndq"}> : () -> ()
    %cst_37 = arith.constant dense<0.000000e+00> : vector<4x8x64xf32>
    %89 = tpu.matmul %79, %88, %cst_37 {dimension_numbers = #tpu.dot_dimension_numbers<[2], [2], [1], [1], [0, 0, 0, 1, 1, 1], [0], [0]>} : vector<4x8x64xbf16>, vector<4x64x64xbf16>, vector<4x8x64xf32> -> vector<4x8x64xf32>
    "tpu.trace_stop"() : () -> ()
    %90 = tpu.reciprocal %87 {approx = true} : vector<4x64x1xf32> -> vector<4x64x1xf32>
    %91 = tpu.transpose %90, [0, 2, 1] : vector<4x64x1xf32> -> vector<4x1x64xf32>
    %92 = vector.broadcast %91 : vector<4x1x64xf32> to vector<4x8x64xf32>
    %93 = arith.mulf %89, %92 : vector<4x8x64xf32>
    %94 = vector.shape_cast %93 : vector<4x8x64xf32> to vector<32x64xf32>
    %95 = arith.truncf %94 : vector<32x64xf32> to vector<32x64xbf16>
    %c0_38 = arith.constant 0 : index
    %c0_39 = arith.constant 0 : index
    %96 = vector.load %arg4[%c0_38, %c0_39] : memref<32x32xbf16, #tpu.memory_space<vmem>>, vector<32x32xbf16>
    %cst_40 = arith.constant dense<0.000000e+00> : vector<32x64xf32>
    %97 = tpu.matmul %96, %95, %cst_40 {dimension_numbers = #tpu.dot_dimension_numbers<[1], [0], [0], [1], [0, 0, 1, 1], [], []>} : vector<32x32xbf16>, vector<32x64xbf16>, vector<32x64xf32> -> vector<32x64xf32>
    %c0_41 = arith.constant 0 : index
    %c0_42 = arith.constant 0 : index
    %98 = vector.load %arg5[%c0_41, %c0_42] : memref<32x1xf32, #tpu.memory_space<vmem>>, vector<32x1xf32>
    %99 = vector.broadcast %98 : vector<32x1xf32> to vector<32x64xf32>
    %100 = arith.addf %97, %99 : vector<32x64xf32>
    %cst_43 = arith.constant dense<0.000000e+00> : vector<64xf32>
    %101 = vector.multi_reduction <add>, %100, %cst_43 [0] : vector<32x64xf32> to vector<64xf32>
    %102 = vector.shape_cast %101 : vector<64xf32> to vector<1x64xf32>
    %cst_44 = arith.constant 3.200000e+01 : f32
    %103 = vector.broadcast %cst_44 : f32 to vector<1x64xf32>
    %104 = arith.divf %102, %103 : vector<1x64xf32>
    %105 = vector.broadcast %104 : vector<1x64xf32> to vector<32x64xf32>
    %106 = arith.subf %100, %105 : vector<32x64xf32>
    %107 = arith.mulf %106, %106 : vector<32x64xf32>
    %cst_45 = arith.constant dense<0.000000e+00> : vector<64xf32>
    %108 = vector.multi_reduction <add>, %107, %cst_45 [0] : vector<32x64xf32> to vector<64xf32>
    %109 = vector.shape_cast %108 : vector<64xf32> to vector<1x64xf32>
    %cst_46 = arith.constant 3.200000e+01 : f32
    %110 = vector.broadcast %cst_46 : f32 to vector<1x64xf32>
    %111 = arith.divf %109, %110 : vector<1x64xf32>
    %112 = vector.broadcast %104 : vector<1x64xf32> to vector<32x64xf32>
    %113 = arith.subf %100, %112 : vector<32x64xf32>
    %cst_47 = arith.constant 9.99999974E-6 : f32
    %114 = vector.broadcast %cst_47 : f32 to vector<1x64xf32>
    %115 = arith.addf %111, %114 : vector<1x64xf32>
    %116 = math.rsqrt %115 : vector<1x64xf32>
    %117 = vector.broadcast %116 : vector<1x64xf32> to vector<32x64xf32>
    %118 = arith.mulf %113, %117 : vector<32x64xf32>
    %c0_48 = arith.constant 0 : index
    %c0_49 = arith.constant 0 : index
    %119 = vector.load %arg6[%c0_48, %c0_49] : memref<32x1xf32, #tpu.memory_space<vmem>>, vector<32x1xf32>
    %120 = vector.broadcast %119 : vector<32x1xf32> to vector<32x64xf32>
    %121 = arith.mulf %118, %120 : vector<32x64xf32>
    %c0_50 = arith.constant 0 : index
    %c0_51 = arith.constant 0 : index
    %122 = vector.load %arg7[%c0_50, %c0_51] : memref<32x1xf32, #tpu.memory_space<vmem>>, vector<32x1xf32>
    %123 = vector.broadcast %122 : vector<32x1xf32> to vector<32x64xf32>
    %124 = arith.addf %121, %123 : vector<32x64xf32>
    %c1_52 = arith.constant 1 : index
    %c0_53 = arith.constant 0 : index
    %c0_54 = arith.constant 0 : index
    %125 = vector.load %arg8[%c1_52, %c0_53, %c0_54] : memref<2x32x64xf32, #tpu.memory_space<vmem>>, vector<1x32x64xf32>
    %126 = vector.shape_cast %125 : vector<1x32x64xf32> to vector<32x64xf32>
    %127 = vector.shape_cast %124 : vector<32x64xf32> to vector<1x32x64xf32>
    tpu.vector_store %arg8[%c1_52, %c0_53, %c0_54], %127 {strides = array<i32>} : memref<2x32x64xf32, #tpu.memory_space<vmem>>, vector<1x32x64xf32>,
    return
  }
  func.func @transform_0(%arg0: i32) -> (i32, i32, i32) {
    %c0_i32 = arith.constant 0 : i32
    %c0_i32_0 = arith.constant 0 : i32
    %c0_i32_1 = arith.constant 0 : i32
    return %arg0, %c0_i32, %c0_i32_0 : i32, i32, i32
  }
  func.func @transform_1(%arg0: i32) -> (i32, i32) {
    %c0_i32 = arith.constant 0 : i32
    %c0_i32_0 = arith.constant 0 : i32
    %c0_i32_1 = arith.constant 0 : i32
    return %c0_i32, %c0_i32_0 : i32, i32
  }
  func.func @transform_2(%arg0: i32) -> (i32, i32) {
    %c0_i32 = arith.constant 0 : i32
    %c0_i32_0 = arith.constant 0 : i32
    %c0_i32_1 = arith.constant 0 : i32
    return %c0_i32, %c0_i32_0 : i32, i32
  }
  func.func @transform_3(%arg0: i32) -> (i32, i32) {
    %c0_i32 = arith.constant 0 : i32
    %c0_i32_0 = arith.constant 0 : i32
    %c0_i32_1 = arith.constant 0 : i32
    return %c0_i32, %c0_i32_0 : i32, i32
  }
  func.func @transform_4(%arg0: i32) -> (i32, i32) {
    %c0_i32 = arith.constant 0 : i32
    %c0_i32_0 = arith.constant 0 : i32
    %c0_i32_1 = arith.constant 0 : i32
    return %c0_i32, %c0_i32_0 : i32, i32
  }
  func.func @transform_5(%arg0: i32) -> (i32, i32) {
    %c0_i32 = arith.constant 0 : i32
    %c0_i32_0 = arith.constant 0 : i32
    %c0_i32_1 = arith.constant 0 : i32
    return %c0_i32, %c0_i32_0 : i32, i32
  }
  func.func @transform_6(%arg0: i32) -> (i32, i32) {
    %c0_i32 = arith.constant 0 : i32
    %c0_i32_0 = arith.constant 0 : i32
    %c0_i32_1 = arith.constant 0 : i32
    return %c0_i32, %c0_i32_0 : i32, i32
  }
  func.func @transform_7(%arg0: i32) -> (i32, i32, i32) {
    %c0_i32 = arith.constant 0 : i32
    %c0_i32_0 = arith.constant 0 : i32
    %c0_i32_1 = arith.constant 0 : i32
    return %arg0, %c0_i32, %c0_i32_0 : i32, i32, i32
  }
}

</mosaic_0001>

<bundles_post_ra>
// kernel: tpu_custom_call.1
= control target key start
LH: loop header
LB: loop body
LE: loop exit
PB: predicated region body
PF: predicated region fallthrough
CT: control target
= control target key end

     0   :  { %v3496_v3 = vmov 0   ;;  %s4587_s0 = inlined_call_operand.vmem [shape: f32[2,32,64], index: 0, kind: input, shape index: {}]   ;;  %s4588_s1 = inlined_call_operand.vmem [shape: bf16[96,32], index: 1, kind: input, shape index: {}]   ;;  %s4589_s2 = inlined_call_operand.vmem [shape: f32[96,1], index: 2, kind: input, shape index: {}]   ;;  %s4590_s3 = inlined_call_operand.vmem [shape: bf16[32,32], index: 3, kind: input, shape index: {}]   ;;  %s4591_s4 = inlined_call_operand.vmem [shape: f32[32,1], index: 4, kind: input, shape index: {}]   ;;  %s4592_s5 = inlined_call_operand.vmem [shape: f32[32,1], index: 5, kind: input, shape index: {}]   ;;  %s4593_s6 = inlined_call_operand.vmem [shape: f32[32,1], index: 6, kind: input, shape index: {}]   ;;  %s4594_s7 = inlined_call_operand.hbm [shape: f32[2,32,64], index: 7, kind: output, shape index: {}]  }
   0x1   :  { %v46_v0 = vld [vmem:[%s4589_s2] sm:$0xff]  ;;  %v30_v1 = vld [vmem:[%s4587_s0 + $0x10] sm:$0xff]  ;;  %v31_v2 = vld [vmem:[%s4587_s0 + $0x18] sm:$0xff]  ;;  %3121 = vset.pattern.permute.xlu0 %v3496_v3  ;;  %3123 = vset.pattern.permute.xlu2 %v3496_v3 }
   0x2   :  { %v33_v4 = vpack.c.bf16 %v31_v2, %v30_v1  ;;  %v28_v5 = vld [vmem:[%s4587_s0] sm:$0xff]  ;;  %v29_v6 = vld [vmem:[%s4587_s0 + $0x8] sm:$0xff]  ;;  %60 = vperm.xlu0 %3121, %v46_v0  }
   0x3   :  { %v32_v7 = vpack.c.bf16 %v29_v6, %v28_v5 }
   0x4   :  { %173 = vmatpush.bf16.msra.mxu0 %v33_v4 }
   0x5   :  { %12 = vsyncpa [#allocation3], 0  ;;  %v3097_v8 = vld [vmem:[%s4588_s1] sm:$0xff]  ;;  %vm148_vm0 = vcmask 261120   ;;  %v49_v10 = vld [vmem:[%s4589_s2 + $0x18] sm:$0xff]  ;;  %vm407_vm1 = vcmask 1043456  }
   0x6   :  { %v50_v9 = vld [vmem:[%s4589_s2 + $0x20] sm:$0xff]  ;;  %v3098_v11 = vld [vmem:[%s4588_s1 + $0x8] sm:$0xff]  ;;  %v53_v12 = vld [vmem:[%s4589_s2 + $0x38] sm:$0xff]  ;;  %vm394_vm2 = vcmask 64512   ;;  %vm632_vm3 = vcmask 523264   ;;  %s2961_s23 = sshll.u32 %s4594_s7, 4  ;;  %s2962_s23 = int_to_ptr.hbm [resolvable:$true] %s2961_s23 }
   0x7   :  { %v55_v13 = vld [vmem:[%s4589_s2 + $0x48] sm:$0xff]  ;;  %v3099_v14 = vld [vmem:[%s4588_s1 + $0x10] sm:$0xff]  ;;  %v57_v15 = vld [vmem:[%s4589_s2 + $0x58] sm:$0xff]  ;;  %s3499_s24 = smov 128   ;;  %s3500_s25 = smov 8  }
   0x8   :  { %174 = vmatpush.bf16.msra.mxu0 %v32_v7  ;;  %v3100_v16 = vld [vmem:[%s4588_s1 + $0x18] sm:$0xff]  ;;  %v3101_v17 = vld [vmem:[%s4588_s1 + $0x20] sm:$0xff]  ;;  %v3102_v18 = vld [vmem:[%s4588_s1 + $0x28] sm:$0xff] }
   0x9   :  { %v48_v38 = vld [vmem:[%s4589_s2 + $0x10] sm:$0xff]  ;;  %v51_v40 = vld [vmem:[%s4589_s2 + $0x28] sm:$0xff]  ;;  %v54_v42 = vld [vmem:[%s4589_s2 + $0x40] sm:$0xff] }
   0xa   :  { %80 = vperm.xlu0 %3121, %v50_v9   ;;  %70 = vperm.xlu2 %3123, %v48_v38   ;;  %v52_v41 = vld [vmem:[%s4589_s2 + $0x30] sm:$0xff]  ;;  %v47_v43 = vld [vmem:[%s4589_s2 + $0x8] sm:$0xff] }
   0xb   :  { %2997 = vmatmul.msk.bf16.vlgmr.msra.gmra.mxu0 %vm148_vm0, %v3097_v8  ;;  %v56_v44 = vld [vmem:[%s4589_s2 + $0x50] sm:$0xff] }
  0x12   :  { %75 = vperm.xlu0 %3121, %v49_v10   ;;  %85 = vperm.xlu2 %3123, %v51_v40  }
  0x1a   :  { %95 = vperm.xlu0 %3121, %v53_v12   ;;  %90 = vperm.xlu2 %3123, %v52_v41  }
  0x1b   :  { %2998 = vmatmul.msk.bf16.gmra.mxu0 %vm148_vm0, %v3098_v11 }
  0x22   :  { %105 = vperm.xlu0 %3121, %v55_v13   ;;  %100 = vperm.xlu2 %3123, %v54_v42  }
  0x2a   :  { %115 = vperm.xlu0 %3121, %v57_v15  }
  0x2b   :  { %2999 = vmatmul.msk.bf16.gmra.mxu0 %vm148_vm0, %v3099_v14 }
  0x3b   :  { %3000 = vmatmul.msk.bf16.gmra.mxu0 %vm148_vm0, %v3100_v16 }
  0x4b   :  { %3001 = vmatmul.msk.bf16.gmra.mxu0 %vm148_vm0, %v3101_v17 }
  0x5b   :  { %3002 = vmatmul.msk.bf16.gmra.mxu0 %vm148_vm0, %v3102_v18 }
  0x64   :  { %v71_v0 = vpop.permute.xlu2 %70 }
  0x6c   :  { %v86_v4 = vpop.permute.xlu2 %85 }
  0x74   :  { %v61_v19 = vpop.permute.xlu0 %60  ;;  %v91_v11 = vpop.permute.xlu2 %90 }
  0x7c   :  { %v81_v23 = vpop.permute.xlu0 %80 }
  0x84   :  { %v76_v25 = vpop.permute.xlu0 %75 }
  0x88   :  { %v176_v20 = vpop.f32.mrf.mxu0 }
  0x89   :  { %v177_v21 = vadd.f32 %v176_v20, %v61_v19 }
  0x8b   :  { %206 = vxpose.xlu1.b32.start.end [1/1] (short) (narrow) %v177_v21, 64 }
  0x8c   :  { %v96_v34 = vpop.permute.xlu0 %95 }
  0x90   :  { %v3595_v22 = vpop.f32.mrf.mxu0 }
  0x98   :  { %v3597_v24 = vpop.f32.mrf.mxu0 }
  0x99   :  { %v182_v18 = vadd.f32 %v3597_v24, %v71_v0 }
  0xa0   :  { %v183_v26 = vpop.f32.mrf.mxu0 }
  0xa1   :  { %v184_v27 = vadd.f32 %v183_v26, %v76_v25  ;;  %v3631_v26 = vpop.permute.xlu0 %105 }
  0xa3   :  { %302 = vxpose.xlu0.b32.start.end [1/1] (short) (narrow) %v184_v27, 64 }
  0xa8   :  { %v186_v28 = vpop.f32.mrf.mxu0 }
  0xa9   :  { %v187_v29 = vadd.f32 %v186_v28, %v81_v23  ;;  %v3633_v27 = vpop.permute.xlu0 %115 }
  0xab   :  { %v366_v30 = vpack.c.bf16 %v187_v29, %v187_v29 }
  0xad   :  { %v409_v31 = vsel %vm407_vm1, %v366_v30, 0  ;;  %v3635_v30 = vpop.permute.xlu2 %100 }
  0xae   :  { %418 = vmatpush.bf16.msra.mxu1 %v409_v31 }
  0xb0   :  { %v188_v32 = vpop.f32.mrf.mxu0 }
  0xb1   :  { %v189_v12 = vadd.f32 %v188_v32, %v86_v4 }
  0xb3   :  { %v367_v14 = vpack.c.bf16 %v189_v12, %v189_v12 }
  0xb5   :  { %v473_v16 = vsel %vm407_vm1, %v367_v14, 0 }
  0xb6   :  { %482 = vmatpush.bf16.msra.mxu2 %v473_v16 }
  0xb8   :  { %v191_v33 = vpop.f32.mrf.mxu0 }
  0xb9   :  { %v192_v13 = vadd.f32 %v191_v33, %v91_v11 }
  0xbb   :  { %v368_v15 = vpack.c.bf16 %v192_v13, %v192_v13 }
  0xbd   :  { %v537_v17 = vsel %vm407_vm1, %v368_v15, 0 }
  0xbe   :  { %546 = vmatpush.bf16.msra.mxu3 %v537_v17 }
  0xc0   :  { %v193_v35 = vpop.f32.mrf.mxu0 }
  0xc1   :  { %v194_v36 = vadd.f32 %v193_v35, %v96_v34 }
  0xc3   :  { %v369_v37 = vpack.c.bf16 %v194_v36, %v194_v36 }
  0xc5   :  { %v601_v39 = vsel %vm407_vm1, %v369_v37, 0 }
  0xc6   :  { %610 = vmatpush.bf16.msrb.mxu1 %v601_v39 }
  0xde   :  { %3122 = vset.pattern.permute.xlu1 %v3496_v3 }
 0x11d   :  { %65 = vperm.xlu1 %3122, %v47_v43  }
 0x125   :  { %110 = vperm.xlu1 %3122, %v56_v44  }
 0x12f   :  { %v222_v45 = vpop.trf.xlu1 }
 0x130   :  { %v334_v46 = vpack.c.bf16 %v222_v45, %v222_v45 }
 0x132   :  { %v382_v48 = vunpack.c.l.b16 %v334_v46 }
 0x137   :  { %v223_v47 = vpop.trf.xlu1 }
 0x138   :  { %v335_v49 = vpack.c.bf16 %v223_v47, %v223_v47 }
 0x13a   :  { %v383_v50 = vunpack.c.l.b16 %v335_v49 }
 0x13c   :  { %v390_v51 = vpack.c.b16 %v383_v50, %v382_v48 }
 0x13e   :  { %3003 = vmatmul.msk.bf16.vlgmr.msra.gmra.mxu1 %vm394_vm2, %v390_v51 }
 0x13f   :  { %v224_v52 = vpop.trf.xlu1 }
 0x140   :  { %v336_v53 = vpack.c.bf16 %v224_v52, %v224_v52 }
 0x142   :  { %v384_v55 = vunpack.c.l.b16 %v336_v53 }
 0x147   :  { %v225_v54 = vpop.trf.xlu1  ;;  %v318_v28 = vpop.trf.xlu0 }
 0x148   :  { %v337_v56 = vpack.c.bf16 %v225_v54, %v225_v54  ;;  %v358_v29 = vpack.c.bf16 %v318_v28, %v318_v28 }
 0x14a   :  { %v385_v57 = vunpack.c.l.b16 %v337_v56  ;;  %v576_v31 = vunpack.c.l.b16 %v358_v29 }
 0x14c   :  { %v391_v58 = vpack.c.b16 %v385_v57, %v384_v55 }
 0x14e   :  { %3004 = vmatmul.msk.bf16.gmra.mxu1 %vm394_vm2, %v391_v58 }
 0x14f   :  { %v226_v59 = vpop.trf.xlu1  ;;  %v319_v24 = vpop.trf.xlu0 }
 0x150   :  { %v338_v60 = vpack.c.bf16 %v226_v59, %v226_v59 }
 0x152   :  { %v386_v62 = vunpack.c.l.b16 %v338_v60 }
 0x157   :  { %v227_v61 = vpop.trf.xlu1  ;;  %v320_v35 = vpop.trf.xlu0 }
 0x158   :  { %v339_v63 = vpack.c.bf16 %v227_v61, %v227_v61  ;;  %v360_v44 = vpack.c.bf16 %v320_v35, %v320_v35 }
 0x15a   :  { %v387_v1 = vunpack.c.l.b16 %v339_v63  ;;  %v578_v53 = vunpack.c.l.b16 %v360_v44 }
 0x15c   :  { %v392_v2 = vpack.c.b16 %v387_v1, %v386_v62 }
 0x15e   :  { %3005 = vmatmul.msk.bf16.gmra.mxu1 %vm394_vm2, %v392_v2 }
 0x15f   :  { %v228_v3 = vpop.trf.xlu1  ;;  %v321_v43 = vpop.trf.xlu0 }
 0x160   :  { %v340_v5 = vpack.c.bf16 %v228_v3, %v228_v3  ;;  %v361_v45 = vpack.c.bf16 %v321_v43, %v321_v43 }
 0x162   :  { %v388_v7 = vunpack.c.l.b16 %v340_v5  ;;  %v579_v54 = vunpack.c.l.b16 %v361_v45 }
 0x164   :  { %v585_v60 = vpack.c.b16 %v579_v54, %v578_v53 }
 0x167   :  { %v229_v6 = vpop.trf.xlu1  ;;  %v322_v59 = vpop.trf.xlu0 }
 0x168   :  { %v341_v8 = vpack.c.bf16 %v229_v6, %v229_v6  ;;  %v362_v4 = vpack.c.bf16 %v322_v59, %v322_v59 }
 0x16a   :  { %v389_v9 = vunpack.c.l.b16 %v341_v8  ;;  %v580_v13 = vunpack.c.l.b16 %v362_v4 }
 0x16c   :  { %v393_v10 = vpack.c.b16 %v389_v9, %v388_v7 }
 0x16e   :  { %3006 = vmatmul.msk.bf16.gmra.mxu1 %vm394_vm2, %v393_v10 }
 0x16f   :  { %v323_v7 = vpop.trf.xlu0 }
 0x170   :  { %v363_v8 = vpack.c.bf16 %v323_v7, %v323_v7 }
 0x172   :  { %v581_v14 = vunpack.c.l.b16 %v363_v8 }
 0x18f   :  { %v66_v19 = vpop.permute.xlu1 %65 }
 0x190   :  { %v179_v20 = vadd.f32 %v3595_v22, %v66_v19  ;;  %v359_v22 = vpack.c.bf16 %v319_v24, %v319_v24 }
 0x192   :  { %v3124_v21 = vpack.i.bf16 %v182_v18, %v179_v20  ;;  %v577_v32 = vunpack.c.l.b16 %v359_v22  ;;  %v586_v20 = vpack.c.b16 %v581_v14, %v580_v13 }
 0x194   :  { %3125 = vxpose.xlu2.b32.start.end [1/1] (short) (narrow) %v3124_v21, 64  ;;  %v584_v33 = vpack.c.b16 %v577_v32, %v576_v31  ;;  %v324_v21 = vpop.trf.xlu0 }
 0x195   :  { %v364_v22 = vpack.c.bf16 %v324_v21, %v324_v21 }
 0x196   :  { %3015 = vmatmul.msk.bf16.vlgmr.msrb.gmra.mxu1 %vm394_vm2, %v584_v33 }
 0x1a6   :  { %3016 = vmatmul.msk.bf16.gmra.mxu1 %vm394_vm2, %v585_v60 }
 0x1b6   :  { %3017 = vmatmul.msk.bf16.gmra.mxu1 %vm394_vm2, %v586_v20 }
 0x1bb   :  { %v3627_v23 = vpop.f32.mrf.mxu1 }
 0x1bc   :  { %v633_v25 = vsel %vm632_vm3, %v3627_v23, -inf }
 0x1bd   :  { %634 = vmax.xlane.f32.xlu1 %v633_v25 }
 0x1c3   :  { %v3638_v48 = vpop.f32.mrf.mxu1 }
 0x1c4   :  { %v636_v55 = vsel %vm632_vm3, %v3638_v48, -inf }
 0x1cb   :  { %v3645_v63 = vpop.f32.mrf.mxu1 }
 0x1cc   :  { %v639_v0 = vsel %vm632_vm3, %v3645_v63, -inf }
 0x22d   :  { %v3126_v34 = vpop.trf.xlu2 }
 0x22e   :  { %v3127_v36 = vunpack.i.l.bf16 %v3126_v34  ;;  %v3130_v37 = vunpack.i.h.bf16 %v3126_v34  ;;  %v325_v34 = vpop.trf.xlu0 }
 0x22f   :  { %v365_v35 = vpack.c.bf16 %v325_v34, %v325_v34 }
 0x230   :  { %v342_v39 = vpack.c.bf16 %v3127_v36, %v3127_v36  ;;  %v350_v40 = vpack.c.bf16 %v3130_v37, %v3130_v37 }
 0x232   :  { %v448_v50 = vunpack.c.l.b16 %v342_v39  ;;  %v512_v52 = vunpack.c.l.b16 %v350_v40  ;;  %v582_v40 = vunpack.c.l.b16 %v364_v22 }
 0x235   :  { %v3131_v38 = vpop.trf.xlu2 }
 0x236   :  { %v3132_v41 = vunpack.i.l.bf16 %v3131_v38  ;;  %v3135_v42 = vunpack.i.h.bf16 %v3131_v38 }
 0x238   :  { %v343_v46 = vpack.c.bf16 %v3132_v41, %v3132_v41  ;;  %v351_v47 = vpack.c.bf16 %v3135_v42, %v3135_v42  ;;  %v583_v41 = vunpack.c.l.b16 %v365_v35 }
 0x23a   :  { %v449_v49 = vunpack.c.l.b16 %v343_v46  ;;  %v513_v51 = vunpack.c.l.b16 %v351_v47  ;;  %v587_v47 = vpack.c.b16 %v583_v41, %v582_v40 }
 0x23c   :  { %v456_v56 = vpack.c.b16 %v449_v49, %v448_v50  ;;  %v520_v57 = vpack.c.b16 %v513_v51, %v512_v52  ;;  %3018 = vmatmul.msk.bf16.gmra.mxu1 %vm394_vm2, %v587_v47 }
 0x23d   :  { %637 = vmax.xlane.f32.xlu2 %v636_v55  ;;  %v3136_v58 = vpop.trf.xlu2 }
 0x23e   :  { %3007 = vmatmul.msk.bf16.vlgmr.msra.gmra.mxu2 %vm394_vm2, %v456_v56  ;;  %3011 = vmatmul.msk.bf16.vlgmr.msra.gmra.mxu3 %vm394_vm2, %v520_v57  ;;  %v3137_v61 = vunpack.i.l.bf16 %v3136_v58  ;;  %v3140_v62 = vunpack.i.h.bf16 %v3136_v58 }
 0x240   :  { %v344_v1 = vpack.c.bf16 %v3137_v61, %v3137_v61  ;;  %v352_v2 = vpack.c.bf16 %v3140_v62, %v3140_v62 }
 0x242   :  { %v450_v10 = vunpack.c.l.b16 %v344_v1  ;;  %v514_v12 = vunpack.c.l.b16 %v352_v2  ;;  %v3657_v1 = vpop.f32.mrf.mxu1 }
 0x245   :  { %640 = vmax.xlane.f32.xlu2 %v639_v0  ;;  %v3141_v3 = vpop.trf.xlu2 }
 0x246   :  { %v3142_v5 = vunpack.i.l.bf16 %v3141_v3  ;;  %v3145_v6 = vunpack.i.h.bf16 %v3141_v3  ;;  %v3661_v3 = vpop.permute.xlu1 %110 }
 0x248   :  { %v345_v9 = vpack.c.bf16 %v3142_v5, %v3142_v5  ;;  %v353_v11 = vpack.c.bf16 %v3145_v6, %v3145_v6 }
 0x24a   :  { %v451_v15 = vunpack.c.l.b16 %v345_v9  ;;  %v515_v16 = vunpack.c.l.b16 %v353_v11  ;;  %v3659_v2 = vpop.f32.mrf.mxu1 }
 0x24c   :  { %v457_v17 = vpack.c.b16 %v451_v15, %v450_v10  ;;  %v521_v18 = vpack.c.b16 %v515_v16, %v514_v12 }
 0x24d   :  { %v3146_v19 = vpop.trf.xlu2 }
 0x24e   :  { %3008 = vmatmul.msk.bf16.gmra.mxu2 %vm394_vm2, %v457_v17  ;;  %3012 = vmatmul.msk.bf16.gmra.mxu3 %vm394_vm2, %v521_v18  ;;  %v3147_v25 = vunpack.i.l.bf16 %v3146_v19  ;;  %v3150_v28 = vunpack.i.h.bf16 %v3146_v19  ;;  %v635_v5 = vpop.xlane.xlu1 %634 }
 0x24f   :  { %v729_v6 = vsub.f32 %v3627_v23, %v635_v5 }
 0x250   :  { %v346_v29 = vpack.c.bf16 %v3147_v25, %v3147_v25  ;;  %v354_v24 = vpack.c.bf16 %v3150_v28, %v3150_v28 }
 0x251   :  { %v761_v8 = vmul.f32 1.442695, %v729_v6 }
 0x252   :  { %v452_v37 = vunpack.c.l.b16 %v346_v29  ;;  %v516_v39 = vunpack.c.l.b16 %v354_v24  ;;  %v3663_v4 = vpop.f32.mrf.mxu1 }
 0x253   :  { %3208 = vpow2.f32 %v761_v8 }
 0x255   :  { %v3151_v31 = vpop.trf.xlu2 }
 0x256   :  { %v3152_v32 = vunpack.i.l.bf16 %v3151_v31  ;;  %v3155_v33 = vunpack.i.h.bf16 %v3151_v31  ;;  %v642_v31 = vsel %vm632_vm3, %v3657_v1, -inf }
 0x258   :  { %v347_v36 = vpack.c.bf16 %v3152_v32, %v3152_v32  ;;  %v355_v38 = vpack.c.bf16 %v3155_v33, %v3155_v33 }
 0x259   :  { %v3671_v13 = vpop.eup %3208 }
 0x25a   :  { %v453_v42 = vunpack.c.l.b16 %v347_v36  ;;  %v517_v43 = vunpack.c.l.b16 %v355_v38  ;;  %v3666_v7 = vpop.f32.mrf.mxu1  ;;  %v921_v14 = vpack.c.bf16 %v3671_v13, %v3671_v13 }
 0x25c   :  { %v458_v44 = vpack.c.b16 %v453_v42, %v452_v37  ;;  %v522_v45 = vpack.c.b16 %v517_v43, %v516_v39  ;;  %v3681_v17 = vunpack.c.l.b16 %v921_v14 }
 0x25d   :  { %v3156_v46 = vpop.trf.xlu2 }
 0x25e   :  { %3009 = vmatmul.msk.bf16.gmra.mxu2 %vm394_vm2, %v458_v44  ;;  %3013 = vmatmul.msk.bf16.gmra.mxu3 %vm394_vm2, %v522_v45  ;;  %v3160_v49 = vunpack.i.h.bf16 %v3156_v46  ;;  %v3157_v50 = vunpack.i.l.bf16 %v3156_v46  ;;  %v651_v44 = vsel %vm632_vm3, %v3666_v7, -inf  ;;  %v645_v45 = vsel %vm632_vm3, %v3659_v2, -inf }
 0x260   :  { %v356_v51 = vpack.c.bf16 %v3160_v49, %v3160_v49  ;;  %v348_v52 = vpack.c.bf16 %v3157_v50, %v3157_v50 }
 0x262   :  { %v518_v57 = vunpack.c.l.b16 %v356_v51  ;;  %v454_v59 = vunpack.c.l.b16 %v348_v52  ;;  %v3669_v12 = vpop.f32.mrf.mxu1  ;;  %v648_v51 = vsel %vm632_vm3, %v3663_v4, -inf }
 0x263   :  { %v654_v39 = vsel %vm632_vm3, %v3669_v12, -inf }
 0x265   :  { %v3161_v53 = vpop.trf.xlu2 }
 0x266   :  { %v3165_v54 = vunpack.i.h.bf16 %v3161_v53  ;;  %v3162_v55 = vunpack.i.l.bf16 %v3161_v53 }
 0x268   :  { %v357_v56 = vpack.c.bf16 %v3165_v54, %v3165_v54  ;;  %v349_v58 = vpack.c.bf16 %v3162_v55, %v3162_v55 }
 0x26a   :  { %v519_v60 = vunpack.c.l.b16 %v357_v56  ;;  %v455_v61 = vunpack.c.l.b16 %v349_v58  ;;  %v3679_v16 = vpop.f32.mrf.mxu1 }
 0x26b   :  { %v705_v52 = vsel %vm632_vm3, %v3679_v16, -inf }
 0x26c   :  { %v523_v62 = vpack.c.b16 %v519_v60, %v518_v57  ;;  %v459_v0 = vpack.c.b16 %v455_v61, %v454_v59 }
 0x26e   :  { %3014 = vmatmul.msk.bf16.gmra.mxu3 %vm394_vm2, %v523_v62  ;;  %3010 = vmatmul.msk.bf16.gmra.mxu2 %vm394_vm2, %v459_v0 }
 0x272   :  { %v3693_v25 = vpop.f32.mrf.mxu1 }
 0x27a   :  { %v3713_v36 = vpop.f32.mrf.mxu1 }
 0x27b   :  { %v711_v53 = vsel %vm632_vm3, %v3713_v36, -inf }
 0x282   :  { %v3725_v42 = vpop.f32.mrf.mxu1 }
 0x283   :  { %v714_v5 = vsel %vm632_vm3, %v3725_v42, -inf }
 0x28a   :  { %v3733_v46 = vpop.f32.mrf.mxu1 }
 0x292   :  { %v3747_v54 = vpop.f32.mrf.mxu1 }
 0x293   :  { %v720_v59 = vsel %vm632_vm3, %v3747_v54, -inf }
 0x2b0   :  { %v638_v9 = vpop.xlane.xlu2 %637 }
 0x2b1   :  { %v730_v10 = vsub.f32 %v3638_v48, %v638_v9 }
 0x2b3   :  { %v763_v11 = vmul.f32 1.442695, %v730_v10 }
 0x2b5   :  { %3210 = vpow2.f32 %v763_v11 }
 0x2b8   :  { %v641_v62 = vpop.xlane.xlu2 %640 }
 0x2b9   :  { %v3761_v61 = vpop.f32.mrf.mxu1  ;;  %v731_v8 = vsub.f32 %v3645_v63, %v641_v62 }
 0x2ba   :  { %v723_v6 = vsel %vm632_vm3, %v3761_v61, -inf }
 0x2bb   :  { %v3675_v15 = vpop.eup %3210  ;;  %v765_v10 = vmul.f32 1.442695, %v731_v8 }
 0x2bc   :  { %v922_v23 = vpack.c.bf16 %v3675_v15, %v3675_v15  ;;  %v828_v63 = vsel %vm632_vm3, %v3675_v15, 0.0 }
 0x2bd   :  { %3212 = vpow2.f32 %v765_v10 }
 0x2be   :  { %v3683_v18 = vunpack.c.l.b16 %v922_v23 }
 0x2c0   :  { %v969_v48 = vpack.c.b16 %v3683_v18, %v3681_v17 }
 0x2c1   :  { %v3687_v19 = vpop.f32.mrf.mxu2  ;;  %v3689_v20 = vpop.f32.mrf.mxu3 }
 0x2c2   :  { %v657_v21 = vsel %vm632_vm3, %v3687_v19, -inf  ;;  %v681_v35 = vsel %vm632_vm3, %v3689_v20, -inf  ;;  %v3772_v11 = vpop.f32.mrf.mxu1 }
 0x2c3   :  { %658 = vmax.xlane.f32.xlu0 %v657_v21  ;;  %v726_v23 = vsel %vm632_vm3, %v3772_v11, -inf }
 0x2c9   :  { %v3695_v28 = vpop.f32.mrf.mxu2  ;;  %v3697_v29 = vpop.f32.mrf.mxu3 }
 0x2ca   :  { %v684_v24 = vsel %vm632_vm3, %v3697_v29, -inf  ;;  %v660_v22 = vsel %vm632_vm3, %v3695_v28, -inf }
 0x2cb   :  { %685 = vmax.xlane.f32.xlu2 %v684_v24  ;;  %643 = vmax.xlane.f32.xlu0 %v642_v31  ;;  %v3782_v24 = vpop.eup %3212 }
 0x2cc   :  { %661 = vmax.xlane.f32.xlu1 %v660_v22  ;;  %v831_v22 = vsel %vm632_vm3, %v3782_v24, 0.0 }
 0x2d1   :  { %v3705_v32 = vpop.f32.mrf.mxu2  ;;  %v3707_v33 = vpop.f32.mrf.mxu3 }
 0x2d2   :  { %v687_v34 = vsel %vm632_vm3, %v3707_v33, -inf  ;;  %v663_v41 = vsel %vm632_vm3, %v3705_v32, -inf }
 0x2d3   :  { %688 = vmax.xlane.f32.xlu0 %v687_v34 }
 0x2d4   :  { %682 = vmax.xlane.f32.xlu1 %v681_v35  ;;  %v708_v35 = vsel %vm632_vm3, %v3693_v25, -inf }
 0x2d9   :  { %v3715_v37 = vpop.f32.mrf.mxu2  ;;  %v3717_v38 = vpop.f32.mrf.mxu3 }
 0x2da   :  { %v666_v40 = vsel %vm632_vm3, %v3715_v37, -inf  ;;  %v690_v60 = vsel %vm632_vm3, %v3717_v38, -inf }
 0x2db   :  { %655 = vmax.xlane.f32.xlu0 %v654_v39  ;;  %667 = vmax.xlane.f32.xlu2 %v666_v40  ;;  %v717_v40 = vsel %vm632_vm3, %v3733_v46, -inf }
 0x2dc   :  { %664 = vmax.xlane.f32.xlu1 %v663_v41  ;;  %v825_v41 = vsel %vm632_vm3, %v3671_v13, 0.0 }
 0x2e1   :  { %v3727_v43 = vpop.f32.mrf.mxu3  ;;  %v3749_v55 = vpop.f32.mrf.mxu2 }
 0x2e2   :  { %v693_v47 = vsel %vm632_vm3, %v3727_v43, -inf  ;;  %v669_v56 = vsel %vm632_vm3, %v3749_v55, -inf }
 0x2e3   :  { %652 = vmax.xlane.f32.xlu2 %v651_v44 }
 0x2e4   :  { %646 = vmax.xlane.f32.xlu1 %v645_v45 }
 0x2e9   :  { %v3737_v49 = vpop.f32.mrf.mxu3  ;;  %v3763_v0 = vpop.f32.mrf.mxu2 }
 0x2ea   :  { %v696_v50 = vsel %vm632_vm3, %v3737_v49, -inf  ;;  %v672_v9 = vsel %vm632_vm3, %v3763_v0, -inf }
 0x2eb   :  { %697 = vmax.xlane.f32.xlu0 %v696_v50  ;;  %694 = vmax.xlane.f32.xlu2 %v693_v47 }
 0x2ec   :  { %649 = vmax.xlane.f32.xlu1 %v648_v51 }
 0x2f1   :  { %v3753_v57 = vpop.f32.mrf.mxu3  ;;  %v3774_v14 = vpop.f32.mrf.mxu2 }
 0x2f2   :  { %v699_v58 = vsel %vm632_vm3, %v3753_v57, -inf  ;;  %v675_v21 = vsel %vm632_vm3, %v3774_v14, -inf }
 0x2f3   :  { %706 = vmax.xlane.f32.xlu0 %v705_v52  ;;  %712 = vmax.xlane.f32.xlu2 %v711_v53 }
 0x2f4   :  { %670 = vmax.xlane.f32.xlu1 %v669_v56 }
 0x2f9   :  { %v3784_v31 = vpop.f32.mrf.mxu2  ;;  %v3792_v15 = vpop.f32.mrf.mxu3 }
 0x2fa   :  { %v678_v34 = vsel %vm632_vm3, %v3784_v31, -inf  ;;  %v702_v39 = vsel %vm632_vm3, %v3792_v15, -inf }
 0x2fb   :  { %700 = vmax.xlane.f32.xlu0 %v699_v58  ;;  %721 = vmax.xlane.f32.xlu2 %v720_v59 }
 0x2fc   :  { %691 = vmax.xlane.f32.xlu1 %v690_v60 }
 0x303   :  { %715 = vmax.xlane.f32.xlu0 %v714_v5  ;;  %724 = vmax.xlane.f32.xlu2 %v723_v6 }
 0x304   :  { %673 = vmax.xlane.f32.xlu1 %v672_v9 }
 0x30b   :  { %727 = vmax.xlane.f32.xlu0 %v726_v23  ;;  %829 = vadd.xlane.f32.xlu2 %v828_v63 }
 0x30c   :  { %676 = vmax.xlane.f32.xlu1 %v675_v21 }
 0x313   :  { %832 = vadd.xlane.f32.xlu0 %v831_v22 }
 0x314   :  { %679 = vmax.xlane.f32.xlu1 %v678_v34 }
 0x31c   :  { %709 = vmax.xlane.f32.xlu1 %v708_v35 }
 0x324   :  { %703 = vmax.xlane.f32.xlu1 %v702_v39 }
 0x32c   :  { %718 = vmax.xlane.f32.xlu1 %v717_v40 }
 0x334   :  { %826 = vadd.xlane.f32.xlu1 %v825_v41 }
 0x336   :  { %v659_v44 = vpop.xlane.xlu0 %658 }
 0x337   :  { %v737_v45 = vsub.f32 %v3687_v19, %v659_v44 }
 0x339   :  { %v777_v47 = vmul.f32 1.442695, %v737_v45 }
 0x33b   :  { %3214 = vpow2.f32 %v777_v47 }
 0x33e   :  { %v686_v50 = vpop.xlane.xlu2 %685  ;;  %v644_v51 = vpop.xlane.xlu0 %643 }
 0x33f   :  { %v732_v52 = vsub.f32 %v3657_v1, %v644_v51  ;;  %v662_v53 = vpop.xlane.xlu1 %661  ;;  %v746_v56 = vsub.f32 %v3697_v29, %v686_v50 }
 0x340   :  { %v738_v58 = vsub.f32 %v3695_v28, %v662_v53 }
 0x341   :  { %v3215_v59 = vpop.eup %3214  ;;  %v767_v60 = vmul.f32 1.442695, %v732_v52  ;;  %v795_v5 = vmul.f32 1.442695, %v746_v56 }
 0x342   :  { %v779_v62 = vmul.f32 1.442695, %v738_v58  ;;  %v849_v13 = vsel %vm632_vm3, %v3215_v59, 0.0  ;;  %v929_v29 = vpack.c.bf16 %v3215_v59, %v3215_v59 }
 0x343   :  { %850 = vadd.xlane.f32.xlu2 %v849_v13  ;;  %3216 = vpow2.f32 %v767_v60 }
 0x344   :  { %3218 = vpow2.f32 %v779_v62 }
 0x345   :  { %3220 = vpow2.f32 %v795_v5 }
 0x346   :  { %v689_v19 = vpop.xlane.xlu0 %688 }
 0x347   :  { %v683_v6 = vpop.xlane.xlu1 %682  ;;  %v747_v28 = vsub.f32 %v3707_v33, %v689_v19 }
 0x348   :  { %v745_v8 = vsub.f32 %v3689_v20, %v683_v6  ;;  %v3812_v20 = vunpack.c.l.b16 %v929_v29 }
 0x349   :  { %v3806_v1 = vpop.eup %3216  ;;  %v797_v40 = vmul.f32 1.442695, %v747_v28 }
 0x34a   :  { %v793_v9 = vmul.f32 1.442695, %v745_v8  ;;  %v3219_v10 = vpop.eup %3218  ;;  %v834_v23 = vsel %vm632_vm3, %v3806_v1, 0.0 }
 0x34b   :  { %835 = vadd.xlane.f32.xlu1 %v834_v23  ;;  %v852_v21 = vsel %vm632_vm3, %v3219_v10, 0.0  ;;  %v930_v63 = vpack.c.bf16 %v3219_v10, %v3219_v10  ;;  %v3221_v22 = vpop.eup %3220 }
 0x34c   :  { %3222 = vpow2.f32 %v793_v9  ;;  %853 = vadd.xlane.f32.xlu0 %v852_v21  ;;  %v938_v47 = vpack.c.bf16 %v3221_v22, %v3221_v22  ;;  %v876_v58 = vsel %vm632_vm3, %v3221_v22, 0.0 }
 0x34d   :  { %v3814_v39 = vunpack.c.l.b16 %v930_v63  ;;  %3224 = vpow2.f32 %v797_v40 }
 0x34e   :  { %v656_v34 = vpop.xlane.xlu0 %655  ;;  %v668_v35 = vpop.xlane.xlu2 %667  ;;  %v3824_v59 = vunpack.c.l.b16 %v938_v47 }
 0x34f   :  { %v736_v41 = vsub.f32 %v3669_v12, %v656_v34  ;;  %v665_v33 = vpop.xlane.xlu1 %664  ;;  %v1017_v45 = vpack.c.b16 %v3814_v39, %v3812_v20  ;;  %v740_v8 = vsub.f32 %v3715_v37, %v668_v35 }
 0x350   :  { %v739_v44 = vsub.f32 %v3705_v32, %v665_v33 }
 0x351   :  { %v775_v52 = vmul.f32 1.442695, %v736_v41 }
 0x352   :  { %v3223_v50 = vpop.eup %3222  ;;  %v781_v51 = vmul.f32 1.442695, %v739_v44 }
 0x353   :  { %v873_v53 = vsel %vm632_vm3, %v3223_v50, 0.0  ;;  %v937_v56 = vpack.c.bf16 %v3223_v50, %v3223_v50  ;;  %v3830_v19 = vpop.eup %3224 }
 0x354   :  { %874 = vadd.xlane.f32.xlu2 %v873_v53  ;;  %3226 = vpow2.f32 %v781_v51  ;;  %877 = vadd.xlane.f32.xlu0 %v876_v58  ;;  %v879_v10 = vsel %vm632_vm3, %v3830_v19, 0.0 }
 0x355   :  { %v3822_v12 = vunpack.c.l.b16 %v937_v56  ;;  %3228 = vpow2.f32 %v775_v52 }
 0x356   :  { %v653_v32 = vpop.xlane.xlu2 %652 }
 0x357   :  { %v735_v60 = vsub.f32 %v3666_v7, %v653_v32  ;;  %v647_v62 = vpop.xlane.xlu1 %646  ;;  %v1065_v13 = vpack.c.b16 %v3824_v59, %v3822_v12 }
 0x358   :  { %v733_v5 = vsub.f32 %v3659_v2, %v647_v62  ;;  %v783_v2 = vmul.f32 1.442695, %v740_v8 }
 0x359   :  { %v773_v6 = vmul.f32 1.442695, %v735_v60 }
 0x35a   :  { %v769_v9 = vmul.f32 1.442695, %v733_v5  ;;  %v3833_v29 = vpop.eup %3226 }
 0x35b   :  { %3230 = vpow2.f32 %v773_v6  ;;  %v855_v7 = vsel %vm632_vm3, %v3833_v29, 0.0  ;;  %v3839_v28 = vpop.eup %3228 }
 0x35c   :  { %3232 = vpow2.f32 %v769_v9  ;;  %880 = vadd.xlane.f32.xlu0 %v879_v10  ;;  %856 = vadd.xlane.f32.xlu1 %v855_v7  ;;  %v928_v63 = vpack.c.bf16 %v3839_v28, %v3839_v28 }
 0x35d   :  { %3234 = vpow2.f32 %v783_v2 }
 0x35e   :  { %v695_v23 = vpop.xlane.xlu2 %694  ;;  %v968_v47 = vunpack.c.l.b16 %v928_v63 }
 0x35f   :  { %v650_v21 = vpop.xlane.xlu1 %649  ;;  %v749_v35 = vsub.f32 %v3727_v43, %v695_v23  ;;  %v698_v43 = vpop.xlane.xlu0 %697 }
 0x360   :  { %v734_v37 = vsub.f32 %v3663_v4, %v650_v21  ;;  %v923_v21 = vpack.c.bf16 %v3782_v24, %v3782_v24 }
 0x361   :  { %v3844_v22 = vpop.eup %3230  ;;  %v801_v4 = vmul.f32 1.442695, %v749_v35 }
 0x362   :  { %v3233_v34 = vpop.eup %3232  ;;  %v771_v40 = vmul.f32 1.442695, %v734_v37  ;;  %v927_v41 = vpack.c.bf16 %v3844_v22, %v3844_v22 }
 0x363   :  { %v837_v33 = vsel %vm632_vm3, %v3233_v34, 0.0  ;;  %v3850_v52 = vpop.eup %3234  ;;  %v925_v32 = vpack.c.bf16 %v3233_v34, %v3233_v34 }
 0x364   :  { %838 = vadd.xlane.f32.xlu2 %v837_v33  ;;  %v967_v44 = vunpack.c.l.b16 %v927_v41  ;;  %3236 = vpow2.f32 %v771_v40  ;;  %v858_v62 = vsel %vm632_vm3, %v3850_v52, 0.0  ;;  %v750_v40 = vsub.f32 %v3737_v49, %v698_v43 }
 0x365   :  { %3238 = vpow2.f32 %v801_v4  ;;  %v965_v8 = vunpack.c.l.b16 %v925_v32  ;;  %v963_v33 = vunpack.c.l.b16 %v923_v21 }
 0x366   :  { %v972_v50 = vpack.c.b16 %v968_v47, %v967_v44  ;;  %v803_v44 = vmul.f32 1.442695, %v750_v40  ;;  %v3880_v32 = vpop.xlane.xlu2 %712 }
 0x367   :  { %v671_v51 = vpop.xlane.xlu1 %670  ;;  %v707_v41 = vpop.xlane.xlu0 %706 }
 0x368   :  { %v741_v53 = vsub.f32 %v3749_v55, %v671_v51  ;;  %v986_v56 = vsel %vm632_vm3, %v972_v50, 0  ;;  %v924_v55 = vpack.c.bf16 %v3806_v1, %v3806_v1  ;;  %v846_v51 = vsel %vm632_vm3, %v3839_v28, 0.0  ;;  %v196_v28 = vpop.f32.mrf.mxu0 }
 0x369   :  { %992 = vmatpush.bf16.xpose.msrb.mxu2 %v986_v56 }
 0x36a   :  { %v785_v58 = vmul.f32 1.442695, %v741_v53  ;;  %v3237_v60 = vpop.eup %3236  ;;  %v964_v34 = vunpack.c.l.b16 %v924_v55 }
 0x36b   :  { %v840_v5 = vsel %vm632_vm3, %v3237_v60, 0.0  ;;  %v926_v6 = vpack.c.bf16 %v3237_v60, %v3237_v60  ;;  %v3859_v7 = vpop.eup %3238 }
 0x36c   :  { %859 = vadd.xlane.f32.xlu2 %v858_v62  ;;  %3240 = vpow2.f32 %v785_v58  ;;  %841 = vadd.xlane.f32.xlu0 %v840_v5  ;;  %v885_v1 = vsel %vm632_vm3, %v3859_v7, 0.0  ;;  %v970_v24 = vpack.c.b16 %v964_v34, %v963_v33 }
 0x36d   :  { %v966_v9 = vunpack.c.l.b16 %v926_v6  ;;  %v753_v6 = vsub.f32 %v3679_v16, %v707_v41 }
 0x36e   :  { %v980_v4 = vsel %vm632_vm3, %v970_v24, 0 }
 0x36f   :  { %v692_v10 = vpop.xlane.xlu1 %691  ;;  %v971_v23 = vpack.c.b16 %v966_v9, %v965_v8  ;;  %v701_v56 = vpop.xlane.xlu0 %700  ;;  %v197_v8 = vadd.f32 %v196_v28, %v3635_v30  ;;  %v809_v55 = vmul.f32 1.442695, %v753_v6 }
 0x370   :  { %v748_v2 = vsub.f32 %v3717_v38, %v692_v10  ;;  %v751_v21 = vsub.f32 %v3753_v57, %v701_v56 }
 0x371   :  { %v983_v63 = vsel %vm632_vm3, %v971_v23, 0  ;;  %v370_v18 = vpack.c.bf16 %v197_v8, %v197_v8  ;;  %v3896_v23 = vpop.xlane.xlu2 %721 }
 0x372   :  { %v799_v37 = vmul.f32 1.442695, %v748_v2  ;;  %v3865_v35 = vpop.eup %3240  ;;  %993 = vmatpush.bf16.xpose.msrb.mxu2 %v983_v63  ;;  %v805_v63 = vmul.f32 1.442695, %v751_v21 }
 0x373   :  { %v861_v38 = vsel %vm632_vm3, %v3865_v35, 0.0 }
 0x374   :  { %886 = vadd.xlane.f32.xlu2 %v885_v1  ;;  %3242 = vpow2.f32 %v799_v37  ;;  %862 = vadd.xlane.f32.xlu0 %v861_v38 }
 0x375   :  { %3244 = vpow2.f32 %v803_v44 }
 0x377   :  { %v674_v47 = vpop.xlane.xlu1 %673 }
 0x378   :  { %v742_v49 = vsub.f32 %v3763_v0, %v674_v47  ;;  %v977_v0 = vsel %vm632_vm3, %v969_v48, 0  ;;  %v716_v48 = vpop.xlane.xlu0 %715 }
 0x379   :  { %v725_v57 = vpop.xlane.xlu2 %724 }
 0x37a   :  { %v3873_v50 = vpop.eup %3242  ;;  %994 = vmatpush.bf16.xpose.msrb.mxu2 %v980_v4  ;;  %v787_v43 = vmul.f32 1.442695, %v742_v49 }
 0x37b   :  { %v882_v53 = vsel %vm632_vm3, %v3873_v50, 0.0  ;;  %v3883_v62 = vpop.eup %3244 }
 0x37c   :  { %847 = vadd.xlane.f32.xlu0 %v846_v51  ;;  %883 = vadd.xlane.f32.xlu1 %v882_v53  ;;  %3246 = vpow2.f32 %v787_v43  ;;  %v888_v9 = vsel %vm632_vm3, %v3883_v62, 0.0  ;;  %v933_v43 = vpack.c.bf16 %v3865_v35, %v3865_v35 }
 0x37f   :  { %v677_v58 = vpop.xlane.xlu1 %676 }
 0x380   :  { %v743_v60 = vsub.f32 %v3774_v14, %v677_v58  ;;  %v843_v14 = vsel %vm632_vm3, %v3844_v22, 0.0  ;;  %v728_v38 = vpop.xlane.xlu0 %727 }
 0x381   :  { %v760_v47 = vsub.f32 %v3772_v11, %v728_v38  ;;  %v756_v11 = vsub.f32 %v3725_v42, %v716_v48  ;;  %v932_v42 = vpack.c.bf16 %v3850_v52, %v3850_v52  ;;  %v941_v38 = vpack.c.bf16 %v3859_v7, %v3859_v7  ;;  %v830_v12 = vpop.xlane.xlu2 %829 }
 0x382   :  { %v789_v5 = vmul.f32 1.442695, %v743_v60  ;;  %995 = vmatpush.bf16.xpose.msrb.mxu2 %v977_v0  ;;  %v3247_v16 = vpop.eup %3246 }
 0x383   :  { %v864_v37 = vsel %vm632_vm3, %v3247_v16, 0.0  ;;  %v934_v51 = vpack.c.bf16 %v3247_v16, %v3247_v16 }
 0x384   :  { %3248 = vpow2.f32 %v789_v5  ;;  %889 = vadd.xlane.f32.xlu0 %v888_v9  ;;  %844 = vadd.xlane.f32.xlu1 %v843_v14  ;;  %v823_v5 = vmul.f32 1.442695, %v760_v47  ;;  %v1013_v14 = vunpack.c.l.b16 %v933_v43 }
 0x385   :  { %3250 = vpow2.f32 %v809_v55  ;;  %v1014_v28 = vunpack.c.l.b16 %v934_v51  ;;  %v931_v55 = vpack.c.bf16 %v3833_v29, %v3833_v29  ;;  %v1061_v51 = vunpack.c.l.b16 %v941_v38  ;;  %v1518_v38 = vld [vmem:[%s4589_s2 + $0x18] sm:$0xff] }
 0x387   :  { %v680_v17 = vpop.xlane.xlu1 %679  ;;  %v1011_v16 = vunpack.c.l.b16 %v931_v55 }
 0x388   :  { %v744_v10 = vsub.f32 %v3784_v31, %v680_v17  ;;  %v1019_v17 = vpack.c.b16 %v1014_v28, %v1013_v14 }
 0x389   :  { %3019 = vmatmul.msk.bf16.vlgmr.msrb.gmra.mxu2 %vm632_vm3, %v370_v18  ;;  %v815_v18 = vmul.f32 1.442695, %v756_v11 }
 0x38a   :  { %v3249_v2 = vpop.eup %3248  ;;  %v791_v30 = vmul.f32 1.442695, %v744_v10 }
 0x38b   :  { %v867_v22 = vsel %vm632_vm3, %v3249_v2, 0.0  ;;  %v3903_v40 = vpop.eup %3250  ;;  %v935_v1 = vpack.c.bf16 %v3249_v2, %v3249_v2  ;;  %v1012_v2 = vunpack.c.l.b16 %v932_v42 }
 0x38c   :  { %3252 = vpow2.f32 %v791_v30  ;;  %868 = vadd.xlane.f32.xlu2 %v867_v22  ;;  %865 = vadd.xlane.f32.xlu1 %v864_v37  ;;  %v897_v44 = vsel %vm632_vm3, %v3903_v40, 0.0  ;;  %v1031_v30 = vsel %vm632_vm3, %v1019_v17, 0 }
 0x38d   :  { %3254 = vpow2.f32 %v805_v63  ;;  %v1015_v4 = vunpack.c.l.b16 %v935_v1 }
 0x38f   :  { %v710_v34 = vpop.xlane.xlu1 %709 }
 0x390   :  { %v754_v31 = vsub.f32 %v3693_v25, %v710_v34  ;;  %v759_v25 = vsub.f32 %v3761_v61, %v725_v57  ;;  %v755_v61 = vsub.f32 %v3713_v36, %v3880_v32  ;;  %v758_v32 = vsub.f32 %v3747_v54, %v3896_v23 }
 0x392   :  { %v3253_v41 = vpop.eup %3252  ;;  %v811_v33 = vmul.f32 1.442695, %v754_v31  ;;  %v821_v9 = vmul.f32 1.442695, %v759_v25  ;;  %v813_v36 = vmul.f32 1.442695, %v755_v61  ;;  %v198_v61 = vpop.f32.mrf.mxu0 }
 0x393   :  { %v936_v24 = vpack.c.bf16 %v3253_v41, %v3253_v41  ;;  %v3255_v60 = vpop.eup %3254  ;;  %v819_v37 = vmul.f32 1.442695, %v758_v32  ;;  %v870_v54 = vsel %vm632_vm3, %v3253_v41, 0.0  ;;  %v199_v42 = vadd.f32 %v198_v61, %v3631_v26 }
 0x394   :  { %3256 = vpow2.f32 %v811_v33  ;;  %898 = vadd.xlane.f32.xlu1 %v897_v44  ;;  %v943_v29 = vpack.c.bf16 %v3255_v60, %v3255_v60  ;;  %v942_v33 = vpack.c.bf16 %v3883_v62, %v3883_v62 }
 0x395   :  { %v1016_v49 = vunpack.c.l.b16 %v936_v24 }
 0x396   :  { %v1063_v31 = vunpack.c.l.b16 %v943_v29  ;;  %v1062_v25 = vunpack.c.l.b16 %v942_v33 }
 0x397   :  { %v704_v53 = vpop.xlane.xlu1 %703  ;;  %v1020_v56 = vpack.c.b16 %v1016_v49, %v1015_v4 }
 0x398   :  { %v752_v58 = vsub.f32 %v3792_v15, %v704_v53  ;;  %v891_v15 = vsel %vm632_vm3, %v3255_v60, 0.0 }
 0x399   :  { %v1034_v0 = vsel %vm632_vm3, %v1020_v56, 0 }
 0x39a   :  { %v3913_v6 = vpop.eup %3256  ;;  %v807_v8 = vmul.f32 1.442695, %v752_v58  ;;  %1040 = vmatpush.bf16.xpose.msrb.mxu3 %v1034_v0  ;;  %v940_v0 = vpack.c.bf16 %v3873_v50, %v3873_v50 }
 0x39b   :  { %v900_v35 = vsel %vm632_vm3, %v3913_v6, 0.0 }
 0x39c   :  { %3258 = vpow2.f32 %v807_v8  ;;  %901 = vadd.xlane.f32.xlu2 %v900_v35  ;;  %892 = vadd.xlane.f32.xlu1 %v891_v15  ;;  %v939_v8 = vpack.c.bf16 %v3830_v19, %v3830_v19  ;;  %v1025_v35 = vsel %vm632_vm3, %v1017_v45, 0  ;;  %v1060_v15 = vunpack.c.l.b16 %v940_v0 }
 0x39d   :  { %3260 = vpow2.f32 %v823_v5  ;;  %v1067_v5 = vpack.c.b16 %v1062_v25, %v1061_v51 }
 0x39e   :  { %3262 = vpow2.f32 %v821_v9 }
 0x39f   :  { %v719_v48 = vpop.xlane.xlu1 %718  ;;  %3264 = vpow2.f32 %v815_v18  ;;  %v1079_v14 = vsel %vm632_vm3, %v1067_v5, 0  ;;  %v1059_v18 = vunpack.c.l.b16 %v939_v8 }
 0x3a0   :  { %v757_v10 = vsub.f32 %v3733_v46, %v719_v48  ;;  %3266 = vpow2.f32 %v813_v36  ;;  %v1018_v46 = vpack.c.b16 %v1012_v2, %v1011_v16  ;;  %v371_v48 = vpack.c.bf16 %v199_v42, %v199_v42 }
 0x3a1   :  { %v1066_v45 = vpack.c.b16 %v1060_v15, %v1059_v18 }
 0x3a2   :  { %v3259_v21 = vpop.eup %3258  ;;  %v817_v52 = vmul.f32 1.442695, %v757_v10  ;;  %1041 = vmatpush.bf16.xpose.msrb.mxu3 %v1031_v30  ;;  %v1028_v41 = vsel %vm632_vm3, %v1018_v46, 0 }
 0x3a3   :  { %v3261_v22 = vpop.eup %3260  ;;  %v894_v63 = vsel %vm632_vm3, %v3259_v21, 0.0  ;;  %v944_v34 = vpack.c.bf16 %v3259_v21, %v3259_v21  ;;  %v1076_v26 = vsel %vm632_vm3, %v1066_v45, 0  ;;  %v946_v21 = vpack.c.bf16 %v3913_v6, %v3913_v6  ;;  %v1515_v6 = vld [vmem:[%s4589_s2] sm:$0xff] }
 0x3a4   :  { %3268 = vpow2.f32 %v817_v52  ;;  %895 = vadd.xlane.f32.xlu2 %v894_v63  ;;  %v3263_v23 = vpop.eup %3262  ;;  %871 = vadd.xlane.f32.xlu1 %v870_v54  ;;  %v952_v24 = vpack.c.bf16 %v3261_v22, %v3261_v22  ;;  %v918_v17 = vsel %vm632_vm3, %v3261_v22, 0.0  ;;  %v201_v52 = vpop.f32.mrf.mxu0  ;;  %v945_v22 = vpack.c.bf16 %v3903_v40, %v3903_v40 }
 0x3a5   :  { %v1064_v1 = vunpack.c.l.b16 %v944_v34  ;;  %3270 = vpow2.f32 %v819_v37  ;;  %v3265_v44 = vpop.eup %3264  ;;  %v951_v47 = vpack.c.bf16 %v3263_v23, %v3263_v23  ;;  %v915_v19 = vsel %vm632_vm3, %v3263_v23, 0.0  ;;  %v833_v23 = vpop.xlane.xlu0 %832 }
 0x3a6   :  { %v3267_v4 = vpop.eup %3266  ;;  %v1112_v56 = vunpack.c.l.b16 %v952_v24  ;;  %v906_v7 = vsel %vm632_vm3, %v3265_v44, 0.0  ;;  %v948_v32 = vpack.c.bf16 %v3265_v44, %v3265_v44  ;;  %v1073_v37 = vsel %vm632_vm3, %v1065_v13, 0  ;;  %v1521_v44 = vld [vmem:[%s4589_s2 + $0x30] sm:$0xff] }
 0x3a7   :  { %v1068_v57 = vpack.c.b16 %v1064_v1, %v1063_v31  ;;  %v903_v43 = vsel %vm632_vm3, %v3267_v4, 0.0  ;;  %v1111_v58 = vunpack.c.l.b16 %v951_v47  ;;  %v947_v10 = vpack.c.bf16 %v3267_v4, %v3267_v4 }
 0x3a8   :  { %v1108_v2 = vunpack.c.l.b16 %v948_v32  ;;  %v1106_v34 = vunpack.c.l.b16 %v946_v21  ;;  %v202_v54 = vadd.f32 %v201_v52, %v3661_v3  ;;  %v1105_v46 = vunpack.c.l.b16 %v945_v22 }
 0x3a9   :  { %v1082_v49 = vsel %vm632_vm3, %v1068_v57, 0  ;;  %v1116_v28 = vpack.c.b16 %v1112_v56, %v1111_v58  ;;  %v1107_v30 = vunpack.c.l.b16 %v947_v10  ;;  %v827_v57 = vpop.xlane.xlu1 %826 }
 0x3aa   :  { %v3269_v53 = vpop.eup %3268  ;;  %1042 = vmatpush.bf16.xpose.msrb.mxu3 %v1028_v41  ;;  %1088 = vmatpush.bf16.xpose.msra.mxu2 %v1082_v49  ;;  %v1113_v31 = vpack.c.b16 %v1106_v34, %v1105_v46  ;;  %v372_v40 = vpack.c.bf16 %v202_v54, %v202_v54 }
 0x3ab   :  { %v909_v62 = vsel %vm632_vm3, %v3269_v53, 0.0  ;;  %v3271_v60 = vpop.eup %3270  ;;  %v949_v11 = vpack.c.bf16 %v3269_v53, %v3269_v53  ;;  %v1130_v55 = vsel %vm632_vm3, %v1116_v28, 0  ;;  %v1114_v29 = vpack.c.b16 %v1108_v2, %v1107_v30 }
 0x3ac   :  { %907 = vadd.xlane.f32.xlu2 %v906_v7  ;;  %910 = vadd.xlane.f32.xlu0 %v909_v62  ;;  %v950_v9 = vpack.c.bf16 %v3271_v60, %v3271_v60  ;;  %v912_v20 = vsel %vm632_vm3, %v3271_v60, 0.0  ;;  %v203_v1 = vpop.f32.mrf.mxu0  ;;  %v1121_v59 = vsel %vm632_vm3, %v1113_v31, 0 }
 0x3ad   :  { %904 = vadd.xlane.f32.xlu1 %v903_v43  ;;  %v1109_v50 = vunpack.c.l.b16 %v949_v11  ;;  %v1124_v63 = vsel %vm632_vm3, %v1114_v29, 0  ;;  %v204_v13 = vadd.f32 %v203_v1, %v3633_v27 }
 0x3ae   :  { %v1110_v39 = vunpack.c.l.b16 %v950_v9 }
 0x3af   :  { %v373_v33 = vpack.c.bf16 %v204_v13, %v204_v13 }
 0x3b0   :  { %v1115_v36 = vpack.c.b16 %v1110_v39, %v1109_v50 }
 0x3b2   :  { %1043 = vmatpush.bf16.xpose.msrb.mxu3 %v1025_v35  ;;  %1089 = vmatpush.bf16.xpose.msra.mxu2 %v1079_v14  ;;  %v1127_v16 = vsel %vm632_vm3, %v1115_v36, 0 }
 0x3b4   :  { %916 = vadd.xlane.f32.xlu2 %v915_v19  ;;  %919 = vadd.xlane.f32.xlu0 %v918_v17 }
 0x3b5   :  { %913 = vadd.xlane.f32.xlu1 %v912_v20 }
 0x3b6   :  { %v851_v24 = vpop.xlane.xlu2 %850 }
 0x3b7   :  { %3272 = vrcp.f32 %v851_v24 }
 0x3b9   :  { %3020 = vmatmul.msk.bf16.vlgmr.msrb.gmra.mxu3 %vm632_vm3, %v371_v48 }
 0x3ba   :  { %1136 = vmatpush.bf16.xpose.msra.mxu3 %v1130_v55  ;;  %1090 = vmatpush.bf16.xpose.msra.mxu2 %v1076_v26 }
 0x3bd   :  { %v3273_v41 = vpop.eup %3272 }
 0x3be   :  { %v836_v4 = vpop.xlane.xlu1 %835 }
 0x3bf   :  { %v854_v3 = vpop.xlane.xlu0 %853 }
 0x3c0   :  { %3274 = vrcp.f32 %v854_v3 }
 0x3c2   :  { %1137 = vmatpush.bf16.xpose.msra.mxu3 %v1127_v16  ;;  %1091 = vmatpush.bf16.xpose.msra.mxu2 %v1073_v37 }
 0x3c6   :  { %v3275_v53 = vpop.eup %3274 }
 0x3c7   :  { %v3980_v47 = vpop.xlane.xlu0 %877  ;;  %v3982_v27 = vpop.xlane.xlu2 %874 }
 0x3c8   :  { %1529 = vperm.xlu0 %3121, %v1515_v6  }
 0x3c9   :  { %3021 = vmatmul.msk.bf16.vlgmr.msra.gmra.mxu2 %vm632_vm3, %v372_v40 }
 0x3ca   :  { %1138 = vmatpush.bf16.xpose.msra.mxu3 %v1124_v63 }
 0x3cf   :  { %v3984_v49 = vpop.xlane.xlu0 %880  ;;  %v857_v25 = vpop.xlane.xlu1 %856 }
 0x3d0   :  { %1544 = vperm.xlu0 %3121, %v1518_v38   ;;  %3276 = vrcp.f32 %v857_v25 }
 0x3d1   :  { %3278 = vrcp.f32 %v827_v57 }
 0x3d2   :  { %1139 = vmatpush.bf16.xpose.msra.mxu3 %v1121_v59 }
 0x3d6   :  { %v3277_v62 = vpop.eup %3276 }
 0x3d7   :  { %v839_v51 = vpop.xlane.xlu2 %838  ;;  %v3279_v43 = vpop.eup %3278 }
 0x3d8   :  { %1559 = vperm.xlu0 %3121, %v1521_v44  }
 0x3d9   :  { %3022 = vmatmul.msk.bf16.vlgmr.msra.gmra.mxu3 %vm632_vm3, %v373_v33 }
 0x3dd   :  { %1209 = vxpose.xlu2.b32.start [1/8] (short) (narrow) %v3273_v41, 8  ;;  %v1519_v41 = vld [vmem:[%s4589_s2 + $0x20] sm:$0xff] }
 0x3df   :  { %v842_v56 = vpop.xlane.xlu0 %841  ;;  %v860_v7 = vpop.xlane.xlu2 %859 }
 0x3e0   :  { %3280 = vrcp.f32 %v860_v7 }
 0x3e1   :  { %3282 = vrcp.f32 %v830_v12 }
 0x3e5   :  { %1210 = vxpose.xlu2.b32.cont [2/8] (short) (narrow) %v3275_v53, 8 }
 0x3e6   :  { %v3281_v5 = vpop.eup %3280 }
 0x3e7   :  { %v863_v60 = vpop.xlane.xlu0 %862  ;;  %v3283_v0 = vpop.eup %3282 }
 0x3e8   :  { %3284 = vrcp.f32 %v863_v60  ;;  %v3988_v8 = vpop.xlane.xlu2 %886 }
 0x3e9   :  { %3286 = vrcp.f32 %v833_v23 }
 0x3ea   :  { %3288 = vrcp.f32 %v836_v4 }
 0x3ed   :  { %1211 = vxpose.xlu2.b32.cont [3/8] (short) (narrow) %v3277_v62, 8  ;;  %v1520_v62 = vld [vmem:[%s4589_s2 + $0x28] sm:$0xff] }
 0x3ee   :  { %v3285_v11 = vpop.eup %3284 }
 0x3ef   :  { %1177 = vxpose.xlu1.b32.start [1/8] (short) (narrow) %v3279_v43, 8  ;;  %v3986_v58 = vpop.xlane.xlu1 %883  ;;  %v3287_v61 = vpop.eup %3286 }
 0x3f0   :  { %v3289_v14 = vpop.eup %3288  ;;  %v848_v48 = vpop.xlane.xlu0 %847 }
 0x3f5   :  { %1212 = vxpose.xlu2.b32.cont [4/8] (short) (narrow) %v3281_v5, 8 }
 0x3f7   :  { %1178 = vxpose.xlu1.b32.cont [2/8] (short) (narrow) %v3283_v0, 8  ;;  %v845_v28 = vpop.xlane.xlu1 %844 }
 0x3f8   :  { %v890_v21 = vpop.xlane.xlu0 %889 }
 0x3fd   :  { %1213 = vxpose.xlu2.b32.cont [5/8] (short) (narrow) %v3285_v11, 8 }
 0x3ff   :  { %1179 = vxpose.xlu1.b32.cont [3/8] (short) (narrow) %v3287_v61, 8  ;;  %v866_v9 = vpop.xlane.xlu1 %865  ;;  %v869_v35 = vpop.xlane.xlu2 %868 }
 0x400   :  { %3290 = vrcp.f32 %v866_v9 }
 0x401   :  { %3292 = vrcp.f32 %v839_v51  ;;  %v1522_v51 = vld [vmem:[%s4589_s2 + $0x38] sm:$0xff] }
 0x402   :  { %3294 = vrcp.f32 %v869_v35 }
 0x406   :  { %v3291_v15 = vpop.eup %3290 }
 0x407   :  { %1180 = vxpose.xlu1.b32.cont [4/8] (short) (narrow) %v3289_v14, 8  ;;  %1214 = vxpose.xlu2.b32.cont [6/8] (short) (narrow) %v3291_v15, 8  ;;  %v899_v55 = vpop.xlane.xlu1 %898  ;;  %v3293_v50 = vpop.eup %3292  ;;  %v1517_v14 = vld [vmem:[%s4589_s2 + $0x10] sm:$0xff] }
 0x408   :  { %3296 = vrcp.f32 %v899_v55  ;;  %v3295_v19 = vpop.eup %3294  ;;  %v3035_v15 = vld [vmem:[%s4587_s0 + $0x30] sm:$0xff]  ;;  %v3036_v55 = vld [vmem:[%s4587_s0 + $0x38] sm:$0xff] }
 0x409   :  { %3298 = vrcp.f32 %v842_v56 }
 0x40c   :  { %v3990_v42 = vpop.f32.mrf.mxu2 }
 0x40e   :  { %v3297_v17 = vpop.eup %3296 }
 0x40f   :  { %1181 = vxpose.xlu1.b32.cont [5/8] (short) (narrow) %v3293_v50, 8  ;;  %v902_v18 = vpop.xlane.xlu2 %901  ;;  %1215 = vxpose.xlu2.b32.cont [7/8] (short) (narrow) %v3295_v19, 8  ;;  %v893_v20 = vpop.xlane.xlu1 %892  ;;  %v1502_v19 = vpack.c.bf16 %v3036_v55, %v3035_v15 }
 0x410   :  { %3300 = vrcp.f32 %v902_v18  ;;  %1273 = vxpose.xlu0.b32.start [1/8] (short) (narrow) %v3297_v17, 8  ;;  %v3299_v39 = vpop.eup %3298  ;;  %v3034_v18 = vld [vmem:[%s4587_s0 + $0x28] sm:$0xff] }
 0x411   :  { %3302 = vrcp.f32 %v845_v28 }
 0x414   :  { %v999_v45 = vpop.f32.mrf.mxu2 }
 0x415   :  { %v3105_v45 = vld [vmem:[%s4588_s1] sm:$0xff] }
 0x416   :  { %v3301_v36 = vpop.eup %3300 }
 0x417   :  { %1182 = vxpose.xlu1.b32.cont [6/8] (short) (narrow) %v3299_v39, 8  ;;  %v872_v32 = vpop.xlane.xlu1 %871  ;;  %v896_v10 = vpop.xlane.xlu2 %895 }
 0x418   :  { %1274 = vxpose.xlu0.b32.cont [2/8] (short) (narrow) %v3301_v36, 8  ;;  %3304 = vrcp.f32 %v872_v32  ;;  %v3303_v26 = vpop.eup %3302  ;;  %v3106_v36 = vld [vmem:[%s4588_s1 + $0x8] sm:$0xff]  ;;  %v3107_v32 = vld [vmem:[%s4588_s1 + $0x10] sm:$0xff] }
 0x419   :  { %3306 = vrcp.f32 %v848_v48  ;;  %v3108_v48 = vld [vmem:[%s4588_s1 + $0x18] sm:$0xff] }
 0x41a   :  { %3308 = vrcp.f32 %v3982_v27 }
 0x41e   :  { %v3305_v16 = vpop.eup %3304 }
 0x41f   :  { %1183 = vxpose.xlu1.b32.cont [7/8] (short) (narrow) %v3303_v26, 8  ;;  %1216 = vxpose.xlu2.b32.end [8/8] (short) (narrow) %v3305_v16, 8  ;;  %v3307_v30 = vpop.eup %3306  ;;  %v908_v52 = vpop.xlane.xlu2 %907 }
 0x420   :  { %v905_v2 = vpop.xlane.xlu1 %904  ;;  %v3309_v29 = vpop.eup %3308 }
 0x421   :  { %3310 = vrcp.f32 %v905_v2  ;;  %v911_v63 = vpop.xlane.xlu0 %910 }
 0x422   :  { %3312 = vrcp.f32 %v3980_v47 }
 0x423   :  { %3314 = vrcp.f32 %v908_v52 }
 0x424   :  { %3316 = vrcp.f32 %v3984_v49  ;;  %v1516_v49 = vld [vmem:[%s4589_s2 + $0x8] sm:$0xff] }
 0x425   :  { %3318 = vrcp.f32 %v911_v63 }
 0x426   :  { %3320 = vrcp.f32 %v3986_v58 }
 0x427   :  { %1184 = vxpose.xlu1.b32.end [8/8] (short) (narrow) %v3307_v30, 8  ;;  %v3311_v22 = vpop.eup %3310  ;;  %1241 = vxpose.xlu2.b32.start [1/8] (short) (narrow) %v3309_v29, 8  ;;  %v917_v40 = vpop.xlane.xlu2 %916 }
 0x428   :  { %1275 = vxpose.xlu0.b32.cont [3/8] (short) (narrow) %v3311_v22, 8  ;;  %v3313_v37 = vpop.eup %3312  ;;  %v914_v46 = vpop.xlane.xlu1 %913 }
 0x429   :  { %v3315_v34 = vpop.eup %3314  ;;  %3322 = vrcp.f32 %v914_v46  ;;  %v920_v13 = vpop.xlane.xlu0 %919 }
 0x42a   :  { %v3317_v54 = vpop.eup %3316  ;;  %3324 = vrcp.f32 %v3988_v8 }
 0x42b   :  { %v3319_v23 = vpop.eup %3318  ;;  %3326 = vrcp.f32 %v917_v40 }
 0x42c   :  { %v3321_v31 = vpop.eup %3320  ;;  %3328 = vrcp.f32 %v890_v21 }
 0x42d   :  { %3330 = vrcp.f32 %v920_v13 }
 0x42e   :  { %3332 = vrcp.f32 %v893_v20  ;;  %v3104_v20 = vld [vmem:[%s4590_s3 + $0x8] sm:$0xff] }
 0x42f   :  { %1242 = vxpose.xlu2.b32.cont [2/8] (short) (narrow) %v3313_v37, 8  ;;  %v3323_v1 = vpop.eup %3322  ;;  %3334 = vrcp.f32 %v896_v10 }
 0x430   :  { %1276 = vxpose.xlu0.b32.cont [4/8] (short) (narrow) %v3315_v34, 8  ;;  %v3325_v59 = vpop.eup %3324 }
 0x431   :  { %v3327_v3 = vpop.eup %3326 }
 0x432   :  { %v3329_v33 = vpop.eup %3328 }
 0x433   :  { %v3331_v24 = vpop.eup %3330 }
 0x434   :  { %v3333_v47 = vpop.eup %3332 }
 0x435   :  { %v3335_v4 = vpop.eup %3334 }
 0x437   :  { %1243 = vxpose.xlu2.b32.cont [3/8] (short) (narrow) %v3317_v54, 8 }
 0x438   :  { %1277 = vxpose.xlu0.b32.cont [5/8] (short) (narrow) %v3319_v23, 8  ;;  %v3109_v23 = vld [vmem:[%s4588_s1 + $0x20] sm:$0xff] }
 0x43a   :  { %v1530_v25 = vpop.permute.xlu0 %1529 }
 0x43c   :  { %v1045_v6 = vpop.f32.mrf.mxu3 }
 0x43f   :  { %1244 = vxpose.xlu2.b32.cont [4/8] (short) (narrow) %v3321_v31, 8 }
 0x440   :  { %1278 = vxpose.xlu0.b32.cont [6/8] (short) (narrow) %v3323_v1, 8 }
 0x442   :  { %v1545_v53 = vpop.permute.xlu0 %1544 }
 0x444   :  { %v1047_v12 = vpop.f32.mrf.mxu3 }
 0x447   :  { %1245 = vxpose.xlu2.b32.cont [5/8] (short) (narrow) %v3325_v59, 8 }
 0x448   :  { %1279 = vxpose.xlu0.b32.cont [7/8] (short) (narrow) %v3327_v3, 8 }
 0x44a   :  { %v4006_v56 = vpop.permute.xlu0 %1559 }
 0x44c   :  { %v1093_v38 = vpop.f32.mrf.mxu2 }
 0x44f   :  { %1246 = vxpose.xlu2.b32.cont [6/8] (short) (narrow) %v3329_v33, 8 }
 0x450   :  { %1280 = vxpose.xlu0.b32.end [8/8] (short) (narrow) %v3331_v24, 8 }
 0x454   :  { %v1095_v57 = vpop.f32.mrf.mxu2 }
 0x457   :  { %1247 = vxpose.xlu2.b32.cont [7/8] (short) (narrow) %v3333_v47, 8 }
 0x45c   :  { %v1141_v44 = vpop.f32.mrf.mxu3 }
 0x45f   :  { %1248 = vxpose.xlu2.b32.end [8/8] (short) (narrow) %v3335_v4, 8 }
 0x464   :  { %v1143_v27 = vpop.f32.mrf.mxu3 }
 0x480   :  { %v1225_v7 = vpop.trf.xlu2 }
 0x481   :  { %1549 = vperm.xlu1 %3122, %v1519_v41   ;;  %v1306_v11 = vperm.slane %v1225_v7, 0 }
 0x483   :  { %v1310_v50 = vmul.f32 %v1306_v11, %v1045_v6 }
 0x489   :  { %1534 = vperm.xlu1 %3122, %v1516_v49  }
 0x491   :  { %1564 = vperm.xlu1 %3122, %v1522_v51   ;;  %v3110_v51 = vld [vmem:[%s4588_s1 + $0x28] sm:$0xff] }
 0x493   :  { %v1193_v58 = vpop.trf.xlu1 }
 0x494   :  { %v1305_v0 = vperm.slane %v1193_v58, 0 }
 0x496   :  { %v1309_v9 = vmul.f32 %v1305_v0, %v3990_v42  ;;  %v3033_v42 = vld [vmem:[%s4587_s0 + $0x20] sm:$0xff] }
 0x497   :  { %v1501_v39 = vpack.c.bf16 %v3034_v18, %v3033_v42  ;;  %v1523_v0 = vld [vmem:[%s4589_s2 + $0x40] sm:$0xff] }
 0x498   :  { %v1313_v17 = vpack.c.bf16 %v1310_v50, %v1309_v9 }
 0x4bc   :  { %v1289_v43 = vpop.trf.xlu0 }
 0x4bd   :  { %v1308_v60 = vperm.slane %v1289_v43, 0 }
 0x4be   :  { %1554 = vperm.xlu0 %3121, %v1520_v62  }
 0x4bf   :  { %v1312_v8 = vmul.f32 %v1308_v60, %v1141_v44 }
 0x4c0   :  { %v1257_v5 = vpop.trf.xlu2 }
 0x4c1   :  { %v1307_v28 = vperm.slane %v1257_v5, 0 }
 0x4c3   :  { %v1311_v61 = vmul.f32 %v1307_v28, %v1093_v38  ;;  %v1525_v28 = vld [vmem:[%s4589_s2 + $0x50] sm:$0xff] }
 0x4c5   :  { %v1314_v35 = vpack.c.bf16 %v1312_v8, %v1311_v61 }
 0x4c7   :  { %1365 = vmatpush.bf16.msrb.mxu0 %v1314_v35  ;;  %3113 = vmatpush.bf16.msrb.mxu2 %v1314_v35 }
 0x4c8   :  { %1539 = vperm.xlu2 %3123, %v1517_v14  }
 0x4cb   :  { %1366 = vmatpush.bf16.msrb.mxu0 %v1313_v17  ;;  %3114 = vmatpush.bf16.msrb.mxu2 %v1313_v17 }
 0x4ce   :  { %3032 = vmatmul.msk.bf16.vlgmr.msrb.gmra.mxu2 %vm148_vm0, %v3104_v20 }
 0x4cf   :  { %1641 = vmatpush.bf16.msra.mxu2 %v1502_v19 }
 0x4d3   :  { %1642 = vmatpush.bf16.msra.mxu2 %v1501_v39 }
 0x4de   :  { %3061 = vmatmul.msk.bf16.vlgmr.msra.gmra.mxu2 %vm148_vm0, %v3105_v45 }
 0x4ee   :  { %3062 = vmatmul.msk.bf16.gmra.mxu2 %vm148_vm0, %v3106_v36 }
 0x4f3   :  { %v1550_v16 = vpop.permute.xlu1 %1549 }
 0x4fb   :  { %v1535_v29 = vpop.permute.xlu1 %1534 }
 0x4fe   :  { %3063 = vmatmul.msk.bf16.gmra.mxu2 %vm148_vm0, %v3107_v32 }
 0x503   :  { %v1565_v47 = vpop.permute.xlu1 %1564 }
 0x50e   :  { %3064 = vmatmul.msk.bf16.gmra.mxu2 %vm148_vm0, %v3108_v48 }
 0x51e   :  { %3065 = vmatmul.msk.bf16.gmra.mxu2 %vm148_vm0, %v3109_v23 }
 0x522   :  { %v1540_v37 = vpop.permute.xlu2 %1539 }
 0x52e   :  { %3066 = vmatmul.msk.bf16.gmra.mxu2 %vm148_vm0, %v3110_v51 }
 0x530   :  { %v1555_v12 = vpop.permute.xlu0 %1554 }
 0x551   :  { %v4047_v10 = vpop.f32.mrf.mxu2 }
 0x559   :  { %v4049_v26 = vpop.f32.mrf.mxu2 }
 0x561   :  { %v1644_v2 = vpop.f32.mrf.mxu2 }
 0x562   :  { %v1645_v30 = vadd.f32 %v1644_v2, %v1530_v25  ;;  %v3103_v25 = vld [vmem:[%s4590_s3] sm:$0xff] }
 0x563   :  { %3031 = vmatmul.msk.bf16.vlgmr.msrb.gmra.mxu0 %vm148_vm0, %v3103_v25 }
 0x564   :  { %1674 = vxpose.xlu2.b32.start.end [1/1] (short) (narrow) %v1645_v30, 64 }
 0x569   :  { %v1646_v21 = vpop.f32.mrf.mxu2 }
 0x56a   :  { %v1647_v52 = vadd.f32 %v1646_v21, %v1535_v29 }
 0x56c   :  { %1706 = vxpose.xlu0.b32.start.end [1/1] (short) (narrow) %v1647_v52, 64 }
 0x571   :  { %v1649_v22 = vpop.f32.mrf.mxu2 }
 0x572   :  { %v1650_v34 = vadd.f32 %v1649_v22, %v1540_v37 }
 0x579   :  { %v1651_v63 = vpop.f32.mrf.mxu2 }
 0x57a   :  { %v1652_v54 = vadd.f32 %v1651_v63, %v1545_v53 }
 0x57c   :  { %v3166_v46 = vpack.i.bf16 %v1652_v54, %v1650_v34 }
 0x57e   :  { %3167 = vxpose.xlu1.b32.start.end [1/1] (short) (narrow) %v3166_v46, 64 }
 0x581   :  { %v1654_v6 = vpop.f32.mrf.mxu2 }
 0x582   :  { %v1655_v31 = vadd.f32 %v1654_v6, %v1550_v16 }
 0x584   :  { %v1834_v40 = vpack.c.bf16 %v1655_v31, %v1655_v31 }
 0x586   :  { %v1875_v1 = vsel %vm407_vm1, %v1834_v40, 0 }
 0x587   :  { %1884 = vmatpush.bf16.msrb.mxu3 %v1875_v1 }
 0x589   :  { %v1656_v59 = vpop.f32.mrf.mxu2 }
 0x58a   :  { %v1657_v13 = vadd.f32 %v1656_v59, %v1555_v12 }
 0x58c   :  { %v1835_v3 = vpack.c.bf16 %v1657_v13, %v1657_v13 }
 0x58e   :  { %v1939_v38 = vsel %vm407_vm1, %v1835_v3, 0 }
 0x58f   :  { %1948 = vmatpush.bf16.msra.mxu1 %v1939_v38 }
 0x591   :  { %v1659_v33 = vpop.f32.mrf.mxu2 }
 0x592   :  { %v1660_v24 = vadd.f32 %v1659_v33, %v4006_v56 }
 0x594   :  { %v1836_v57 = vpack.c.bf16 %v1660_v24, %v1660_v24 }
 0x596   :  { %v2003_v44 = vsel %vm407_vm1, %v1836_v57, 0 }
 0x597   :  { %2012 = vmatpush.bf16.msra.mxu0 %v2003_v44 }
 0x599   :  { %v1661_v27 = vpop.f32.mrf.mxu2 }
 0x59a   :  { %v1662_v4 = vadd.f32 %v1661_v27, %v1565_v47 }
 0x59c   :  { %v1837_v41 = vpack.c.bf16 %v1662_v4, %v1662_v4 }
 0x59e   :  { %v2067_v49 = vsel %vm407_vm1, %v1837_v41, 0 }
 0x59f   :  { %2076 = vmatpush.bf16.msra.mxu3 %v2067_v49 }
 0x5fd   :  { %v1690_v53 = vpop.trf.xlu2 }
 0x5fe   :  { %v1802_v56 = vpack.c.bf16 %v1690_v53, %v1690_v53 }
 0x600   :  { %v1850_v62 = vunpack.c.l.b16 %v1802_v56 }
 0x605   :  { %v1691_v7 = vpop.trf.xlu2 }
 0x606   :  { %v1803_v43 = vpack.c.bf16 %v1691_v7, %v1691_v7 }
 0x608   :  { %v1851_v58 = vunpack.c.l.b16 %v1803_v43 }
 0x60a   :  { %v1858_v60 = vpack.c.b16 %v1851_v58, %v1850_v62 }
 0x60c   :  { %3067 = vmatmul.msk.bf16.vlgmr.msrb.gmra.mxu3 %vm394_vm2, %v1858_v60 }
 0x60d   :  { %v1692_v5 = vpop.trf.xlu2 }
 0x60e   :  { %v1804_v8 = vpack.c.bf16 %v1692_v5, %v1692_v5 }
 0x610   :  { %1569 = vperm.xlu1 %3122, %v1523_v0   ;;  %v1722_v11 = vpop.trf.xlu0  ;;  %v1852_v9 = vunpack.c.l.b16 %v1804_v8 }
 0x611   :  { %v1810_v14 = vpack.c.bf16 %v1722_v11, %v1722_v11 }
 0x612   :  { %1579 = vperm.xlu0 %3121, %v1525_v28  }
 0x613   :  { %v1914_v17 = vunpack.c.l.b16 %v1810_v14 }
 0x615   :  { %v1693_v61 = vpop.trf.xlu2 }
 0x616   :  { %v1805_v35 = vpack.c.bf16 %v1693_v61, %v1693_v61 }
 0x618   :  { %v1853_v15 = vunpack.c.l.b16 %v1805_v35  ;;  %v1723_v55 = vpop.trf.xlu0 }
 0x619   :  { %v1811_v50 = vpack.c.bf16 %v1723_v55, %v1723_v55 }
 0x61a   :  { %v1859_v19 = vpack.c.b16 %v1853_v15, %v1852_v9 }
 0x61b   :  { %v1915_v42 = vunpack.c.l.b16 %v1811_v50 }
 0x61c   :  { %3068 = vmatmul.msk.bf16.gmra.mxu3 %vm394_vm2, %v1859_v19 }
 0x61d   :  { %v1922_v18 = vpack.c.b16 %v1915_v42, %v1914_v17  ;;  %v1694_v20 = vpop.trf.xlu2 }
 0x61e   :  { %v1806_v45 = vpack.c.bf16 %v1694_v20, %v1694_v20 }
 0x61f   :  { %3071 = vmatmul.msk.bf16.vlgmr.msra.gmra.mxu1 %vm394_vm2, %v1922_v18 }
 0x620   :  { %v1724_v39 = vpop.trf.xlu0  ;;  %v1854_v16 = vunpack.c.l.b16 %v1806_v45 }
 0x621   :  { %v1812_v32 = vpack.c.bf16 %v1724_v39, %v1724_v39 }
 0x622   :  { %v3168_v36 = vpop.trf.xlu1 }
 0x623   :  { %v3169_v30 = vunpack.i.l.bf16 %v3168_v36  ;;  %v1916_v52 = vunpack.c.l.b16 %v1812_v32  ;;  %v3172_v60 = vunpack.i.h.bf16 %v3168_v36 }
 0x625   :  { %v1695_v48 = vpop.trf.xlu2  ;;  %v1818_v54 = vpack.c.bf16 %v3169_v30, %v3169_v30  ;;  %v1826_v61 = vpack.c.bf16 %v3172_v60, %v3172_v60 }
 0x626   :  { %v1807_v2 = vpack.c.bf16 %v1695_v48, %v1695_v48 }
 0x627   :  { %v1978_v40 = vunpack.c.l.b16 %v1818_v54  ;;  %v2042_v15 = vunpack.c.l.b16 %v1826_v61 }
 0x628   :  { %v1855_v29 = vunpack.c.l.b16 %v1807_v2  ;;  %v1725_v21 = vpop.trf.xlu0 }
 0x629   :  { %v1813_v22 = vpack.c.bf16 %v1725_v21, %v1725_v21 }
 0x62a   :  { %v1860_v37 = vpack.c.b16 %v1855_v29, %v1854_v16  ;;  %v3173_v63 = vpop.trf.xlu1 }
 0x62b   :  { %v1917_v34 = vunpack.c.l.b16 %v1813_v22  ;;  %v3174_v46 = vunpack.i.l.bf16 %v3173_v63  ;;  %v3177_v62 = vunpack.i.h.bf16 %v3173_v63 }
 0x62c   :  { %3069 = vmatmul.msk.bf16.gmra.mxu3 %vm394_vm2, %v1860_v37 }
 0x62d   :  { %v1923_v23 = vpack.c.b16 %v1917_v34, %v1916_v52  ;;  %v1696_v6 = vpop.trf.xlu2  ;;  %v1819_v31 = vpack.c.bf16 %v3174_v46, %v3174_v46  ;;  %v1827_v28 = vpack.c.bf16 %v3177_v62, %v3177_v62  ;;  %v4100_v62 = vpop.f32.mrf.mxu0 }
 0x62e   :  { %v1808_v13 = vpack.c.bf16 %v1696_v6, %v1696_v6 }
 0x62f   :  { %3072 = vmatmul.msk.bf16.gmra.mxu1 %vm394_vm2, %v1923_v23  ;;  %v1979_v1 = vunpack.c.l.b16 %v1819_v31  ;;  %v2043_v35 = vunpack.c.l.b16 %v1827_v28 }
 0x630   :  { %v1726_v12 = vpop.trf.xlu0  ;;  %v1856_v24 = vunpack.c.l.b16 %v1808_v13 }
 0x631   :  { %v1986_v59 = vpack.c.b16 %v1979_v1, %v1978_v40  ;;  %v1814_v38 = vpack.c.bf16 %v1726_v12, %v1726_v12  ;;  %v2050_v17 = vpack.c.b16 %v2043_v35, %v2042_v15 }
 0x632   :  { %v3178_v3 = vpop.trf.xlu1 }
 0x633   :  { %3075 = vmatmul.msk.bf16.vlgmr.msra.gmra.mxu0 %vm394_vm2, %v1986_v59  ;;  %v3179_v57 = vunpack.i.l.bf16 %v3178_v3  ;;  %v1918_v4 = vunpack.c.l.b16 %v1814_v38  ;;  %v3182_v32 = vunpack.i.h.bf16 %v3178_v3 }
 0x635   :  { %v1697_v33 = vpop.trf.xlu2  ;;  %v1820_v49 = vpack.c.bf16 %v3179_v57, %v3179_v57  ;;  %v1828_v29 = vpack.c.bf16 %v3182_v32, %v3182_v32  ;;  %v4112_v28 = vpop.f32.mrf.mxu0 }
 0x636   :  { %v1809_v44 = vpack.c.bf16 %v1697_v33, %v1697_v33 }
 0x637   :  { %v1980_v58 = vunpack.c.l.b16 %v1820_v49  ;;  %v2044_v37 = vunpack.c.l.b16 %v1828_v29 }
 0x638   :  { %v1857_v47 = vunpack.c.l.b16 %v1809_v44  ;;  %v1727_v27 = vpop.trf.xlu0 }
 0x639   :  { %v1815_v41 = vpack.c.bf16 %v1727_v27, %v1727_v27 }
 0x63a   :  { %v1861_v51 = vpack.c.b16 %v1857_v47, %v1856_v24  ;;  %v3183_v25 = vpop.trf.xlu1 }
 0x63b   :  { %v1919_v53 = vunpack.c.l.b16 %v1815_v41  ;;  %v3184_v56 = vunpack.i.l.bf16 %v3183_v25  ;;  %v3187_v48 = vunpack.i.h.bf16 %v3183_v25 }
 0x63c   :  { %3070 = vmatmul.msk.bf16.gmra.mxu3 %vm394_vm2, %v1861_v51 }
 0x63d   :  { %v1924_v7 = vpack.c.b16 %v1919_v53, %v1918_v4  ;;  %v1821_v43 = vpack.c.bf16 %v3184_v56, %v3184_v56  ;;  %v1829_v21 = vpack.c.bf16 %v3187_v48, %v3187_v48 }
 0x63f   :  { %3073 = vmatmul.msk.bf16.gmra.mxu1 %vm394_vm2, %v1924_v7  ;;  %v1981_v5 = vunpack.c.l.b16 %v1821_v43  ;;  %v2045_v63 = vunpack.c.l.b16 %v1829_v21 }
 0x640   :  { %v1728_v0 = vpop.trf.xlu0 }
 0x641   :  { %v1987_v8 = vpack.c.b16 %v1981_v5, %v1980_v58  ;;  %v1816_v14 = vpack.c.bf16 %v1728_v0, %v1728_v0  ;;  %v2051_v46 = vpack.c.b16 %v2045_v63, %v2044_v37 }
 0x642   :  { %v3188_v11 = vpop.trf.xlu1 }
 0x643   :  { %3076 = vmatmul.msk.bf16.gmra.mxu0 %vm394_vm2, %v1987_v8  ;;  %v3189_v9 = vunpack.i.l.bf16 %v3188_v11  ;;  %v1920_v18 = vunpack.c.l.b16 %v1816_v14  ;;  %v3192_v40 = vunpack.i.h.bf16 %v3188_v11 }
 0x645   :  { %v1822_v50 = vpack.c.bf16 %v3189_v9, %v3189_v9  ;;  %v1830_v13 = vpack.c.bf16 %v3192_v40, %v3192_v40 }
 0x647   :  { %v1982_v36 = vunpack.c.l.b16 %v1822_v50  ;;  %v2046_v38 = vunpack.c.l.b16 %v1830_v13 }
 0x648   :  { %v1729_v55 = vpop.trf.xlu0 }
 0x649   :  { %v1817_v19 = vpack.c.bf16 %v1729_v55, %v1729_v55 }
 0x64a   :  { %v3193_v42 = vpop.trf.xlu1 }
 0x64b   :  { %v3194_v20 = vunpack.i.l.bf16 %v3193_v42  ;;  %v1921_v39 = vunpack.c.l.b16 %v1817_v19  ;;  %v3197_v1 = vunpack.i.h.bf16 %v3193_v42 }
 0x64c   :  { %3079 = vmatmul.msk.bf16.vlgmr.msra.gmra.mxu3 %vm394_vm2, %v2050_v17 }
 0x64d   :  { %v1823_v45 = vpack.c.bf16 %v3194_v20, %v3194_v20  ;;  %v1925_v16 = vpack.c.b16 %v1921_v39, %v1920_v18  ;;  %v1831_v3 = vpack.c.bf16 %v3197_v1, %v3197_v1 }
 0x64f   :  { %v1983_v2 = vunpack.c.l.b16 %v1823_v45  ;;  %3074 = vmatmul.msk.bf16.gmra.mxu1 %vm394_vm2, %v1925_v16  ;;  %v2047_v33 = vunpack.c.l.b16 %v1831_v3 }
 0x651   :  { %v1988_v30 = vpack.c.b16 %v1983_v2, %v1982_v36  ;;  %v2052_v24 = vpack.c.b16 %v2047_v33, %v2046_v38 }
 0x652   :  { %v3198_v52 = vpop.trf.xlu1 }
 0x653   :  { %3077 = vmatmul.msk.bf16.gmra.mxu0 %vm394_vm2, %v1988_v30  ;;  %v3199_v22 = vunpack.i.l.bf16 %v3198_v52  ;;  %v3202_v57 = vunpack.i.h.bf16 %v3198_v52 }
 0x655   :  { %v1824_v34 = vpack.c.bf16 %v3199_v22, %v3199_v22  ;;  %v1832_v47 = vpack.c.bf16 %v3202_v57, %v3202_v57  ;;  %v1524_v57 = vld [vmem:[%s4589_s2 + $0x48] sm:$0xff] }
 0x657   :  { %v1984_v31 = vunpack.c.l.b16 %v1824_v34  ;;  %v2048_v4 = vunpack.c.l.b16 %v1832_v47 }
 0x65a   :  { %v3203_v54 = vpop.trf.xlu1 }
 0x65b   :  { %v3204_v23 = vunpack.i.l.bf16 %v3203_v54  ;;  %v3207_v44 = vunpack.i.h.bf16 %v3203_v54 }
 0x65c   :  { %3080 = vmatmul.msk.bf16.gmra.mxu3 %vm394_vm2, %v2051_v46 }
 0x65d   :  { %v1825_v6 = vpack.c.bf16 %v3204_v23, %v3204_v23  ;;  %v1833_v27 = vpack.c.bf16 %v3207_v44, %v3207_v44 }
 0x65f   :  { %v1985_v12 = vunpack.c.l.b16 %v1825_v6  ;;  %v2049_v41 = vunpack.c.l.b16 %v1833_v27 }
 0x661   :  { %v1989_v59 = vpack.c.b16 %v1985_v12, %v1984_v31  ;;  %v2053_v49 = vpack.c.b16 %v2049_v41, %v2048_v4 }
 0x663   :  { %3078 = vmatmul.msk.bf16.gmra.mxu0 %vm394_vm2, %v1989_v59 }
 0x66c   :  { %3081 = vmatmul.msk.bf16.gmra.mxu3 %vm394_vm2, %v2052_v24 }
 0x67c   :  { %3082 = vmatmul.msk.bf16.gmra.mxu3 %vm394_vm2, %v2053_v49 }
 0x684   :  { %v4213_v49 = vpop.permute.xlu0 %1579 }
 0x68f   :  { %v4090_v51 = vpop.f32.mrf.mxu3 }
 0x690   :  { %v2098_v25 = vsel %vm632_vm3, %v4090_v51, -inf }
 0x691   :  { %2099 = vmax.xlane.f32.xlu1 %v2098_v25 }
 0x697   :  { %v4094_v53 = vpop.f32.mrf.mxu3 }
 0x698   :  { %v2101_v60 = vsel %vm632_vm3, %v4094_v53, -inf }
 0x69c   :  { %v4096_v56 = vpop.f32.mrf.mxu1 }
 0x69d   :  { %v2122_v7 = vsel %vm632_vm3, %v4096_v56, -inf }
 0x69e   :  { %2123 = vmax.xlane.f32.xlu0 %v2122_v7 }
 0x69f   :  { %v4102_v43 = vpop.f32.mrf.mxu3 }
 0x6a0   :  { %v2104_v8 = vsel %vm632_vm3, %v4102_v43, -inf }
 0x6a4   :  { %v4104_v58 = vpop.f32.mrf.mxu1 }
 0x6a5   :  { %v2125_v5 = vsel %vm632_vm3, %v4104_v58, -inf }
 0x6a6   :  { %2102 = vmax.xlane.f32.xlu0 %v2101_v60  ;;  %2126 = vmax.xlane.f32.xlu2 %v2125_v5 }
 0x6a7   :  { %v4110_v0 = vpop.f32.mrf.mxu3 }
 0x6a8   :  { %v2107_v39 = vsel %vm632_vm3, %v4110_v0, -inf }
 0x6ac   :  { %v4114_v11 = vpop.f32.mrf.mxu1 }
 0x6ad   :  { %v2128_v61 = vsel %vm632_vm3, %v4114_v11, -inf }
 0x6ae   :  { %2105 = vmax.xlane.f32.xlu2 %v2104_v8  ;;  %2129 = vmax.xlane.f32.xlu1 %v2128_v61 }
 0x6af   :  { %v4120_v9 = vpop.f32.mrf.mxu3 }
 0x6b0   :  { %v4122_v35 = vpop.f32.mrf.mxu0  ;;  %v2110_v48 = vsel %vm632_vm3, %v4120_v9, -inf }
 0x6b1   :  { %v2146_v14 = vsel %vm632_vm3, %v4122_v35, -inf }
 0x6b2   :  { %2147 = vmax.xlane.f32.xlu0 %v2146_v14 }
 0x6b4   :  { %v4126_v15 = vpop.f32.mrf.mxu1 }
 0x6b5   :  { %v2131_v16 = vsel %vm632_vm3, %v4126_v15, -inf }
 0x6b7   :  { %v4128_v55 = vpop.f32.mrf.mxu3 }
 0x6b8   :  { %v4130_v50 = vpop.f32.mrf.mxu0  ;;  %v2113_v34 = vsel %vm632_vm3, %v4128_v55, -inf }
 0x6b9   :  { %v2149_v19 = vsel %vm632_vm3, %v4130_v50, -inf }
 0x6ba   :  { %2150 = vmax.xlane.f32.xlu2 %v2149_v19 }
 0x6bc   :  { %v4134_v17 = vpop.f32.mrf.mxu1 }
 0x6bd   :  { %v2134_v42 = vsel %vm632_vm3, %v4134_v17, -inf }
 0x6be   :  { %2135 = vmax.xlane.f32.xlu1 %v2134_v42 }
 0x6bf   :  { %v4138_v18 = vpop.f32.mrf.mxu3 }
 0x6c0   :  { %v4140_v20 = vpop.f32.mrf.mxu0  ;;  %v2116_v63 = vsel %vm632_vm3, %v4138_v18, -inf }
 0x6c1   :  { %v2152_v45 = vsel %vm632_vm3, %v4140_v20, -inf }
 0x6c2   :  { %2108 = vmax.xlane.f32.xlu2 %v2107_v39  ;;  %2153 = vmax.xlane.f32.xlu0 %v2152_v45 }
 0x6c4   :  { %v4154_v2 = vpop.f32.mrf.mxu1 }
 0x6c5   :  { %v2137_v29 = vsel %vm632_vm3, %v4154_v2, -inf }
 0x6c7   :  { %v4146_v36 = vpop.f32.mrf.mxu3 }
 0x6c8   :  { %v4148_v32 = vpop.f32.mrf.mxu0  ;;  %v2119_v40 = vsel %vm632_vm3, %v4146_v36, -inf }
 0x6c9   :  { %v2155_v52 = vsel %vm632_vm3, %v4148_v32, -inf }
 0x6ca   :  { %2111 = vmax.xlane.f32.xlu2 %v2110_v48  ;;  %2132 = vmax.xlane.f32.xlu0 %v2131_v16 }
 0x6cc   :  { %v4174_v46 = vpop.f32.mrf.mxu1 }
 0x6cd   :  { %v2140_v6 = vsel %vm632_vm3, %v4174_v46, -inf }
 0x6cf   :  { %v4156_v30 = vpop.f32.mrf.mxu3 }
 0x6d0   :  { %v4160_v21 = vpop.f32.mrf.mxu0  ;;  %v2170_v27 = vsel %vm632_vm3, %v4156_v30, -inf }
 0x6d1   :  { %v2158_v31 = vsel %vm632_vm3, %v4160_v21, -inf }
 0x6d2   :  { %2138 = vmax.xlane.f32.xlu0 %v2137_v29  ;;  %2156 = vmax.xlane.f32.xlu2 %v2155_v52 }
 0x6d4   :  { %v4192_v3 = vpop.f32.mrf.mxu1 }
 0x6d5   :  { %v2143_v33 = vsel %vm632_vm3, %v4192_v3, -inf }
 0x6d7   :  { %v4164_v22 = vpop.f32.mrf.mxu3 }
 0x6d8   :  { %v4166_v37 = vpop.f32.mrf.mxu0  ;;  %v2173_v13 = vsel %vm632_vm3, %v4164_v22, -inf }
 0x6d9   :  { %v2161_v54 = vsel %vm632_vm3, %v4166_v37, -inf }
 0x6da   :  { %2117 = vmax.xlane.f32.xlu0 %v2116_v63  ;;  %2114 = vmax.xlane.f32.xlu2 %v2113_v34 }
 0x6db   :  { %2162 = vmax.xlane.f32.xlu1 %v2161_v54  ;;  %v4233_v54 = vpop.permute.xlu1 %1569 }
 0x6df   :  { %v4176_v23 = vpop.f32.mrf.mxu3 }
 0x6e0   :  { %v4184_v1 = vpop.f32.mrf.mxu0  ;;  %v2176_v25 = vsel %vm632_vm3, %v4176_v23, -inf }
 0x6e1   :  { %v2164_v59 = vsel %vm632_vm3, %v4184_v1, -inf }
 0x6e2   :  { %2141 = vmax.xlane.f32.xlu0 %v2140_v6  ;;  %2159 = vmax.xlane.f32.xlu2 %v2158_v31 }
 0x6e3   :  { %2120 = vmax.xlane.f32.xlu1 %v2119_v40 }
 0x6e7   :  { %v4186_v12 = vpop.f32.mrf.mxu3 }
 0x6e8   :  { %v2179_v24 = vsel %vm632_vm3, %v4186_v12, -inf  ;;  %v4209_v4 = vpop.f32.mrf.mxu0 }
 0x6e9   :  { %v2167_v41 = vsel %vm632_vm3, %v4209_v4, -inf }
 0x6ea   :  { %2165 = vmax.xlane.f32.xlu2 %v2164_v59 }
 0x6eb   :  { %2174 = vmax.xlane.f32.xlu1 %v2173_v13 }
 0x6ef   :  { %v4194_v38 = vpop.f32.mrf.mxu3 }
 0x6f0   :  { %v2182_v5 = vsel %vm632_vm3, %v4194_v38, -inf }
 0x6f2   :  { %2144 = vmax.xlane.f32.xlu2 %v2143_v33 }
 0x6f3   :  { %2180 = vmax.xlane.f32.xlu1 %v2179_v24 }
 0x6f6   :  { %1574 = vperm.xlu0 %3121, %v1524_v57  }
 0x6f7   :  { %v4203_v44 = vpop.f32.mrf.mxu3 }
 0x6f8   :  { %v2185_v47 = vsel %vm632_vm3, %v4203_v44, -inf }
 0x6fa   :  { %2171 = vmax.xlane.f32.xlu2 %v2170_v27 }
 0x6fb   :  { %2186 = vmax.xlane.f32.xlu1 %v2185_v47 }
 0x6ff   :  { %v4220_v61 = vpop.f32.mrf.mxu3 }
 0x700   :  { %v2188_v45 = vsel %vm632_vm3, %v4220_v61, -inf }
 0x702   :  { %2168 = vmax.xlane.f32.xlu2 %v2167_v41 }
 0x704   :  { %v4244_v27 = vpop.xlane.xlu1 %2099 }
 0x707   :  { %v4226_v29 = vpop.f32.mrf.mxu3 }
 0x708   :  { %v2191_v63 = vsel %vm632_vm3, %v4226_v29, -inf }
 0x70a   :  { %2177 = vmax.xlane.f32.xlu2 %v2176_v25 }
 0x711   :  { %v2124_v7 = vpop.xlane.xlu0 %2123 }
 0x712   :  { %v2202_v60 = vsub.f32 %v4096_v56, %v2124_v7  ;;  %2183 = vmax.xlane.f32.xlu2 %v2182_v5 }
 0x714   :  { %v2242_v8 = vmul.f32 1.442695, %v2202_v60 }
 0x716   :  { %3336 = vpow2.f32 %v2242_v8 }
 0x719   :  { %v2127_v14 = vpop.xlane.xlu2 %2126  ;;  %v2103_v19 = vpop.xlane.xlu0 %2102 }
 0x71a   :  { %v2203_v42 = vsub.f32 %v4104_v58, %v2127_v14  ;;  %v2195_v39 = vsub.f32 %v4094_v53, %v2103_v19  ;;  %2189 = vmax.xlane.f32.xlu2 %v2188_v45 }
 0x71c   :  { %v2244_v48 = vmul.f32 1.442695, %v2203_v42  ;;  %v2228_v56 = vmul.f32 1.442695, %v2195_v39  ;;  %v3337_v16 = vpop.eup %3336 }
 0x71d   :  { %v2314_v52 = vsel %vm632_vm3, %v3337_v16, 0.0  ;;  %v2394_v58 = vpack.c.bf16 %v3337_v16, %v3337_v16 }
 0x71e   :  { %3338 = vpow2.f32 %v2244_v48 }
 0x71f   :  { %3340 = vpow2.f32 %v2228_v56  ;;  %v4236_v13 = vunpack.c.l.b16 %v2394_v58 }
 0x720   :  { %2315 = vadd.xlane.f32.xlu0 %v2314_v52 }
 0x721   :  { %v2106_v31 = vpop.xlane.xlu2 %2105  ;;  %v4249_v14 = vpop.xlane.xlu1 %2129 }
 0x722   :  { %2192 = vmax.xlane.f32.xlu2 %v2191_v63 }
 0x724   :  { %v3339_v53 = vpop.eup %3338 }
 0x725   :  { %v4231_v34 = vpop.eup %3340  ;;  %v2395_v6 = vpack.c.bf16 %v3339_v53, %v3339_v53  ;;  %v2148_v40 = vpop.xlane.xlu0 %2147  ;;  %v2317_v56 = vsel %vm632_vm3, %v3339_v53, 0.0 }
 0x726   :  { %v2210_v59 = vsub.f32 %v4122_v35, %v2148_v40  ;;  %v2293_v24 = vsel %vm632_vm3, %v4231_v34, 0.0  ;;  %v2196_v35 = vsub.f32 %v4102_v43, %v2106_v31  ;;  %v1526_v43 = vld [vmem:[%s4589_s2 + $0x58] sm:$0xff] }
 0x727   :  { %v4238_v33 = vunpack.c.l.b16 %v2395_v6 }
 0x728   :  { %v2258_v57 = vmul.f32 1.442695, %v2210_v59  ;;  %2294 = vadd.xlane.f32.xlu0 %v2293_v24  ;;  %v2230_v8 = vmul.f32 1.442695, %v2196_v35 }
 0x729   :  { %v2482_v47 = vpack.c.b16 %v4238_v33, %v4236_v13 }
 0x72a   :  { %3342 = vpow2.f32 %v2258_v57 }
 0x72d   :  { %v2151_v41 = vpop.xlane.xlu2 %2150 }
 0x72e   :  { %v2211_v25 = vsub.f32 %v4130_v50, %v2151_v41 }
 0x730   :  { %v3343_v7 = vpop.eup %3342  ;;  %v2260_v60 = vmul.f32 1.442695, %v2211_v25 }
 0x731   :  { %v2338_v5 = vsel %vm632_vm3, %v3343_v7, 0.0  ;;  %v2402_v39 = vpack.c.bf16 %v3343_v7, %v3343_v7  ;;  %v2136_v58 = vpop.xlane.xlu1 %2135 }
 0x732   :  { %3344 = vpow2.f32 %v2260_v60  ;;  %2339 = vadd.xlane.f32.xlu1 %v2338_v5  ;;  %v2206_v53 = vsub.f32 %v4134_v17, %v2136_v58 }
 0x733   :  { %3346 = vpow2.f32 %v2230_v8  ;;  %v4259_v52 = vunpack.c.l.b16 %v2402_v39 }
 0x734   :  { %v2250_v7 = vmul.f32 1.442695, %v2206_v53 }
 0x735   :  { %v4251_v19 = vpop.xlane.xlu2 %2108  ;;  %v2154_v42 = vpop.xlane.xlu0 %2153 }
 0x736   :  { %v2212_v48 = vsub.f32 %v4140_v20, %v2154_v42 }
 0x738   :  { %v3345_v45 = vpop.eup %3344  ;;  %v2262_v6 = vmul.f32 1.442695, %v2212_v48 }
 0x739   :  { %v2341_v50 = vsel %vm632_vm3, %v3345_v45, 0.0  ;;  %v2403_v16 = vpack.c.bf16 %v3345_v45, %v3345_v45  ;;  %v4265_v59 = vpop.eup %3346 }
 0x73a   :  { %2342 = vadd.xlane.f32.xlu0 %v2341_v50  ;;  %2318 = vadd.xlane.f32.xlu1 %v2317_v56  ;;  %3348 = vpow2.f32 %v2262_v6  ;;  %v2296_v25 = vsel %vm632_vm3, %v4265_v59, 0.0 }
 0x73b   :  { %1584 = vperm.xlu2 %3123, %v1526_v43   ;;  %v4261_v63 = vunpack.c.l.b16 %v2403_v16 }
 0x73d   :  { %v2112_v31 = vpop.xlane.xlu2 %2111  ;;  %v2133_v20 = vpop.xlane.xlu0 %2132  ;;  %v2530_v40 = vpack.c.b16 %v4261_v63, %v4259_v52 }
 0x73e   :  { %v2205_v24 = vsub.f32 %v4126_v15, %v2133_v20  ;;  %v2198_v41 = vsub.f32 %v4120_v9, %v2112_v31  ;;  %v2194_v31 = vsub.f32 %v4090_v51, %v4244_v27 }
 0x740   :  { %v2248_v57 = vmul.f32 1.442695, %v2205_v24  ;;  %v2234_v35 = vmul.f32 1.442695, %v2198_v41  ;;  %v4276_v8 = vpop.eup %3348 }
 0x741   :  { %v2344_v9 = vsel %vm632_vm3, %v4276_v8, 0.0 }
 0x742   :  { %2297 = vadd.xlane.f32.xlu1 %v2296_v25  ;;  %3350 = vpow2.f32 %v2248_v57  ;;  %v2226_v57 = vmul.f32 1.442695, %v2194_v31 }
 0x743   :  { %3352 = vpow2.f32 %v2250_v7 }
 0x744   :  { %3354 = vpow2.f32 %v2234_v35 }
 0x745   :  { %v4272_v60 = vpop.xlane.xlu0 %2138  ;;  %v4274_v5 = vpop.xlane.xlu2 %2156 }
 0x748   :  { %v4278_v15 = vpop.eup %3350 }
 0x749   :  { %v2323_v17 = vsel %vm632_vm3, %v4278_v15, 0.0  ;;  %v4284_v45 = vpop.eup %3352 }
 0x74a   :  { %2345 = vadd.xlane.f32.xlu1 %v2344_v9  ;;  %2324 = vadd.xlane.f32.xlu0 %v2323_v17  ;;  %v4287_v50 = vpop.eup %3354  ;;  %v2326_v6 = vsel %vm632_vm3, %v4284_v45, 0.0  ;;  %v2204_v9 = vsub.f32 %v4114_v11, %v4249_v14  ;;  %v2207_v14 = vsub.f32 %v4154_v2, %v4272_v60 }
 0x74b   :  { %v2302_v20 = vsel %vm632_vm3, %v4287_v50, 0.0 }
 0x74d   :  { %v2118_v42 = vpop.xlane.xlu0 %2117  ;;  %v2115_v39 = vpop.xlane.xlu2 %2114 }
 0x74e   :  { %v2199_v48 = vsub.f32 %v4128_v55, %v2115_v39  ;;  %v2163_v43 = vpop.xlane.xlu1 %2162  ;;  %v2200_v56 = vsub.f32 %v4138_v18, %v2118_v42 }
 0x74f   :  { %v2215_v58 = vsub.f32 %v4166_v37, %v2163_v43 }
 0x750   :  { %v2236_v16 = vmul.f32 1.442695, %v2199_v48  ;;  %v2238_v55 = vmul.f32 1.442695, %v2200_v56  ;;  %v2246_v48 = vmul.f32 1.442695, %v2204_v9 }
 0x751   :  { %v2268_v24 = vmul.f32 1.442695, %v2215_v58 }
 0x752   :  { %2327 = vadd.xlane.f32.xlu1 %v2326_v6  ;;  %3356 = vpow2.f32 %v2236_v16  ;;  %2303 = vadd.xlane.f32.xlu0 %v2302_v20  ;;  %v2252_v20 = vmul.f32 1.442695, %v2207_v14 }
 0x753   :  { %3358 = vpow2.f32 %v2238_v55 }
 0x754   :  { %3360 = vpow2.f32 %v2268_v24 }
 0x755   :  { %v2160_v53 = vpop.xlane.xlu2 %2159  ;;  %v2142_v18 = vpop.xlane.xlu0 %2141  ;;  %3362 = vpow2.f32 %v2226_v57 }
 0x756   :  { %v2214_v41 = vsub.f32 %v4160_v21, %v2160_v53  ;;  %v2121_v37 = vpop.xlane.xlu1 %2120  ;;  %v2208_v51 = vsub.f32 %v4174_v46, %v2142_v18  ;;  %v2197_v21 = vsub.f32 %v4110_v0, %v4251_v19 }
 0x757   :  { %v2201_v25 = vsub.f32 %v4146_v36, %v2121_v37 }
 0x758   :  { %v2266_v7 = vmul.f32 1.442695, %v2214_v41  ;;  %v3357_v35 = vpop.eup %3356  ;;  %v2254_v36 = vmul.f32 1.442695, %v2208_v51  ;;  %v2232_v11 = vmul.f32 1.442695, %v2197_v21  ;;  %v2213_v21 = vsub.f32 %v4148_v32, %v4274_v5 }
 0x759   :  { %v2240_v27 = vmul.f32 1.442695, %v2201_v25  ;;  %v2305_v17 = vsel %vm632_vm3, %v3357_v35, 0.0  ;;  %v4307_v39 = vpop.eup %3358  ;;  %v2391_v57 = vpack.c.bf16 %v3357_v35, %v3357_v35  ;;  %v2390_v25 = vpack.c.bf16 %v4287_v50, %v4287_v50 }
 0x75a   :  { %3364 = vpow2.f32 %v2266_v7  ;;  %2306 = vadd.xlane.f32.xlu1 %v2305_v17  ;;  %v4309_v43 = vpop.eup %3360  ;;  %v2392_v19 = vpack.c.bf16 %v4307_v39, %v4307_v39  ;;  %v2264_v32 = vmul.f32 1.442695, %v2213_v21 }
 0x75b   :  { %3366 = vpow2.f32 %v2240_v27  ;;  %v4311_v56 = vpop.eup %3362  ;;  %v2353_v31 = vsel %vm632_vm3, %v4309_v43, 0.0  ;;  %v2431_v9 = vunpack.c.l.b16 %v2391_v57 }
 0x75c   :  { %3368 = vpow2.f32 %v2254_v36  ;;  %v2290_v2 = vsel %vm632_vm3, %v4311_v56, 0.0  ;;  %v2432_v24 = vunpack.c.l.b16 %v2392_v19  ;;  %v2430_v36 = vunpack.c.l.b16 %v2390_v25 }
 0x75d   :  { %v4305_v42 = vpop.xlane.xlu2 %2165  ;;  %3370 = vpow2.f32 %v2246_v48  ;;  %v2398_v25 = vpack.c.bf16 %v4284_v45, %v4284_v45 }
 0x75e   :  { %v2175_v46 = vpop.xlane.xlu1 %2174  ;;  %3372 = vpow2.f32 %v2232_v11  ;;  %v2216_v5 = vsub.f32 %v4184_v1, %v4305_v42 }
 0x75f   :  { %v2219_v0 = vsub.f32 %v4164_v22, %v2175_v46  ;;  %3374 = vpow2.f32 %v2252_v20  ;;  %v2436_v46 = vpack.c.b16 %v2431_v9, %v2430_v36  ;;  %v2386_v9 = vpack.c.bf16 %v4311_v56, %v4311_v56 }
 0x760   :  { %v4315_v16 = vpop.eup %3364  ;;  %v2270_v20 = vmul.f32 1.442695, %v2216_v5  ;;  %v2478_v36 = vunpack.c.l.b16 %v2398_v25 }
 0x761   :  { %v3367_v58 = vpop.eup %3366  ;;  %v2350_v6 = vsel %vm632_vm3, %v4315_v16, 0.0  ;;  %v2276_v22 = vmul.f32 1.442695, %v2219_v0  ;;  %v2388_v0 = vpack.c.bf16 %v4265_v59, %v4265_v59  ;;  %v2426_v56 = vunpack.c.l.b16 %v2386_v9 }
 0x762   :  { %2351 = vadd.xlane.f32.xlu0 %v2350_v6  ;;  %2354 = vadd.xlane.f32.xlu1 %v2353_v31  ;;  %v2393_v60 = vpack.c.bf16 %v3367_v58, %v3367_v58  ;;  %v3369_v41 = vpop.eup %3368  ;;  %v2311_v35 = vsel %vm632_vm3, %v3367_v58, 0.0  ;;  %v2448_v31 = vsel %vm632_vm3, %v2436_v46, 0 }
 0x763   :  { %v4329_v7 = vpop.eup %3370  ;;  %3376 = vpow2.f32 %v2276_v22  ;;  %v2400_v58 = vpack.c.bf16 %v3369_v41, %v3369_v41  ;;  %v2428_v42 = vunpack.c.l.b16 %v2388_v0 }
 0x764   :  { %2291 = vadd.xlane.f32.xlu2 %v2290_v2  ;;  %v2433_v53 = vunpack.c.l.b16 %v2393_v60  ;;  %v3373_v17 = vpop.eup %3372  ;;  %v2320_v50 = vsel %vm632_vm3, %v4329_v7, 0.0 }
 0x765   :  { %v2145_v55 = vpop.xlane.xlu2 %2144  ;;  %v2389_v11 = vpack.c.bf16 %v3373_v17, %v3373_v17  ;;  %v4340_v14 = vpop.eup %3374  ;;  %v2299_v59 = vsel %vm632_vm3, %v3373_v17, 0.0  ;;  %v2480_v22 = vunpack.c.l.b16 %v2400_v58 }
 0x766   :  { %v2209_v18 = vsub.f32 %v4192_v3, %v2145_v55  ;;  %v2437_v37 = vpack.c.b16 %v2433_v53, %v2432_v24  ;;  %v2332_v3 = vsel %vm632_vm3, %v3369_v41, 0.0  ;;  %v2399_v24 = vpack.c.bf16 %v4340_v14, %v4340_v14  ;;  %v2181_v53 = vpop.xlane.xlu1 %2180 }
 0x767   :  { %v2429_v2 = vunpack.c.l.b16 %v2389_v11 }
 0x768   :  { %v2256_v51 = vmul.f32 1.442695, %v2209_v18  ;;  %v2451_v27 = vsel %vm632_vm3, %v2437_v37, 0  ;;  %v2387_v37 = vpack.c.bf16 %v4231_v34, %v4231_v34  ;;  %v2479_v17 = vunpack.c.l.b16 %v2399_v24 }
 0x769   :  { %2457 = vmatpush.bf16.xpose.msrb.mxu1 %v2451_v27  ;;  %v4346_v19 = vpop.eup %3376  ;;  %v2435_v18 = vpack.c.b16 %v2429_v2, %v2428_v42 }
 0x76a   :  { %3378 = vpow2.f32 %v2256_v51  ;;  %2333 = vadd.xlane.f32.xlu0 %v2332_v3  ;;  %2312 = vadd.xlane.f32.xlu1 %v2311_v35  ;;  %v2365_v1 = vsel %vm632_vm3, %v4346_v19, 0.0  ;;  %v2221_v3 = vsub.f32 %v4186_v12, %v2181_v53  ;;  %v2484_v46 = vpack.c.b16 %v2479_v17, %v2478_v36  ;;  %v1575_v36 = vpop.permute.xlu0 %1574 }
 0x76b   :  { %3380 = vpow2.f32 %v2264_v32  ;;  %v2445_v34 = vsel %vm632_vm3, %v2435_v18, 0  ;;  %v2396_v12 = vpack.c.bf16 %v4329_v7, %v4329_v7 }
 0x76c   :  { %2321 = vadd.xlane.f32.xlu2 %v2320_v50  ;;  %3382 = vpow2.f32 %v2270_v20  ;;  %v2427_v50 = vunpack.c.l.b16 %v2387_v37  ;;  %v2280_v32 = vmul.f32 1.442695, %v2221_v3  ;;  %v1664_v20 = vpop.f32.mrf.mxu2  ;;  %v2407_v37 = vpack.c.bf16 %v4309_v43, %v4309_v43 }
 0x76d   :  { %v4338_v48 = vpop.xlane.xlu2 %2171  ;;  %v1665_v7 = vadd.f32 %v1664_v20, %v4233_v54 }
 0x76e   :  { %v2434_v0 = vpack.c.b16 %v2427_v50, %v2426_v56  ;;  %v2527_v3 = vunpack.c.l.b16 %v2407_v37  ;;  %v2404_v50 = vpack.c.bf16 %v4276_v8, %v4276_v8  ;;  %v2218_v8 = vsub.f32 %v4156_v30, %v4338_v48 }
 0x770   :  { %v4348_v6 = vpop.eup %3378 }
 0x771   :  { %v2401_v60 = vpack.c.bf16 %v4348_v6, %v4348_v6  ;;  %2458 = vmatpush.bf16.xpose.msrb.mxu1 %v2448_v31  ;;  %v4366_v21 = vpop.eup %3380  ;;  %v2496_v31 = vsel %vm632_vm3, %v2484_v46, 0 }
 0x772   :  { %2366 = vadd.xlane.f32.xlu1 %v2365_v1  ;;  %v2347_v45 = vsel %vm632_vm3, %v4366_v21, 0.0  ;;  %v4374_v11 = vpop.eup %3382  ;;  %v2442_v1 = vsel %vm632_vm3, %v2434_v0, 0  ;;  %v2187_v0 = vpop.xlane.xlu1 %2186 }
 0x773   :  { %v2481_v55 = vunpack.c.l.b16 %v2401_v60  ;;  %v2476_v60 = vunpack.c.l.b16 %v2396_v12  ;;  %v2356_v13 = vsel %vm632_vm3, %v4374_v11, 0.0 }
 0x774   :  { %2300 = vadd.xlane.f32.xlu2 %v2299_v59 }
 0x775   :  { %v2169_v57 = vpop.xlane.xlu2 %2168  ;;  %v2485_v41 = vpack.c.b16 %v2481_v55, %v2480_v22  ;;  %v2329_v55 = vsel %vm632_vm3, %v4340_v14, 0.0 }
 0x776   :  { %v2217_v51 = vsub.f32 %v4209_v4, %v2169_v57  ;;  %v2397_v4 = vpack.c.bf16 %v4278_v15, %v4278_v15  ;;  %v2408_v15 = vpack.c.bf16 %v4374_v11, %v4374_v11  ;;  %v2406_v57 = vpack.c.bf16 %v4315_v16, %v4315_v16 }
 0x777   :  { %v2499_v27 = vsel %vm632_vm3, %v2485_v41, 0 }
 0x778   :  { %v2272_v35 = vmul.f32 1.442695, %v2217_v51  ;;  %2505 = vmatpush.bf16.xpose.msrb.mxu0 %v2499_v27  ;;  %v2477_v58 = vunpack.c.l.b16 %v2397_v4  ;;  %v2528_v24 = vunpack.c.l.b16 %v2408_v15  ;;  %v1838_v51 = vpack.c.bf16 %v1665_v7, %v1665_v7 }
 0x779   :  { %2459 = vmatpush.bf16.xpose.msrb.mxu1 %v2445_v34  ;;  %v2526_v9 = vunpack.c.l.b16 %v2406_v57  ;;  %v2274_v15 = vmul.f32 1.442695, %v2218_v8 }
 0x77a   :  { %3384 = vpow2.f32 %v2272_v35  ;;  %v2483_v22 = vpack.c.b16 %v2477_v58, %v2476_v60  ;;  %v2405_v35 = vpack.c.bf16 %v4366_v21, %v4366_v21  ;;  %v2524_v58 = vunpack.c.l.b16 %v2404_v50 }
 0x77b   :  { %3386 = vpow2.f32 %v2280_v32  ;;  %v2532_v43 = vpack.c.b16 %v2527_v3, %v2526_v9  ;;  %v1666_v32 = vpop.f32.mrf.mxu2 }
 0x77c   :  { %2348 = vadd.xlane.f32.xlu2 %v2347_v45  ;;  %v2493_v27 = vsel %vm632_vm3, %v2483_v22, 0  ;;  %v2490_v45 = vsel %vm632_vm3, %v2482_v47, 0  ;;  %v1667_v21 = vadd.f32 %v1666_v32, %v1575_v36  ;;  %v2223_v47 = vsub.f32 %v4203_v44, %v2187_v0 }
 0x77d   :  { %v4378_v5 = vpop.xlane.xlu2 %2177  ;;  %v2544_v56 = vsel %vm632_vm3, %v2532_v43, 0  ;;  %v2538_v22 = vsel %vm632_vm3, %v2530_v40, 0 }
 0x77e   :  { %v2284_v20 = vmul.f32 1.442695, %v2223_v47  ;;  %v2220_v44 = vsub.f32 %v4176_v23, %v4378_v5 }
 0x780   :  { %v3385_v2 = vpop.eup %3384  ;;  %2506 = vmatpush.bf16.xpose.msrb.mxu0 %v2496_v31  ;;  %v1839_v31 = vpack.c.bf16 %v1667_v21, %v1667_v21 }
 0x781   :  { %v2359_v42 = vsel %vm632_vm3, %v3385_v2, 0.0  ;;  %v2409_v59 = vpack.c.bf16 %v3385_v2, %v3385_v2  ;;  %2460 = vmatpush.bf16.xpose.msrb.mxu1 %v2442_v1  ;;  %v4392_v25 = vpop.eup %3386 }
 0x782   :  { %2360 = vadd.xlane.f32.xlu0 %v2359_v42  ;;  %v2371_v16 = vsel %vm632_vm3, %v4392_v25, 0.0  ;;  %v2335_v42 = vsel %vm632_vm3, %v4348_v6, 0.0  ;;  %v2413_v3 = vpack.c.bf16 %v4392_v25, %v4392_v25 }
 0x783   :  { %v2529_v53 = vunpack.c.l.b16 %v2409_v59  ;;  %v2278_v59 = vmul.f32 1.442695, %v2220_v44 }
 0x784   :  { %2330 = vadd.xlane.f32.xlu2 %v2329_v55 }
 0x785   :  { %v2184_v18 = vpop.xlane.xlu2 %2183  ;;  %v2533_v41 = vpack.c.b16 %v2529_v53, %v2528_v24 }
 0x786   :  { %v2222_v54 = vsub.f32 %v4194_v38, %v2184_v18  ;;  %v2308_v38 = vsel %vm632_vm3, %v4307_v39, 0.0  ;;  %v2525_v39 = vunpack.c.l.b16 %v2405_v35 }
 0x787   :  { %v2547_v14 = vsel %vm632_vm3, %v2533_v41, 0 }
 0x788   :  { %v2282_v17 = vmul.f32 1.442695, %v2222_v54  ;;  %2507 = vmatpush.bf16.xpose.msrb.mxu0 %v2493_v27  ;;  %2553 = vmatpush.bf16.xpose.msrb.mxu2 %v2547_v14  ;;  %v2531_v33 = vpack.c.b16 %v2525_v39, %v2524_v58 }
 0x789   :  { %3083 = vmatmul.msk.bf16.vlgmr.msrb.gmra.mxu1 %vm632_vm3, %v1838_v51 }
 0x78a   :  { %3388 = vpow2.f32 %v2282_v17  ;;  %2372 = vadd.xlane.f32.xlu0 %v2371_v16  ;;  %v2541_v30 = vsel %vm632_vm3, %v2531_v33, 0 }
 0x78c   :  { %2309 = vadd.xlane.f32.xlu2 %v2308_v38 }
 0x78d   :  { %v2190_v34 = vpop.xlane.xlu2 %2189 }
 0x78e   :  { %v2224_v4 = vsub.f32 %v4220_v61, %v2190_v34  ;;  %v2573_v34 = vunpack.c.l.b16 %v2413_v3 }
 0x790   :  { %v3389_v46 = vpop.eup %3388  ;;  %v2286_v12 = vmul.f32 1.442695, %v2224_v4  ;;  %2508 = vmatpush.bf16.xpose.msrb.mxu0 %v2490_v45  ;;  %2554 = vmatpush.bf16.xpose.msrb.mxu2 %v2544_v56  ;;  %v2411_v56 = vpack.c.bf16 %v4346_v19, %v4346_v19 }
 0x791   :  { %v2374_v61 = vsel %vm632_vm3, %v3389_v46, 0.0  ;;  %v2414_v37 = vpack.c.bf16 %v3389_v46, %v3389_v46 }
 0x792   :  { %3390 = vpow2.f32 %v2286_v12  ;;  %2375 = vadd.xlane.f32.xlu1 %v2374_v61  ;;  %v2571_v32 = vunpack.c.l.b16 %v2411_v56 }
 0x793   :  { %3392 = vpow2.f32 %v2274_v15  ;;  %v4438_v38 = vpop.xlane.xlu0 %2315 }
 0x794   :  { %2357 = vadd.xlane.f32.xlu2 %v2356_v13 }
 0x795   :  { %v2193_v2 = vpop.xlane.xlu2 %2192 }
 0x796   :  { %v2225_v60 = vsub.f32 %v4226_v29, %v2193_v2  ;;  %v1669_v29 = vpop.f32.mrf.mxu2 }
 0x797   :  { %3084 = vmatmul.msk.bf16.vlgmr.msrb.gmra.mxu0 %vm632_vm3, %v1839_v31  ;;  %v1670_v23 = vadd.f32 %v1669_v29, %v4213_v49  ;;  %v2574_v49 = vunpack.c.l.b16 %v2414_v37 }
 0x798   :  { %v3391_v48 = vpop.eup %3390  ;;  %v2288_v1 = vmul.f32 1.442695, %v2225_v60  ;;  %2555 = vmatpush.bf16.xpose.msrb.mxu2 %v2541_v30 }
 0x799   :  { %v2380_v11 = vsel %vm632_vm3, %v3391_v48, 0.0  ;;  %v3393_v7 = vpop.eup %3392  ;;  %v2416_v55 = vpack.c.bf16 %v3391_v48, %v3391_v48  ;;  %v1840_v52 = vpack.c.bf16 %v1670_v23, %v1670_v23 }
 0x79a   :  { %3394 = vpow2.f32 %v2288_v1  ;;  %2381 = vadd.xlane.f32.xlu0 %v2380_v11  ;;  %v2362_v6 = vsel %vm632_vm3, %v3393_v7, 0.0  ;;  %v2410_v4 = vpack.c.bf16 %v3393_v7, %v3393_v7 }
 0x79b   :  { %3396 = vpow2.f32 %v2284_v20  ;;  %v2576_v18 = vunpack.c.l.b16 %v2416_v55  ;;  %v2295_v46 = vpop.xlane.xlu0 %2294 }
 0x79c   :  { %2336 = vadd.xlane.f32.xlu2 %v2335_v42  ;;  %3398 = vpow2.f32 %v2278_v59  ;;  %v2570_v25 = vunpack.c.l.b16 %v2410_v4 }
 0x79d   :  { %v1585_v0 = vpop.permute.xlu2 %1584 }
 0x79e   :  { %v2578_v12 = vpack.c.b16 %v2571_v32, %v2570_v25  ;;  %v1671_v21 = vpop.f32.mrf.mxu2 }
 0x79f   :  { %v1672_v58 = vadd.f32 %v1671_v21, %v1585_v0 }
 0x7a0   :  { %v3395_v24 = vpop.eup %3394  ;;  %2556 = vmatpush.bf16.xpose.msrb.mxu2 %v2538_v22  ;;  %v2586_v61 = vsel %vm632_vm3, %v2578_v12, 0 }
 0x7a1   :  { %v2383_v5 = vsel %vm632_vm3, %v3395_v24, 0.0  ;;  %v2417_v53 = vpack.c.bf16 %v3395_v24, %v3395_v24  ;;  %v3397_v57 = vpop.eup %3396  ;;  %v1841_v19 = vpack.c.bf16 %v1672_v58, %v1672_v58 }
 0x7a2   :  { %2384 = vadd.xlane.f32.xlu1 %v2383_v5  ;;  %v2415_v40 = vpack.c.bf16 %v3397_v57, %v3397_v57  ;;  %v3399_v51 = vpop.eup %3398  ;;  %v2377_v50 = vsel %vm632_vm3, %v3397_v57, 0.0 }
 0x7a3   :  { %v2577_v41 = vunpack.c.l.b16 %v2417_v53  ;;  %v2368_v9 = vsel %vm632_vm3, %v3399_v51, 0.0  ;;  %v2412_v16 = vpack.c.bf16 %v3399_v51, %v3399_v51 }
 0x7a4   :  { %2363 = vadd.xlane.f32.xlu2 %v2362_v6  ;;  %v2575_v27 = vunpack.c.l.b16 %v2415_v40 }
 0x7a5   :  { %v2581_v63 = vpack.c.b16 %v2577_v41, %v2576_v18  ;;  %v2340_v14 = vpop.xlane.xlu1 %2339  ;;  %v2572_v35 = vunpack.c.l.b16 %v2412_v16 }
 0x7a6   :  { %v2580_v17 = vpack.c.b16 %v2575_v27, %v2574_v49  ;;  %3400 = vrcp.f32 %v2340_v14 }
 0x7a7   :  { %3085 = vmatmul.msk.bf16.vlgmr.msrb.gmra.mxu2 %vm632_vm3, %v1840_v52  ;;  %v2595_v54 = vsel %vm632_vm3, %v2581_v63, 0  ;;  %v2579_v36 = vpack.c.b16 %v2573_v34, %v2572_v35 }
 0x7a8   :  { %2601 = vmatpush.bf16.xpose.msra.mxu1 %v2595_v54  ;;  %v2592_v43 = vsel %vm632_vm3, %v2580_v17, 0 }
 0x7a9   :  { %v2589_v39 = vsel %vm632_vm3, %v2579_v36, 0 }
 0x7ac   :  { %2369 = vadd.xlane.f32.xlu2 %v2368_v9  ;;  %v3401_v33 = vpop.eup %3400 }
 0x7ad   :  { %v4442_v45 = vpop.xlane.xlu1 %2318  ;;  %v2343_v13 = vpop.xlane.xlu0 %2342 }
 0x7ae   :  { %3402 = vrcp.f32 %v2343_v13 }
 0x7b0   :  { %2602 = vmatpush.bf16.xpose.msra.mxu1 %v2592_v43 }
 0x7b4   :  { %2378 = vadd.xlane.f32.xlu2 %v2377_v50  ;;  %v3403_v31 = vpop.eup %3402 }
 0x7b5   :  { %v2298_v8 = vpop.xlane.xlu1 %2297 }
 0x7b8   :  { %2603 = vmatpush.bf16.xpose.msra.mxu1 %v2589_v39 }
 0x7bd   :  { %v2346_v47 = vpop.xlane.xlu1 %2345  ;;  %v4451_v48 = vpop.xlane.xlu0 %2324 }
 0x7be   :  { %3404 = vrcp.f32 %v2346_v47 }
 0x7c0   :  { %2604 = vmatpush.bf16.xpose.msra.mxu1 %v2586_v61 }
 0x7c3   :  { %2706 = vxpose.xlu0.b32.start [1/8] (short) (narrow) %v3401_v33, 8 }
 0x7c4   :  { %v3405_v15 = vpop.eup %3404 }
 0x7c5   :  { %v4453_v11 = vpop.xlane.xlu1 %2327  ;;  %v2304_v44 = vpop.xlane.xlu0 %2303 }
 0x7c7   :  { %3086 = vmatmul.msk.bf16.vlgmr.msra.gmra.mxu1 %vm632_vm3, %v1841_v19 }
 0x7cb   :  { %2707 = vxpose.xlu0.b32.cont [2/8] (short) (narrow) %v3403_v31, 8 }
 0x7cd   :  { %v2307_v59 = vpop.xlane.xlu1 %2306 }
 0x7d3   :  { %2708 = vxpose.xlu0.b32.cont [3/8] (short) (narrow) %v3405_v15, 8 }
 0x7d5   :  { %v2352_v7 = vpop.xlane.xlu0 %2351  ;;  %v2355_v23 = vpop.xlane.xlu1 %2354 }
 0x7d7   :  { %v2292_v2 = vpop.xlane.xlu2 %2291 }
 0x7d8   :  { %3406 = vrcp.f32 %v2292_v2 }
 0x7d9   :  { %3408 = vrcp.f32 %v2295_v46 }
 0x7da   :  { %3410 = vrcp.f32 %v2298_v8 }
 0x7dd   :  { %v4457_v6 = vpop.xlane.xlu0 %2333  ;;  %v2313_v54 = vpop.xlane.xlu1 %2312 }
 0x7de   :  { %v3407_v60 = vpop.eup %3406 }
 0x7df   :  { %v4449_v30 = vpop.xlane.xlu2 %2321  ;;  %2642 = vxpose.xlu2.b32.start [1/8] (short) (narrow) %v3407_v60, 8  ;;  %v3409_v20 = vpop.eup %3408 }
 0x7e0   :  { %v3411_v42 = vpop.eup %3410 }
 0x7e5   :  { %v2367_v35 = vpop.xlane.xlu1 %2366 }
 0x7e7   :  { %v2301_v1 = vpop.xlane.xlu2 %2300  ;;  %2643 = vxpose.xlu2.b32.cont [2/8] (short) (narrow) %v3409_v20, 8  ;;  %v2786_v20 = vld [vmem:[%s4591_s4 + $0x10] sm:$0xff] }
 0x7ef   :  { %v2349_v29 = vpop.xlane.xlu2 %2348  ;;  %2644 = vxpose.xlu2.b32.cont [3/8] (short) (narrow) %v3411_v42, 8 }
 0x7f0   :  { %3412 = vrcp.f32 %v2349_v29  ;;  %v1465_v29 = vld [vmem:[%s4593_s6 + $0x8] sm:$0xff] }
 0x7f1   :  { %3414 = vrcp.f32 %v2301_v1  ;;  %v2787_v1 = vld [vmem:[%s4591_s4 + $0x18] sm:$0xff] }
 0x7f2   :  { %3416 = vrcp.f32 %v2352_v7 }
 0x7f3   :  { %3418 = vrcp.f32 %v2304_v44  ;;  %v1439_v44 = vld [vmem:[%s4592_s5 + $0x18] sm:$0xff] }
 0x7f4   :  { %3420 = vrcp.f32 %v2355_v23 }
 0x7f5   :  { %3422 = vrcp.f32 %v2307_v59  ;;  %v2361_v63 = vpop.xlane.xlu0 %2360 }
 0x7f6   :  { %v3413_v22 = vpop.eup %3412 }
 0x7f7   :  { %v3415_v55 = vpop.eup %3414  ;;  %2709 = vxpose.xlu0.b32.cont [4/8] (short) (narrow) %v3413_v22, 8  ;;  %v4455_v24 = vpop.xlane.xlu2 %2330 }
 0x7f8   :  { %2645 = vxpose.xlu2.b32.cont [4/8] (short) (narrow) %v3415_v55, 8  ;;  %v3417_v5 = vpop.eup %3416 }
 0x7f9   :  { %v3419_v53 = vpop.eup %3418 }
 0x7fa   :  { %v3421_v18 = vpop.eup %3420 }
 0x7fb   :  { %v3423_v37 = vpop.eup %3422 }
 0x7fd   :  { %v2373_v39 = vpop.xlane.xlu0 %2372 }
 0x7ff   :  { %2710 = vxpose.xlu0.b32.cont [5/8] (short) (narrow) %v3417_v5, 8  ;;  %v2310_v57 = vpop.xlane.xlu2 %2309 }
 0x800   :  { %2646 = vxpose.xlu2.b32.cont [5/8] (short) (narrow) %v3419_v53, 8 }
 0x805   :  { %v2376_v32 = vpop.xlane.xlu1 %2375 }
 0x806   :  { %v4459_v41 = vpop.f32.mrf.mxu1 }
 0x807   :  { %2711 = vxpose.xlu0.b32.cont [6/8] (short) (narrow) %v3421_v18, 8  ;;  %v2358_v52 = vpop.xlane.xlu2 %2357  ;;  %v1436_v18 = vld [vmem:[%s4592_s5] sm:$0xff] }
 0x808   :  { %2647 = vxpose.xlu2.b32.cont [6/8] (short) (narrow) %v3423_v37, 8  ;;  %3424 = vrcp.f32 %v2358_v52 }
 0x809   :  { %3426 = vrcp.f32 %v2310_v57 }
 0x80a   :  { %3428 = vrcp.f32 %v2361_v63 }
 0x80b   :  { %3430 = vrcp.f32 %v2313_v54  ;;  %v2924_v54 = vld [vmem:[%s4593_s6 + $0x10] sm:$0xff] }
 0x80c   :  { %3432 = vrcp.f32 %v4438_v38 }
 0x80d   :  { %v2382_v13 = vpop.xlane.xlu0 %2381 }
 0x80e   :  { %v3425_v40 = vpop.eup %3424  ;;  %v2464_v49 = vpop.f32.mrf.mxu1 }
 0x80f   :  { %v3427_v51 = vpop.eup %3426  ;;  %2712 = vxpose.xlu0.b32.cont [7/8] (short) (narrow) %v3425_v40, 8  ;;  %v2337_v27 = vpop.xlane.xlu2 %2336  ;;  %v1438_v49 = vld [vmem:[%s4592_s5 + $0x10] sm:$0xff] }
 0x810   :  { %2648 = vxpose.xlu2.b32.cont [7/8] (short) (narrow) %v3427_v51, 8  ;;  %v3429_v9 = vpop.eup %3428  ;;  %v3111_v51 = vld [vmem:[%s4590_s3] sm:$0xff] }
 0x811   :  { %v3431_v17 = vpop.eup %3430 }
 0x812   :  { %v3433_v43 = vpop.eup %3432 }
 0x814   :  { %v4461_v14 = vpop.f32.mrf.mxu0 }
 0x815   :  { %v2385_v31 = vpop.xlane.xlu1 %2384 }
 0x817   :  { %2713 = vxpose.xlu0.b32.end [8/8] (short) (narrow) %v3429_v9, 8  ;;  %v2364_v16 = vpop.xlane.xlu2 %2363 }
 0x818   :  { %2649 = vxpose.xlu2.b32.end [8/8] (short) (narrow) %v3431_v17, 8  ;;  %3434 = vrcp.f32 %v2364_v16  ;;  %v3497_v16 = vmov 32.0  }
 0x819   :  { %3436 = vrcp.f32 %v4442_v45 }
 0x81a   :  { %3438 = vrcp.f32 %v2367_v35 }
 0x81b   :  { %3440 = vrcp.f32 %v4449_v30  ;;  %v1319_v30 = vld [vmem:[%s4591_s4] sm:$0xff] }
 0x81c   :  { %v2512_v3 = vpop.f32.mrf.mxu0 }
 0x81e   :  { %v3435_v34 = vpop.eup %3434 }
 0x81f   :  { %2674 = vxpose.xlu0.b32.start [1/8] (short) (narrow) %v3433_v43, 8  ;;  %2738 = vxpose.xlu1.b32.start [1/8] (short) (narrow) %v3435_v34, 8  ;;  %v3437_v50 = vpop.eup %3436  ;;  %v2370_v36 = vpop.xlane.xlu2 %2369 }
 0x820   :  { %v3439_v4 = vpop.eup %3438  ;;  %3442 = vrcp.f32 %v2370_v36 }
 0x821   :  { %v3441_v56 = vpop.eup %3440  ;;  %3444 = vrcp.f32 %v4451_v48  ;;  %v2785_v48 = vld [vmem:[%s4591_s4 + $0x8] sm:$0xff] }
 0x822   :  { %3446 = vrcp.f32 %v2373_v39 }
 0x823   :  { %3448 = vrcp.f32 %v4453_v11  ;;  %v1437_v11 = vld [vmem:[%s4592_s5 + $0x8] sm:$0xff] }
 0x824   :  { %3450 = vrcp.f32 %v2376_v32 }
 0x825   :  { %3452 = vrcp.f32 %v4455_v24 }
 0x826   :  { %v3443_v25 = vpop.eup %3442 }
 0x827   :  { %2675 = vxpose.xlu0.b32.cont [2/8] (short) (narrow) %v3437_v50, 8  ;;  %2739 = vxpose.xlu1.b32.cont [2/8] (short) (narrow) %v3439_v4, 8  ;;  %v3445_v46 = vpop.eup %3444  ;;  %v2379_v0 = vpop.xlane.xlu2 %2378 }
 0x828   :  { %v3447_v12 = vpop.eup %3446  ;;  %3454 = vrcp.f32 %v2379_v0 }
 0x829   :  { %v3449_v21 = vpop.eup %3448  ;;  %3456 = vrcp.f32 %v4457_v6  ;;  %v1467_v6 = vld [vmem:[%s4593_s6 + $0x18] sm:$0xff] }
 0x82a   :  { %v4466_v38 = vpop.f32.mrf.mxu2  ;;  %v3451_v8 = vpop.eup %3450  ;;  %3458 = vrcp.f32 %v2382_v13 }
 0x82b   :  { %v3453_v58 = vpop.eup %3452  ;;  %3460 = vrcp.f32 %v2337_v27  ;;  %v1464_v27 = vld [vmem:[%s4593_s6] sm:$0xff] }
 0x82c   :  { %3462 = vrcp.f32 %v2385_v31 }
 0x82d   :  { %3464 = vrcp.f32 %v3497_v16 }
 0x82e   :  { %v3455_v33 = vpop.eup %3454 }
 0x82f   :  { %2676 = vxpose.xlu0.b32.cont [3/8] (short) (narrow) %v3441_v56, 8  ;;  %2740 = vxpose.xlu1.b32.cont [3/8] (short) (narrow) %v3443_v25, 8  ;;  %v3457_v47 = vpop.eup %3456 }
 0x830   :  { %v3459_v15 = vpop.eup %3458 }
 0x831   :  { %v3461_v2 = vpop.eup %3460 }
 0x832   :  { %v2560_v45 = vpop.f32.mrf.mxu2  ;;  %v3463_v60 = vpop.eup %3462 }
 0x833   :  { %v3465_v50 = vpop.eup %3464 }
 0x834   :  { %v1392_v39 = vmul.f32 32.0, %v3465_v50  ;;  %vm1396_vm4 = vweird.f32 %v3465_v50 }
 0x837   :  { %2677 = vxpose.xlu0.b32.cont [4/8] (short) (narrow) %v3445_v46, 8  ;;  %2741 = vxpose.xlu1.b32.cont [4/8] (short) (narrow) %v3447_v12, 8  ;;  %v1393_v12 = vsub.f32 1.0, %v1392_v39 }
 0x83f   :  { %2678 = vxpose.xlu0.b32.cont [5/8] (short) (narrow) %v3449_v21, 8  ;;  %2742 = vxpose.xlu1.b32.cont [5/8] (short) (narrow) %v3451_v8, 8 }
 0x844   :  { %v2606_v61 = vpop.f32.mrf.mxu1 }
 0x847   :  { %2679 = vxpose.xlu0.b32.cont [6/8] (short) (narrow) %v3453_v58, 8  ;;  %2743 = vxpose.xlu1.b32.cont [6/8] (short) (narrow) %v3455_v33, 8 }
 0x84c   :  { %v2608_v19 = vpop.f32.mrf.mxu1 }
 0x84f   :  { %2680 = vxpose.xlu0.b32.cont [7/8] (short) (narrow) %v3457_v47, 8  ;;  %2744 = vxpose.xlu1.b32.cont [7/8] (short) (narrow) %v3459_v15, 8 }
 0x857   :  { %2681 = vxpose.xlu0.b32.end [8/8] (short) (narrow) %v3461_v2, 8  ;;  %2745 = vxpose.xlu1.b32.end [8/8] (short) (narrow) %v3463_v60, 8 }
 0x879   :  { %v2658_v59 = vpop.trf.xlu2 }
 0x87a   :  { %v2770_v5 = vperm.slane %v2658_v59, 0 }
 0x87c   :  { %v2774_v63 = vmul.f32 %v2770_v5, %v4459_v41  ;;  %v3112_v41 = vld [vmem:[%s4590_s3 + $0x8] sm:$0xff]  ;;  %s3498_s3 = smov [#allocation2]  }
 0x87d   :  { %s2959_s5 = sshll.u32 %s3498_s3, 4  ;;  %s2960_s5 = int_to_ptr.vmem [resolvable:$true] %s2959_s5 }
 0x881   :  { %1325 = vperm.xlu2 %3123, %v1319_v30  }
 0x883   :  { %v2722_v42 = vpop.trf.xlu0 }
 0x884   :  { %v2772_v7 = vperm.slane %v2722_v42, 0 }
 0x886   :  { %v2776_v53 = vmul.f32 %v2772_v7, %v4466_v38 }
 0x889   :  { %2795 = vperm.xlu2 %3123, %v2785_v48  }
 0x891   :  { %2800 = vperm.xlu2 %3123, %v2786_v20  }
 0x899   :  { %2805 = vperm.xlu2 %3123, %v2787_v1  }
 0x8a1   :  { %1447 = vperm.xlu2 %3123, %v1437_v11  }
 0x8a9   :  { %1457 = vperm.xlu2 %3123, %v1439_v44  }
 0x8b1   :  { %2905 = vperm.xlu2 %3123, %v1437_v11   ;;  %1330 = vperm.xlu1 %3122, %v2785_v48  }
 0x8b9   :  { %2915 = vperm.xlu2 %3123, %v1439_v44   ;;  %1335 = vperm.xlu1 %3122, %v2786_v20  }
 0x8c1   :  { %1475 = vperm.xlu2 %3123, %v1465_v29   ;;  %1340 = vperm.xlu1 %3122, %v2787_v1  }
 0x8c3   :  { %v2690_v22 = vpop.trf.xlu0  ;;  %v2754_v55 = vpop.trf.xlu1 }
 0x8c4   :  { %v2771_v24 = vperm.slane %v2690_v22, 0  ;;  %v2773_v23 = vperm.slane %v2754_v55, 0 }
 0x8c5   :  { %2790 = vperm.xlu0 %3121, %v1319_v30  }
 0x8c6   :  { %v2777_v57 = vmul.f32 %v2773_v23, %v2606_v61  ;;  %v2775_v37 = vmul.f32 %v2771_v24, %v4461_v14 }
 0x8c8   :  { %v2779_v52 = vpack.c.bf16 %v2777_v57, %v2776_v53  ;;  %v2778_v40 = vpack.c.bf16 %v2775_v37, %v2774_v63 }
 0x8c9   :  { %1485 = vperm.xlu2 %3123, %v1467_v6   ;;  %1442 = vperm.xlu1 %3122, %v1436_v18  }
 0x8ca   :  { %2830 = vmatpush.bf16.msra.mxu0 %v2779_v52 }
 0x8cd   :  { %2933 = vperm.xlu0 %3121, %v1465_v29  }
 0x8ce   :  { %2831 = vmatpush.bf16.msra.mxu0 %v2778_v40 }
 0x8d1   :  { %2938 = vperm.xlu2 %3123, %v2924_v54   ;;  %1452 = vperm.xlu1 %3122, %v1438_v49  }
 0x8d2   :  { %3095 = vmatmul.msk.bf16.vlgmr.msra.gmra.mxu0 %vm148_vm0, %v3111_v51 }
 0x8d9   :  { %2900 = vperm.xlu1 %3122, %v1436_v18  }
 0x8db   :  { %v1326_v14 = vpop.permute.xlu2 %1325 }
 0x8dc   :  { %v1369_v35 = vadd.f32 %v4100_v62, %v1326_v14 }
 0x8de   :  { %v1378_v38 = vsel %vm632_vm3, %v1369_v35, 0.0 }
 0x8e1   :  { %2910 = vperm.xlu1 %3122, %v1438_v49  }
 0x8e2   :  { %3096 = vmatmul.msk.bf16.gmra.mxu0 %vm148_vm0, %v3112_v41 }
 0x8e3   :  { %v4519_v17 = vpop.permute.xlu2 %2795 }
 0x8e9   :  { %1470 = vperm.xlu1 %3122, %v1464_v27  }
 0x8eb   :  { %v2801_v4 = vpop.permute.xlu2 %2800 }
 0x8f1   :  { %1480 = vperm.xlu1 %3122, %v2924_v54  }
 0x8f3   :  { %v2806_v0 = vpop.permute.xlu2 %2805 }
 0x8f9   :  { %2928 = vperm.xlu1 %3122, %v1464_v27  }
 0x8fb   :  { %v4531_v31 = vpop.permute.xlu2 %1447 }
 0x901   :  { %2943 = vperm.xlu1 %3122, %v1467_v6  }
 0x903   :  { %v1458_v55 = vpop.permute.xlu2 %1457 }
 0x90b   :  { %v4548_v63 = vpop.permute.xlu2 %2905 }
 0x923   :  { %v1331_v9 = vpop.permute.xlu1 %1330 }
 0x924   :  { %v1371_v43 = vadd.f32 %v4112_v28, %v1331_v9 }
 0x926   :  { %v1379_v36 = vsel %vm632_vm3, %v1371_v43, 0.0 }
 0x927   :  { %v1380_v25 = vadd.f32 %v1379_v36, %v1378_v38 }
 0x92b   :  { %v1336_v3 = vpop.permute.xlu1 %1335 }
 0x92c   :  { %v1374_v34 = vadd.f32 %v4047_v10, %v1336_v3  ;;  %v1394_v10 = vmul.f32 %v3465_v50, %v1393_v12 }
 0x92e   :  { %v1381_v56 = vsel %vm632_vm3, %v1374_v34, 0.0  ;;  %v1395_v58 = vadd.f32 %v3465_v50, %v1394_v10 }
 0x92f   :  { %v1382_v32 = vadd.f32 %v1381_v56, %v1380_v25 }
 0x930   :  { %v4529_v19 = vsel %vm1396_vm4, %v3465_v50, %v1395_v58 }
 0x933   :  { %v1341_v45 = vpop.permute.xlu1 %1340 }
 0x934   :  { %v1376_v46 = vadd.f32 %v4049_v26, %v1341_v45 }
 0x936   :  { %v1383_v28 = vsel %vm632_vm3, %v1376_v46, 0.0 }
 0x937   :  { %v1384_v62 = vadd.f32 %v1383_v28, %v1382_v32  ;;  %v2791_v9 = vpop.permute.xlu0 %2790 }
 0x939   :  { %v1385_v21 = vrot.slane %v1384_v62, 4 }
 0x93b   :  { %v1386_v8 = vadd.f32 %v1385_v21, %v1384_v62  ;;  %v4534_v15 = vpop.permute.xlu1 %1442 }
 0x93d   :  { %v1387_v61 = vrot.slane %v1386_v8, 2 }
 0x93f   :  { %v1388_v13 = vadd.f32 %v1387_v61, %v1386_v8 }
 0x941   :  { %v1389_v33 = vrot.slane %v1388_v13, 1 }
 0x943   :  { %v1390_v47 = vadd.f32 %v1389_v33, %v1388_v13  ;;  %v1453_v53 = vpop.permute.xlu1 %1452 }
 0x945   :  { %v1398_v26 = vmul.f32 %v4529_v19, %v1390_v47 }
 0x947   :  { %v4536_v2 = vsub.f32 %v1369_v35, %v1398_v26  ;;  %v1400_v60 = vsub.f32 %v1371_v43, %v1398_v26  ;;  %v4538_v30 = vsub.f32 %v1374_v34, %v1398_v26  ;;  %v1402_v48 = vsub.f32 %v1376_v46, %v1398_v26  ;;  %v4554_v43 = vpop.permute.xlu2 %2915 }
 0x949   :  { %v1403_v20 = vmul.f32 %v4536_v2, %v4536_v2  ;;  %v1404_v1 = vmul.f32 %v1400_v60, %v1400_v60  ;;  %v1405_v11 = vmul.f32 %v4538_v30, %v4538_v30  ;;  %v1406_v44 = vmul.f32 %v1402_v48, %v1402_v48 }
 0x94b   :  { %v1407_v42 = vsel %vm632_vm3, %v1403_v20, 0.0  ;;  %v1408_v29 = vsel %vm632_vm3, %v1404_v1, 0.0  ;;  %v1410_v7 = vsel %vm632_vm3, %v1405_v11, 0.0  ;;  %v1412_v24 = vsel %vm632_vm3, %v1406_v44, 0.0  ;;  %v4550_v54 = vpop.permute.xlu1 %2900 }
 0x94c   :  { %v1409_v59 = vadd.f32 %v1408_v29, %v1407_v42 }
 0x94e   :  { %v1411_v22 = vadd.f32 %v1410_v7, %v1409_v59 }
 0x94f   :  { %v2833_v23 = vpop.f32.mrf.mxu0  ;;  %v1476_v12 = vpop.permute.xlu2 %1475 }
 0x950   :  { %v1413_v5 = vadd.f32 %v1412_v24, %v1411_v22  ;;  %v2834_v16 = vadd.f32 %v2833_v23, %v2791_v9 }
 0x952   :  { %v1414_v57 = vrot.slane %v1413_v5, 4  ;;  %v2843_v50 = vsel %vm632_vm3, %v2834_v16, 0.0 }
 0x953   :  { %v4556_v35 = vpop.permute.xlu1 %2910 }
 0x954   :  { %v1415_v6 = vadd.f32 %v1414_v57, %v1413_v5 }
 0x956   :  { %v1416_v18 = vrot.slane %v1415_v6, 2 }
 0x957   :  { %v2835_v37 = vpop.f32.mrf.mxu0  ;;  %v1486_v59 = vpop.permute.xlu2 %1485 }
 0x958   :  { %v1417_v52 = vadd.f32 %v1416_v18, %v1415_v6  ;;  %v2836_v14 = vadd.f32 %v2835_v37, %v4519_v17 }
 0x95a   :  { %v1418_v40 = vrot.slane %v1417_v52, 1  ;;  %v2844_v34 = vsel %vm632_vm3, %v2836_v14, 0.0 }
 0x95b   :  { %v2845_v38 = vadd.f32 %v2844_v34, %v2843_v50  ;;  %v1471_v21 = vpop.permute.xlu1 %1470 }
 0x95c   :  { %v1419_v49 = vadd.f32 %v1418_v40, %v1417_v52 }
 0x95e   :  { %v1420_v51 = vmul.f32 %v1419_v49, %v4529_v19 }
 0x95f   :  { %v2838_v41 = vpop.f32.mrf.mxu0 }
 0x960   :  { %v1421_v27 = vadd.f32 1e-05, %v1420_v51  ;;  %v2839_v3 = vadd.f32 %v2838_v41, %v2801_v4 }
 0x962   :  { %3466 = vrsqrt.f32 %v1421_v27  ;;  %v2846_v36 = vsel %vm632_vm3, %v2839_v3, 0.0  ;;  %vm1428_vm6 = vweird.f32 %v1421_v27 }
 0x963   :  { %v2847_v17 = vadd.f32 %v2846_v36, %v2845_v38  ;;  %v1481_v5 = vpop.permute.xlu1 %1480 }
 0x967   :  { %v2840_v56 = vpop.f32.mrf.mxu0 }
 0x968   :  { %v3467_v39 = vpop.eup %3466  ;;  %v2841_v25 = vadd.f32 %v2840_v56, %v2806_v0 }
 0x969   :  { %v1423_v45 = vmul.f32 %v3467_v39, %v1421_v27  ;;  %vm1429_vm5 = vweird.f32 %v3467_v39 }
 0x96a   :  { %v2848_v46 = vsel %vm632_vm3, %v2841_v25, 0.0  ;;  %vm1430_vm7 = vmor %vm1428_vm6, %vm1429_vm5 }
 0x96b   :  { %v1424_v32 = vmul.f32 %v3467_v39, %v1423_v45  ;;  %v2849_v4 = vadd.f32 %v2848_v46, %v2847_v17  ;;  %v2929_v45 = vpop.permute.xlu1 %2928 }
 0x96d   :  { %v1425_v28 = vmul.f32 0.5, %v1424_v32  ;;  %v2850_v62 = vrot.slane %v2849_v4, 4 }
 0x96f   :  { %v1426_v10 = vsub.f32 1.5, %v1425_v28  ;;  %v2851_v8 = vadd.f32 %v2850_v62, %v2849_v4 }
 0x971   :  { %v1427_v61 = vmul.f32 %v3467_v39, %v1426_v10  ;;  %v2852_v58 = vrot.slane %v2851_v8, 2 }
 0x973   :  { %v1431_v13 = vsel %vm1430_vm7, %v3467_v39, %v1427_v61  ;;  %v2853_v33 = vadd.f32 %v2852_v58, %v2851_v8  ;;  %v2939_v61 = vpop.permute.xlu2 %2938  ;;  %v2934_v58 = vpop.permute.xlu0 %2933 }
 0x974   :  { %v1433_v0 = vmul.f32 %v1431_v13, %v1400_v60  ;;  %v1435_v47 = vmul.f32 %v1431_v13, %v1402_v48  ;;  %v1432_v26 = vmul.f32 %v1431_v13, %v4536_v2  ;;  %v1434_v20 = vmul.f32 %v1431_v13, %v4538_v30 }
 0x975   :  { %v2854_v1 = vrot.slane %v2853_v33, 1 }
 0x976   :  { %v1461_v11 = vmul.f32 %v4531_v31, %v1433_v0  ;;  %v1463_v44 = vmul.f32 %v1458_v55, %v1435_v47  ;;  %v1460_v42 = vmul.f32 %v4534_v15, %v1432_v26  ;;  %v1462_v29 = vmul.f32 %v1453_v53, %v1434_v20  ;;  %v2944_v47 = vpop.permute.xlu1 %2943 }
 0x977   :  { %v2855_v7 = vadd.f32 %v2854_v1, %v2853_v33 }
 0x978   :  { %v1489_v22 = vadd.f32 %v1476_v12, %v1461_v11  ;;  %v1491_v24 = vadd.f32 %v1486_v59, %v1463_v44  ;;  %v1488_v23 = vadd.f32 %v1471_v21, %v1460_v42  ;;  %v1490_v57 = vadd.f32 %v1481_v5, %v1462_v29 }
 0x979   :  { %v2856_v60 = vmul.f32 %v2855_v7, %v4529_v19 }
 0x97a   :  { %1493 = vst.msk [vmem:[#allocation2 + $0x8] sm:$0xff] %vm632_vm3, %v1489_v22 }
 0x97b   :  { %1495 = vst.msk [vmem:[#allocation2 + $0x18] sm:$0xff] %vm632_vm3, %v1491_v24  ;;  %v2860_v2 = vsub.f32 %v2841_v25, %v2856_v60  ;;  %v2857_v30 = vsub.f32 %v2834_v16, %v2856_v60  ;;  %v2858_v31 = vsub.f32 %v2836_v14, %v2856_v60  ;;  %v2859_v48 = vsub.f32 %v2839_v3, %v2856_v60 }
 0x97c   :  { %1492 = vst.msk [vmem:[#allocation2] sm:$0xff] %vm632_vm3, %v1488_v23 }
 0x97d   :  { %1494 = vst.msk [vmem:[#allocation2 + $0x10] sm:$0xff] %vm632_vm3, %v1490_v57  ;;  %v2861_v15 = vmul.f32 %v2857_v30, %v2857_v30  ;;  %v2862_v55 = vmul.f32 %v2858_v31, %v2858_v31  ;;  %v2863_v53 = vmul.f32 %v2859_v48, %v2859_v48  ;;  %v2864_v6 = vmul.f32 %v2860_v2, %v2860_v2 }
 0x97f   :  { %v2865_v18 = vsel %vm632_vm3, %v2861_v15, 0.0  ;;  %v2866_v37 = vsel %vm632_vm3, %v2862_v55, 0.0  ;;  %v2868_v40 = vsel %vm632_vm3, %v2863_v53, 0.0  ;;  %v2870_v51 = vsel %vm632_vm3, %v2864_v6, 0.0 }
 0x980   :  { %v2867_v52 = vadd.f32 %v2866_v37, %v2865_v18 }
 0x982   :  { %v2869_v49 = vadd.f32 %v2868_v40, %v2867_v52 }
 0x984   :  { %v2871_v41 = vadd.f32 %v2870_v51, %v2869_v49 }
 0x986   :  { %v2872_v27 = vrot.slane %v2871_v41, 4 }
 0x988   :  { %v2873_v14 = vadd.f32 %v2872_v27, %v2871_v41 }
 0x98a   :  { %v2874_v9 = vrot.slane %v2873_v14, 2 }
 0x98c   :  { %v2875_v16 = vadd.f32 %v2874_v9, %v2873_v14 }
 0x98e   :  { %v2876_v3 = vrot.slane %v2875_v16, 1 }
 0x990   :  { %v2877_v34 = vadd.f32 %v2876_v3, %v2875_v16 }
 0x992   :  { %v2878_v50 = vmul.f32 %v2877_v34, %v4529_v19 }
 0x994   :  { %v2879_v36 = vadd.f32 1e-05, %v2878_v50 }
 0x996   :  { %3468 = vrsqrt.f32 %v2879_v36  ;;  %vm2886_vm9 = vweird.f32 %v2879_v36 }
 0x99c   :  { %v3469_v38 = vpop.eup %3468 }
 0x99d   :  { %v2881_v56 = vmul.f32 %v3469_v38, %v2879_v36  ;;  %vm2887_vm8 = vweird.f32 %v3469_v38 }
 0x99e   :  { %vm2888_vm10 = vmor %vm2886_vm9, %vm2887_vm8 }
 0x99f   :  { %v2882_v39 = vmul.f32 %v3469_v38, %v2881_v56 }
 0x9a1   :  { %v2883_v25 = vmul.f32 0.5, %v2882_v39 }
 0x9a3   :  { %v2884_v17 = vsub.f32 1.5, %v2883_v25 }
 0x9a5   :  { %v2885_v46 = vmul.f32 %v3469_v38, %v2884_v17 }
 0x9a7   :  { %v2889_v32 = vsel %vm2888_vm10, %v3469_v38, %v2885_v46 }
 0x9a8   :  { %v2890_v4 = vmul.f32 %v2889_v32, %v2857_v30  ;;  %v2891_v12 = vmul.f32 %v2889_v32, %v2858_v31  ;;  %v2892_v28 = vmul.f32 %v2889_v32, %v2859_v48  ;;  %v2893_v62 = vmul.f32 %v2889_v32, %v2860_v2 }
 0x9aa   :  { %v2918_v21 = vmul.f32 %v4550_v54, %v2890_v4  ;;  %v2919_v19 = vmul.f32 %v4548_v63, %v2891_v12  ;;  %v2920_v10 = vmul.f32 %v4556_v35, %v2892_v28  ;;  %v2921_v8 = vmul.f32 %v4554_v43, %v2893_v62 }
 0x9ac   :  { %v2946_v13 = vadd.f32 %v2929_v45, %v2918_v21  ;;  %v2947_v33 = vadd.f32 %v2934_v58, %v2919_v19  ;;  %v2948_v0 = vadd.f32 %v2939_v61, %v2920_v10  ;;  %v2949_v26 = vadd.f32 %v2944_v47, %v2921_v8 }
 0x9ae   :  { %2951 = vst.msk [vmem:[#allocation2 + $0x20] sm:$0xff] %vm632_vm3, %v2946_v13 }
 0x9af   :  { %2952 = vst.msk [vmem:[#allocation2 + $0x28] sm:$0xff] %vm632_vm3, %v2947_v33 }
 0x9b0   :  { %2953 = vst.msk [vmem:[#allocation2 + $0x30] sm:$0xff] %vm632_vm3, %v2948_v0 }
 0x9b1   :  { %2954 = vst.msk [vmem:[#allocation2 + $0x38] sm:$0xff] %vm632_vm3, %v2949_v26 }
 0x9b2   :  { %2967 = dma.vmem_to_hbm [thread:$0]  %s2960_s5, 1024, %s2962_s23, [#allocation3], %s3499_s24, %s3499_s24, %s3500_s25  }
 0x9b3   :  { %3494 = dma.done.wait [#allocation3], 1024  }
 0x9b4   :  { %3495 = vsyncadd [#allocation3], 4294966272 }
 0x9b5   :  { %2972 = vsyncpa [#allocation3], 1 }

</bundles_post_ra>
